<compile_context>
chip_gen: v5e
topology: v5e:2x2
jax: 0.10.0
libtpu: 0.0.40
codegen_flags: <defaults>
</compile_context>

<pallas_src>
import jax
import jax.numpy as jnp
from jax.experimental import pallas as pl
from jax.experimental.pallas import tpu as pltpu


LANE = 128      # TPU vreg lane width  (last-dim alignment)
SUBLANE = 8     # TPU vreg sublane width (second-to-last-dim alignment)


def _round_up(x, m):
    return (x + m - 1) // m * m


def _row_tile(rows):
    # rows is always a multiple of SUBLANE here; pick the largest clean divisor.
    for cand in (512, 256, 128, 64, 32, 16, 8):
        if rows % cand == 0:
            return cand
    return rows


# ----------------- Kernel 1: hoisted input projection (big matmul) -----------
def _matmul_bias_kernel(x_ref, w_ref, b_ref, o_ref):
    o_ref[...] = (jnp.dot(x_ref[...], w_ref[...],
                          preferred_element_type=jnp.float32) + b_ref[...])


def input_projection_pallas(x2d, w_in, b_in):
    rows, k = x2d.shape
    n = w_in.shape[1]
    rt = _row_tile(rows)
    return pl.pallas_call(
        _matmul_bias_kernel,
        out_shape=jax.ShapeDtypeStruct((rows, n), jnp.float32),
        grid_spec=pltpu.PrefetchScalarGridSpec(
            num_scalar_prefetch=0,
            grid=(rows // rt,),
            in_specs=[
                pl.BlockSpec((rt, k), lambda i: (i, 0)),
                pl.BlockSpec((k, n), lambda i: (0, 0)),
                pl.BlockSpec((1, n), lambda i: (0, 0)),
            ],
            out_specs=pl.BlockSpec((rt, n), lambda i: (i, 0)),
        ),
        compiler_params=pltpu.CompilerParams(
            dimension_semantics=("parallel",)),
    )(x2d, w_in, b_in)


# ----------------- Kernel 2: bidirectional LSTM recurrence -------------------
def _lstm_recurrence_kernel(xg_ref, whh_ref, out_ref, h_sc, c_sc):
    # xg_ref : (T, Bp, 4*Hp)  precomputed x@wih + bias for THIS direction
    # whh_ref: (Hp, 4*Hp)     recurrent weights for THIS direction
    # out_ref: (T, Bp, Hp)    hidden states for THIS direction
    T = xg_ref.shape[0]
    Hp = h_sc.shape[-1]
    d = pl.program_id(0)            # 0 = forward, 1 = backward

    h_sc[...] = jnp.zeros_like(h_sc)
    c_sc[...] = jnp.zeros_like(c_sc)

    def sig(v):
        # sigmoid(x) = 0.5*tanh(0.5*x) + 0.5  -> single EUP op per gate
        return 0.5 * jnp.tanh(0.5 * v) + 0.5

    def body(t, carry):
        t_idx = jnp.where(d == 0, t, T - 1 - t)
        g = xg_ref[t_idx] + jnp.dot(h_sc[...], whh_ref[...],
                                    preferred_element_type=jnp.float32)
        # gate order (PyTorch): i, f, g, o — Hp is a multiple of 128, so each
        # slice below is lane-aligned.
        i = sig(g[:, 0 * Hp:1 * Hp])
        f = sig(g[:, 1 * Hp:2 * Hp])
        gg = jnp.tanh(g[:, 2 * Hp:3 * Hp])
        o = sig(g[:, 3 * Hp:4 * Hp])
        c_new = f * c_sc[...] + i * gg
        h_new = o * jnp.tanh(c_new)
        c_sc[...] = c_new
        h_sc[...] = h_new
        out_ref[t_idx] = h_new
        return carry

    jax.lax.fori_loop(0, T, body, 0, unroll=(T <= 16))


def bidir_lstm_pallas(xg, whh, Bp, Hp):
    # xg : (T, Bp, 8*Hp)  [fwd gates | bwd gates] along the lane axis
    # whh: (2, Hp, 4*Hp)
    T = xg.shape[0]
    return pl.pallas_call(
        _lstm_recurrence_kernel,
        out_shape=jax.ShapeDtypeStruct((2, T, Bp, Hp), jnp.float32),
        grid_spec=pltpu.PrefetchScalarGridSpec(
            num_scalar_prefetch=0,
            grid=(2,),     # direction axis; independent -> "parallel" (2 TCs on v7x)
            in_specs=[
                pl.BlockSpec((T, Bp, 4 * Hp), lambda d: (0, 0, d)),
                pl.BlockSpec((None, Hp, 4 * Hp), lambda d: (d, 0, 0)),
            ],
            out_specs=pl.BlockSpec((None, T, Bp, Hp), lambda d: (d, 0, 0, 0)),
            scratch_shapes=[pltpu.VMEM((Bp, Hp), jnp.float32)] * 2,  # h, c (f32)
        ),
        compiler_params=pltpu.CompilerParams(
            dimension_semantics=("parallel",)),
    )(xg, whh)


# ----------------- Kernel 3: Linear(2H -> H) over T*B rows (row-tiled) -------
def _linear2_kernel(xf_ref, xb_ref, w1_ref, w2_ref, b_ref, o_ref):
    o_ref[...] = (
        jnp.dot(xf_ref[...], w1_ref[...], preferred_element_type=jnp.float32)
        + jnp.dot(xb_ref[...], w2_ref[...], preferred_element_type=jnp.float32)
        + b_ref[...])


def linear_cat_pallas(xf2d, xb2d, w1, w2, b):
    rows, hp = xf2d.shape
    n = w1.shape[1]
    rt = _row_tile(rows)
    return pl.pallas_call(
        _linear2_kernel,
        out_shape=jax.ShapeDtypeStruct((rows, n), jnp.float32),
        grid_spec=pltpu.PrefetchScalarGridSpec(
            num_scalar_prefetch=0,
            grid=(rows // rt,),
            in_specs=[
                pl.BlockSpec((rt, hp), lambda i: (i, 0)),
                pl.BlockSpec((rt, hp), lambda i: (i, 0)),
                pl.BlockSpec((hp, n), lambda i: (0, 0)),
                pl.BlockSpec((hp, n), lambda i: (0, 0)),
                pl.BlockSpec((1, n), lambda i: (0, 0)),
            ],
            out_specs=pl.BlockSpec((rt, n), lambda i: (i, 0)),
        ),
        compiler_params=pltpu.CompilerParams(
            dimension_semantics=("parallel",)),
    )(xf2d, xb2d, w1, w2, b)


# ----------------- weight padding / packing (one-time, lane-aligned) ---------
def _prepare_padded_params(params, H, Hp, Hout, Houtp):
    def pad_gate_cols(w):                       # (K, 4H) -> (K, 4Hp), per-gate zero pad
        k = w.shape[0]
        return jnp.pad(w.reshape(k, 4, H),
                       ((0, 0), (0, 0), (0, Hp - H))).reshape(k, 4 * Hp)

    def pad_gate_bias(b):                       # (1, 4H) -> (1, 4Hp)
        return jnp.pad(b.reshape(4, H), ((0, 0), (0, Hp - H))).reshape(1, 4 * Hp)

    # combined input-projection weight/bias: columns [fwd gates | bwd gates]
    w_in = jnp.concatenate(
        [pad_gate_cols(params["wih_f"]), pad_gate_cols(params["wih_b"])], axis=1)
    b_in = jnp.concatenate(
        [pad_gate_bias(params["b_f"]), pad_gate_bias(params["b_b"])], axis=1)

    def pad_whh(w):                             # (H, 4H) -> (Hp, 4Hp), zero K rows
        return jnp.pad(pad_gate_cols(w), ((0, Hp - H), (0, 0)))

    whh = jnp.stack([pad_whh(params["whh_f"]), pad_whh(params["whh_b"])])

    # Linear(2H, Hout): split into fwd/bwd halves, transpose, zero-pad K and N
    w_lin = params["w_lin"]                     # (Hout, 2H) PyTorch layout
    w1 = jnp.pad(w_lin[:, :H].T, ((0, Hp - H), (0, Houtp - Hout)))
    w2 = jnp.pad(w_lin[:, H:].T, ((0, Hp - H), (0, Houtp - Hout)))
    b_lin = jnp.pad(params["b_lin"], (0, Houtp - Hout)).reshape(1, Houtp)
    return w_in, b_in, whh, w1, w2, b_lin


def bidirectional_lstm_forward(x, params):
    T, B, nIn = x.shape
    H = params["whh_f"].shape[0]                # whh stored transposed: (H, 4H)
    Hout = params["w_lin"].shape[0]
    Bp = _round_up(B, SUBLANE)
    Hp = _round_up(H, LANE)
    Houtp = _round_up(Hout, LANE)

    w_in, b_in, whh, w1, w2, b_lin = _prepare_padded_params(
        params, H, Hp, Hout, Houtp)

    # pad batch to a sublane multiple; padded rows are sliced away at the end
    x_p = jnp.pad(x, ((0, 0), (0, Bp - B), (0, 0)))
    x2d = x_p.reshape(T * Bp, nIn)

    # Kernel 1: one big MXU matmul for all timesteps / both directions (+bias)
    xg = input_projection_pallas(x2d, w_in, b_in).reshape(T, Bp, 8 * Hp)

    # Kernel 2: recurrence (only h@whh + elementwise gates per step)
    out = bidir_lstm_pallas(xg, whh, Bp, Hp)    # (2, T, Bp, Hp)

    # Kernel 3: Linear(2H -> H) as two matmuls (no concat needed)
    xf2d = out[0].reshape(T * Bp, Hp)
    xb2d = out[1].reshape(T * Bp, Hp)
    y2d = linear_cat_pallas(xf2d, xb2d, w1, w2, b_lin)
    return y2d.reshape(T, Bp, Houtp)[:, :B, :Hout]


# ------------------------------ Param init (deterministic) -------------------
def init_params(key, nIn, H):
    kb = 1.0 / float(jnp.sqrt(H))
    keys = jax.random.split(key, 10)

    def u(kk, shape, bound):
        return jax.random.uniform(kk, shape, jnp.float32, -bound, bound)

    # PyTorch nn.LSTM params: weight_ih (4H, nIn), weight_hh (4H, H), biases (4H,)
    wih_f = u(keys[0], (4 * H, nIn), kb)
    whh_f = u(keys[1], (4 * H, H), kb)
    bih_f = u(keys[2], (4 * H,), kb)
    bhh_f = u(keys[3], (4 * H,), kb)
    wih_b = u(keys[4], (4 * H, nIn), kb)
    whh_b = u(keys[5], (4 * H, H), kb)
    bih_b = u(keys[6], (4 * H,), kb)
    bhh_b = u(keys[7], (4 * H,), kb)
    # nn.Linear(2H, H): weight (H, 2H), bias (H,)
    kl = 1.0 / float(jnp.sqrt(2 * H))
    w_lin = u(keys[8], (H, 2 * H), kl)
    b_lin = u(keys[9], (H,), kl)
    return dict(
        wih_f=wih_f.T, whh_f=whh_f.T, b_f=(bih_f + bhh_f).reshape(1, 4 * H),
        wih_b=wih_b.T, whh_b=whh_b.T, b_b=(bih_b + bhh_b).reshape(1, 4 * H),
        w_lin=w_lin, b_lin=b_lin,
    )


# ------------------------------ Pure-JAX reference ---------------------------
def ref_forward(x, p):
    T, B, nIn = x.shape
    H = p["whh_f"].shape[0]

    def cell(carry, x_t, wih_t, whh_t, bias):
        h, c = carry
        g = x_t @ wih_t + h @ whh_t + bias
        i = jax.nn.sigmoid(g[:, :H])
        f = jax.nn.sigmoid(g[:, H:2 * H])
        gg = jnp.tanh(g[:, 2 * H:3 * H])
        o = jax.nn.sigmoid(g[:, 3 * H:])
        c = f * c + i * gg
        h = o * jnp.tanh(c)
        return (h, c), h

    init = (jnp.zeros((B, H), jnp.float32), jnp.zeros((B, H), jnp.float32))
    _, hf = jax.lax.scan(
        lambda carry, x_t: cell(carry, x_t, p["wih_f"], p["whh_f"], p["b_f"]),
        init, x)
    _, hb_rev = jax.lax.scan(
        lambda carry, x_t: cell(carry, x_t, p["wih_b"], p["whh_b"], p["b_b"]),
        init, x[::-1])
    hb = hb_rev[::-1]
    out = jnp.concatenate([hf, hb], axis=-1)            # (T, B, 2H)
    y = out.reshape(T * B, 2 * H) @ p["w_lin"].T + p["b_lin"]
    return y.reshape(T, B, H)


if __name__ == "__main__":
    T, B, nIn, H = 8, 2, 16, 32
    key = jax.random.PRNGKey(0)
    kx, kp = jax.random.split(key)
    x = jax.random.normal(kx, (T, B, nIn), jnp.float32)
    params = init_params(kp, nIn, H)

    fwd = jax.jit(bidirectional_lstm_forward)
    y = jax.block_until_ready(fwd(x, params))

    y_ref = jax.block_until_ready(ref_forward(x, params))
    assert y.shape == (T, B, H), y.shape
    assert jnp.allclose(y, y_ref, rtol=1e-3, atol=1e-3), \
        float(jnp.max(jnp.abs(y - y_ref)))

    print("KERNEL_OK")
</pallas_src>

<mosaic_0001>
module attributes {stable_mosaic.version = 11 : i64} {
  func.func @_matmul_bias_kernel(%arg0: i32, %arg1: memref<64x16xf32, #tpu.memory_space<vmem>>, %arg2: memref<16x1024xf32, #tpu.memory_space<vmem>>, %arg3: memref<1x1024xf32, #tpu.memory_space<vmem>>, %arg4: memref<64x1024xf32, #tpu.memory_space<vmem>>) attributes {dimension_semantics = [#tpu.dimension_semantics<parallel>], iteration_bounds = array<i64: 1>, scalar_prefetch = 0 : i64, scratch_operands = 0 : i64, tpu.core_type = #tpu.core_type<tc>, window_params = [{transform_indices = @transform_0, window_bounds = array<i64: 64, 16>}, {pipeline_mode = #tpu.pipeline_mode<synchronous>, transform_indices = @transform_1, window_bounds = array<i64: 16, 1024>}, {pipeline_mode = #tpu.pipeline_mode<synchronous>, transform_indices = @transform_2, window_bounds = array<i64: 1, 1024>}, {transform_indices = @transform_3, window_bounds = array<i64: 64, 1024>}]} {
    %c0 = arith.constant 0 : index
    %c0_0 = arith.constant 0 : index
    %0 = vector.load %arg1[%c0, %c0_0] : memref<64x16xf32, #tpu.memory_space<vmem>>, vector<64x16xf32>
    %c0_1 = arith.constant 0 : index
    %c0_2 = arith.constant 0 : index
    %1 = vector.load %arg2[%c0_1, %c0_2] : memref<16x1024xf32, #tpu.memory_space<vmem>>, vector<16x1024xf32>
    %cst = arith.constant dense<0.000000e+00> : vector<64x1024xf32>
    %2 = tpu.matmul %0, %1, %cst {dimension_numbers = #tpu.dot_dimension_numbers<[1], [0], [0], [1], [0, 0, 1, 1], [], []>} : vector<64x16xf32>, vector<16x1024xf32>, vector<64x1024xf32> -> vector<64x1024xf32>
    %c0_3 = arith.constant 0 : index
    %c0_4 = arith.constant 0 : index
    %3 = vector.load %arg3[%c0_3, %c0_4] : memref<1x1024xf32, #tpu.memory_space<vmem>>, vector<1x1024xf32>
    %4 = vector.broadcast %3 : vector<1x1024xf32> to vector<64x1024xf32>
    %5 = arith.addf %2, %4 : vector<64x1024xf32>
    %c0_5 = arith.constant 0 : index
    %c0_6 = arith.constant 0 : index
    %6 = vector.load %arg4[%c0_5, %c0_6] : memref<64x1024xf32, #tpu.memory_space<vmem>>, vector<64x1024xf32>
    tpu.vector_store %arg4[%c0_5, %c0_6], %5 {strides = array<i32>} : memref<64x1024xf32, #tpu.memory_space<vmem>>, vector<64x1024xf32>,
    return
  }
  func.func @transform_0(%arg0: i32) -> (i32, i32) {
    %c0_i32 = arith.constant 0 : i32
    %c0_i32_0 = arith.constant 0 : i32
    return %arg0, %c0_i32 : i32, i32
  }
  func.func @transform_1(%arg0: i32) -> (i32, i32) {
    %c0_i32 = arith.constant 0 : i32
    %c0_i32_0 = arith.constant 0 : i32
    %c0_i32_1 = arith.constant 0 : i32
    return %c0_i32, %c0_i32_0 : i32, i32
  }
  func.func @transform_2(%arg0: i32) -> (i32, i32) {
    %c0_i32 = arith.constant 0 : i32
    %c0_i32_0 = arith.constant 0 : i32
    %c0_i32_1 = arith.constant 0 : i32
    return %c0_i32, %c0_i32_0 : i32, i32
  }
  func.func @transform_3(%arg0: i32) -> (i32, i32) {
    %c0_i32 = arith.constant 0 : i32
    %c0_i32_0 = arith.constant 0 : i32
    return %arg0, %c0_i32 : i32, i32
  }
}

module attributes {stable_mosaic.version = 11 : i64} {
  func.func @_lstm_recurrence_kernel(%arg0: i32, %arg1: memref<8x8x512xf32, #tpu.memory_space<vmem>>, %arg2: memref<1x128x512xf32, #tpu.memory_space<vmem>>, %arg3: memref<1x8x8x128xf32, #tpu.memory_space<vmem>>, %arg4: memref<8x128xf32, #tpu.memory_space<vmem>>, %arg5: memref<8x128xf32, #tpu.memory_space<vmem>>) attributes {dimension_semantics = [#tpu.dimension_semantics<parallel>], iteration_bounds = array<i64: 2>, scalar_prefetch = 0 : i64, scratch_operands = 2 : i64, tpu.core_type = #tpu.core_type<tc>, window_params = [{transform_indices = @transform_0, window_bounds = array<i64: 8, 8, 512>}, {transform_indices = @transform_1, window_bounds = array<i64: 1, 128, 512>}, {transform_indices = @transform_2, window_bounds = array<i64: 1, 8, 8, 128>}]} {
    %cst = arith.constant 0.000000e+00 : f32
    %0 = vector.broadcast %cst : f32 to vector<8x128xf32>
    %c0 = arith.constant 0 : index
    %c0_0 = arith.constant 0 : index
    %1 = vector.load %arg4[%c0, %c0_0] : memref<8x128xf32, #tpu.memory_space<vmem>>, vector<8x128xf32>
    tpu.vector_store %arg4[%c0, %c0_0], %0 {strides = array<i32>} : memref<8x128xf32, #tpu.memory_space<vmem>>, vector<8x128xf32>,
    %cst_1 = arith.constant 0.000000e+00 : f32
    %2 = vector.broadcast %cst_1 : f32 to vector<8x128xf32>
    %c0_2 = arith.constant 0 : index
    %c0_3 = arith.constant 0 : index
    %3 = vector.load %arg5[%c0_2, %c0_3] : memref<8x128xf32, #tpu.memory_space<vmem>>, vector<8x128xf32>
    tpu.vector_store %arg5[%c0_2, %c0_3], %2 {strides = array<i32>} : memref<8x128xf32, #tpu.memory_space<vmem>>, vector<8x128xf32>,
    %c0_i32 = arith.constant 0 : i32
    %c0_i32_4 = arith.constant 0 : i32
    %4 = arith.cmpi eq, %arg0, %c0_i32_4 : i32
    %c7_i32 = arith.constant 7 : i32
    %5 = arith.subi %c7_i32, %c0_i32 : i32
    %6 = arith.select %4, %c0_i32, %5 : i32
    %7 = arith.index_cast %6 : i32 to index
    %c0_5 = arith.constant 0 : index
    %c0_6 = arith.constant 0 : index
    %8 = vector.load %arg1[%7, %c0_5, %c0_6] : memref<8x8x512xf32, #tpu.memory_space<vmem>>, vector<1x8x512xf32>
    %9 = vector.shape_cast %8 : vector<1x8x512xf32> to vector<8x512xf32>
    %c0_7 = arith.constant 0 : index
    %c0_8 = arith.constant 0 : index
    %10 = vector.load %arg4[%c0_7, %c0_8] : memref<8x128xf32, #tpu.memory_space<vmem>>, vector<8x128xf32>
    %c0_9 = arith.constant 0 : index
    %c0_10 = arith.constant 0 : index
    %c0_11 = arith.constant 0 : index
    %11 = vector.load %arg2[%c0_9, %c0_10, %c0_11] : memref<1x128x512xf32, #tpu.memory_space<vmem>>, vector<1x128x512xf32>
    %12 = vector.shape_cast %11 : vector<1x128x512xf32> to vector<128x512xf32>
    %cst_12 = arith.constant dense<0.000000e+00> : vector<8x512xf32>
    %13 = tpu.matmul %10, %12, %cst_12 {dimension_numbers = #tpu.dot_dimension_numbers<[1], [0], [0], [1], [0, 0, 1, 1], [], []>} : vector<8x128xf32>, vector<128x512xf32>, vector<8x512xf32> -> vector<8x512xf32>
    %14 = arith.addf %9, %13 : vector<8x512xf32>
    %15 = vector.extract_strided_slice %14 {offsets = [0, 0], sizes = [8, 128], strides = [1, 1]} : vector<8x512xf32> to vector<8x128xf32>
    %cst_13 = arith.constant 5.000000e-01 : f32
    %16 = vector.broadcast %cst_13 : f32 to vector<8x128xf32>
    %17 = arith.mulf %16, %15 : vector<8x128xf32>
    %18 = math.tanh %17 : vector<8x128xf32>
    %cst_14 = arith.constant 5.000000e-01 : f32
    %19 = vector.broadcast %cst_14 : f32 to vector<8x128xf32>
    %20 = arith.mulf %19, %18 : vector<8x128xf32>
    %cst_15 = arith.constant 5.000000e-01 : f32
    %21 = vector.broadcast %cst_15 : f32 to vector<8x128xf32>
    %22 = arith.addf %20, %21 : vector<8x128xf32>
    %23 = vector.extract_strided_slice %14 {offsets = [0, 128], sizes = [8, 128], strides = [1, 1]} : vector<8x512xf32> to vector<8x128xf32>
    %cst_16 = arith.constant 5.000000e-01 : f32
    %24 = vector.broadcast %cst_16 : f32 to vector<8x128xf32>
    %25 = arith.mulf %24, %23 : vector<8x128xf32>
    %26 = math.tanh %25 : vector<8x128xf32>
    %cst_17 = arith.constant 5.000000e-01 : f32
    %27 = vector.broadcast %cst_17 : f32 to vector<8x128xf32>
    %28 = arith.mulf %27, %26 : vector<8x128xf32>
    %cst_18 = arith.constant 5.000000e-01 : f32
    %29 = vector.broadcast %cst_18 : f32 to vector<8x128xf32>
    %30 = arith.addf %28, %29 : vector<8x128xf32>
    %31 = vector.extract_strided_slice %14 {offsets = [0, 256], sizes = [8, 128], strides = [1, 1]} : vector<8x512xf32> to vector<8x128xf32>
    %32 = math.tanh %31 : vector<8x128xf32>
    %33 = vector.extract_strided_slice %14 {offsets = [0, 384], sizes = [8, 128], strides = [1, 1]} : vector<8x512xf32> to vector<8x128xf32>
    %cst_19 = arith.constant 5.000000e-01 : f32
    %34 = vector.broadcast %cst_19 : f32 to vector<8x128xf32>
    %35 = arith.mulf %34, %33 : vector<8x128xf32>
    %36 = math.tanh %35 : vector<8x128xf32>
    %cst_20 = arith.constant 5.000000e-01 : f32
    %37 = vector.broadcast %cst_20 : f32 to vector<8x128xf32>
    %38 = arith.mulf %37, %36 : vector<8x128xf32>
    %cst_21 = arith.constant 5.000000e-01 : f32
    %39 = vector.broadcast %cst_21 : f32 to vector<8x128xf32>
    %40 = arith.addf %38, %39 : vector<8x128xf32>
    %c0_22 = arith.constant 0 : index
    %c0_23 = arith.constant 0 : index
    %41 = vector.load %arg5[%c0_22, %c0_23] : memref<8x128xf32, #tpu.memory_space<vmem>>, vector<8x128xf32>
    %42 = arith.mulf %30, %41 : vector<8x128xf32>
    %43 = arith.mulf %22, %32 : vector<8x128xf32>
    %44 = arith.addf %42, %43 : vector<8x128xf32>
    %45 = math.tanh %44 : vector<8x128xf32>
    %46 = arith.mulf %40, %45 : vector<8x128xf32>
    %c0_24 = arith.constant 0 : index
    %c0_25 = arith.constant 0 : index
    %47 = vector.load %arg5[%c0_24, %c0_25] : memref<8x128xf32, #tpu.memory_space<vmem>>, vector<8x128xf32>
    tpu.vector_store %arg5[%c0_24, %c0_25], %44 {strides = array<i32>} : memref<8x128xf32, #tpu.memory_space<vmem>>, vector<8x128xf32>,
    %c0_26 = arith.constant 0 : index
    %c0_27 = arith.constant 0 : index
    %48 = vector.load %arg4[%c0_26, %c0_27] : memref<8x128xf32, #tpu.memory_space<vmem>>, vector<8x128xf32>
    tpu.vector_store %arg4[%c0_26, %c0_27], %46 {strides = array<i32>} : memref<8x128xf32, #tpu.memory_space<vmem>>, vector<8x128xf32>,
    %c0_28 = arith.constant 0 : index
    %49 = arith.index_cast %6 : i32 to index
    %c0_29 = arith.constant 0 : index
    %c0_30 = arith.constant 0 : index
    %50 = vector.load %arg3[%c0_28, %49, %c0_29, %c0_30] : memref<1x8x8x128xf32, #tpu.memory_space<vmem>>, vector<1x1x8x128xf32>
    %51 = vector.shape_cast %50 : vector<1x1x8x128xf32> to vector<8x128xf32>
    %52 = vector.shape_cast %46 : vector<8x128xf32> to vector<1x1x8x128xf32>
    tpu.vector_store %arg3[%c0_28, %49, %c0_29, %c0_30], %52 {strides = array<i32>} : memref<1x8x8x128xf32, #tpu.memory_space<vmem>>, vector<1x1x8x128xf32>,
    %c1_i32 = arith.constant 1 : i32
    %c0_i32_31 = arith.constant 0 : i32
    %53 = arith.cmpi eq, %arg0, %c0_i32_31 : i32
    %c7_i32_32 = arith.constant 7 : i32
    %54 = arith.subi %c7_i32_32, %c1_i32 : i32
    %55 = arith.select %53, %c1_i32, %54 : i32
    %56 = arith.index_cast %55 : i32 to index
    %c0_33 = arith.constant 0 : index
    %c0_34 = arith.constant 0 : index
    %57 = vector.load %arg1[%56, %c0_33, %c0_34] : memref<8x8x512xf32, #tpu.memory_space<vmem>>, vector<1x8x512xf32>
    %58 = vector.shape_cast %57 : vector<1x8x512xf32> to vector<8x512xf32>
    %c0_35 = arith.constant 0 : index
    %c0_36 = arith.constant 0 : index
    %59 = vector.load %arg4[%c0_35, %c0_36] : memref<8x128xf32, #tpu.memory_space<vmem>>, vector<8x128xf32>
    %c0_37 = arith.constant 0 : index
    %c0_38 = arith.constant 0 : index
    %c0_39 = arith.constant 0 : index
    %60 = vector.load %arg2[%c0_37, %c0_38, %c0_39] : memref<1x128x512xf32, #tpu.memory_space<vmem>>, vector<1x128x512xf32>
    %61 = vector.shape_cast %60 : vector<1x128x512xf32> to vector<128x512xf32>
    %cst_40 = arith.constant dense<0.000000e+00> : vector<8x512xf32>
    %62 = tpu.matmul %59, %61, %cst_40 {dimension_numbers = #tpu.dot_dimension_numbers<[1], [0], [0], [1], [0, 0, 1, 1], [], []>} : vector<8x128xf32>, vector<128x512xf32>, vector<8x512xf32> -> vector<8x512xf32>
    %63 = arith.addf %58, %62 : vector<8x512xf32>
    %64 = vector.extract_strided_slice %63 {offsets = [0, 0], sizes = [8, 128], strides = [1, 1]} : vector<8x512xf32> to vector<8x128xf32>
    %cst_41 = arith.constant 5.000000e-01 : f32
    %65 = vector.broadcast %cst_41 : f32 to vector<8x128xf32>
    %66 = arith.mulf %65, %64 : vector<8x128xf32>
    %67 = math.tanh %66 : vector<8x128xf32>
    %cst_42 = arith.constant 5.000000e-01 : f32
    %68 = vector.broadcast %cst_42 : f32 to vector<8x128xf32>
    %69 = arith.mulf %68, %67 : vector<8x128xf32>
    %cst_43 = arith.constant 5.000000e-01 : f32
    %70 = vector.broadcast %cst_43 : f32 to vector<8x128xf32>
    %71 = arith.addf %69, %70 : vector<8x128xf32>
    %72 = vector.extract_strided_slice %63 {offsets = [0, 128], sizes = [8, 128], strides = [1, 1]} : vector<8x512xf32> to vector<8x128xf32>
    %cst_44 = arith.constant 5.000000e-01 : f32
    %73 = vector.broadcast %cst_44 : f32 to vector<8x128xf32>
    %74 = arith.mulf %73, %72 : vector<8x128xf32>
    %75 = math.tanh %74 : vector<8x128xf32>
    %cst_45 = arith.constant 5.000000e-01 : f32
    %76 = vector.broadcast %cst_45 : f32 to vector<8x128xf32>
    %77 = arith.mulf %76, %75 : vector<8x128xf32>
    %cst_46 = arith.constant 5.000000e-01 : f32
    %78 = vector.broadcast %cst_46 : f32 to vector<8x128xf32>
    %79 = arith.addf %77, %78 : vector<8x128xf32>
    %80 = vector.extract_strided_slice %63 {offsets = [0, 256], sizes = [8, 128], strides = [1, 1]} : vector<8x512xf32> to vector<8x128xf32>
    %81 = math.tanh %80 : vector<8x128xf32>
    %82 = vector.extract_strided_slice %63 {offsets = [0, 384], sizes = [8, 128], strides = [1, 1]} : vector<8x512xf32> to vector<8x128xf32>
    %cst_47 = arith.constant 5.000000e-01 : f32
    %83 = vector.broadcast %cst_47 : f32 to vector<8x128xf32>
    %84 = arith.mulf %83, %82 : vector<8x128xf32>
    %85 = math.tanh %84 : vector<8x128xf32>
    %cst_48 = arith.constant 5.000000e-01 : f32
    %86 = vector.broadcast %cst_48 : f32 to vector<8x128xf32>
    %87 = arith.mulf %86, %85 : vector<8x128xf32>
    %cst_49 = arith.constant 5.000000e-01 : f32
    %88 = vector.broadcast %cst_49 : f32 to vector<8x128xf32>
    %89 = arith.addf %87, %88 : vector<8x128xf32>
    %c0_50 = arith.constant 0 : index
    %c0_51 = arith.constant 0 : index
    %90 = vector.load %arg5[%c0_50, %c0_51] : memref<8x128xf32, #tpu.memory_space<vmem>>, vector<8x128xf32>
    %91 = arith.mulf %79, %90 : vector<8x128xf32>
    %92 = arith.mulf %71, %81 : vector<8x128xf32>
    %93 = arith.addf %91, %92 : vector<8x128xf32>
    %94 = math.tanh %93 : vector<8x128xf32>
    %95 = arith.mulf %89, %94 : vector<8x128xf32>
    %c0_52 = arith.constant 0 : index
    %c0_53 = arith.constant 0 : index
    %96 = vector.load %arg5[%c0_52, %c0_53] : memref<8x128xf32, #tpu.memory_space<vmem>>, vector<8x128xf32>
    tpu.vector_store %arg5[%c0_52, %c0_53], %93 {strides = array<i32>} : memref<8x128xf32, #tpu.memory_space<vmem>>, vector<8x128xf32>,
    %c0_54 = arith.constant 0 : index
    %c0_55 = arith.constant 0 : index
    %97 = vector.load %arg4[%c0_54, %c0_55] : memref<8x128xf32, #tpu.memory_space<vmem>>, vector<8x128xf32>
    tpu.vector_store %arg4[%c0_54, %c0_55], %95 {strides = array<i32>} : memref<8x128xf32, #tpu.memory_space<vmem>>, vector<8x128xf32>,
    %c0_56 = arith.constant 0 : index
    %98 = arith.index_cast %55 : i32 to index
    %c0_57 = arith.constant 0 : index
    %c0_58 = arith.constant 0 : index
    %99 = vector.load %arg3[%c0_56, %98, %c0_57, %c0_58] : memref<1x8x8x128xf32, #tpu.memory_space<vmem>>, vector<1x1x8x128xf32>
    %100 = vector.shape_cast %99 : vector<1x1x8x128xf32> to vector<8x128xf32>
    %101 = vector.shape_cast %95 : vector<8x128xf32> to vector<1x1x8x128xf32>
    tpu.vector_store %arg3[%c0_56, %98, %c0_57, %c0_58], %101 {strides = array<i32>} : memref<1x8x8x128xf32, #tpu.memory_space<vmem>>, vector<1x1x8x128xf32>,
    %c2_i32 = arith.constant 2 : i32
    %c0_i32_59 = arith.constant 0 : i32
    %102 = arith.cmpi eq, %arg0, %c0_i32_59 : i32
    %c7_i32_60 = arith.constant 7 : i32
    %103 = arith.subi %c7_i32_60, %c2_i32 : i32
    %104 = arith.select %102, %c2_i32, %103 : i32
    %105 = arith.index_cast %104 : i32 to index
    %c0_61 = arith.constant 0 : index
    %c0_62 = arith.constant 0 : index
    %106 = vector.load %arg1[%105, %c0_61, %c0_62] : memref<8x8x512xf32, #tpu.memory_space<vmem>>, vector<1x8x512xf32>
    %107 = vector.shape_cast %106 : vector<1x8x512xf32> to vector<8x512xf32>
    %c0_63 = arith.constant 0 : index
    %c0_64 = arith.constant 0 : index
    %108 = vector.load %arg4[%c0_63, %c0_64] : memref<8x128xf32, #tpu.memory_space<vmem>>, vector<8x128xf32>
    %c0_65 = arith.constant 0 : index
    %c0_66 = arith.constant 0 : index
    %c0_67 = arith.constant 0 : index
    %109 = vector.load %arg2[%c0_65, %c0_66, %c0_67] : memref<1x128x512xf32, #tpu.memory_space<vmem>>, vector<1x128x512xf32>
    %110 = vector.shape_cast %109 : vector<1x128x512xf32> to vector<128x512xf32>
    %cst_68 = arith.constant dense<0.000000e+00> : vector<8x512xf32>
    %111 = tpu.matmul %108, %110, %cst_68 {dimension_numbers = #tpu.dot_dimension_numbers<[1], [0], [0], [1], [0, 0, 1, 1], [], []>} : vector<8x128xf32>, vector<128x512xf32>, vector<8x512xf32> -> vector<8x512xf32>
    %112 = arith.addf %107, %111 : vector<8x512xf32>
    %113 = vector.extract_strided_slice %112 {offsets = [0, 0], sizes = [8, 128], strides = [1, 1]} : vector<8x512xf32> to vector<8x128xf32>
    %cst_69 = arith.constant 5.000000e-01 : f32
    %114 = vector.broadcast %cst_69 : f32 to vector<8x128xf32>
    %115 = arith.mulf %114, %113 : vector<8x128xf32>
    %116 = math.tanh %115 : vector<8x128xf32>
    %cst_70 = arith.constant 5.000000e-01 : f32
    %117 = vector.broadcast %cst_70 : f32 to vector<8x128xf32>
    %118 = arith.mulf %117, %116 : vector<8x128xf32>
    %cst_71 = arith.constant 5.000000e-01 : f32
    %119 = vector.broadcast %cst_71 : f32 to vector<8x128xf32>
    %120 = arith.addf %118, %119 : vector<8x128xf32>
    %121 = vector.extract_strided_slice %112 {offsets = [0, 128], sizes = [8, 128], strides = [1, 1]} : vector<8x512xf32> to vector<8x128xf32>
    %cst_72 = arith.constant 5.000000e-01 : f32
    %122 = vector.broadcast %cst_72 : f32 to vector<8x128xf32>
    %123 = arith.mulf %122, %121 : vector<8x128xf32>
    %124 = math.tanh %123 : vector<8x128xf32>
    %cst_73 = arith.constant 5.000000e-01 : f32
    %125 = vector.broadcast %cst_73 : f32 to vector<8x128xf32>
    %126 = arith.mulf %125, %124 : vector<8x128xf32>
    %cst_74 = arith.constant 5.000000e-01 : f32
    %127 = vector.broadcast %cst_74 : f32 to vector<8x128xf32>
    %128 = arith.addf %126, %127 : vector<8x128xf32>
    %129 = vector.extract_strided_slice %112 {offsets = [0, 256], sizes = [8, 128], strides = [1, 1]} : vector<8x512xf32> to vector<8x128xf32>
    %130 = math.tanh %129 : vector<8x128xf32>
    %131 = vector.extract_strided_slice %112 {offsets = [0, 384], sizes = [8, 128], strides = [1, 1]} : vector<8x512xf32> to vector<8x128xf32>
    %cst_75 = arith.constant 5.000000e-01 : f32
    %132 = vector.broadcast %cst_75 : f32 to vector<8x128xf32>
    %133 = arith.mulf %132, %131 : vector<8x128xf32>
    %134 = math.tanh %133 : vector<8x128xf32>
    %cst_76 = arith.constant 5.000000e-01 : f32
    %135 = vector.broadcast %cst_76 : f32 to vector<8x128xf32>
    %136 = arith.mulf %135, %134 : vector<8x128xf32>
    %cst_77 = arith.constant 5.000000e-01 : f32
    %137 = vector.broadcast %cst_77 : f32 to vector<8x128xf32>
    %138 = arith.addf %136, %137 : vector<8x128xf32>
    %c0_78 = arith.constant 0 : index
    %c0_79 = arith.constant 0 : index
    %139 = vector.load %arg5[%c0_78, %c0_79] : memref<8x128xf32, #tpu.memory_space<vmem>>, vector<8x128xf32>
    %140 = arith.mulf %128, %139 : vector<8x128xf32>
    %141 = arith.mulf %120, %130 : vector<8x128xf32>
    %142 = arith.addf %140, %141 : vector<8x128xf32>
    %143 = math.tanh %142 : vector<8x128xf32>
    %144 = arith.mulf %138, %143 : vector<8x128xf32>
    %c0_80 = arith.constant 0 : index
    %c0_81 = arith.constant 0 : index
    %145 = vector.load %arg5[%c0_80, %c0_81] : memref<8x128xf32, #tpu.memory_space<vmem>>, vector<8x128xf32>
    tpu.vector_store %arg5[%c0_80, %c0_81], %142 {strides = array<i32>} : memref<8x128xf32, #tpu.memory_space<vmem>>, vector<8x128xf32>,
    %c0_82 = arith.constant 0 : index
    %c0_83 = arith.constant 0 : index
    %146 = vector.load %arg4[%c0_82, %c0_83] : memref<8x128xf32, #tpu.memory_space<vmem>>, vector<8x128xf32>
    tpu.vector_store %arg4[%c0_82, %c0_83], %144 {strides = array<i32>} : memref<8x128xf32, #tpu.memory_space<vmem>>, vector<8x128xf32>,
    %c0_84 = arith.constant 0 : index
    %147 = arith.index_cast %104 : i32 to index
    %c0_85 = arith.constant 0 : index
    %c0_86 = arith.constant 0 : index
    %148 = vector.load %arg3[%c0_84, %147, %c0_85, %c0_86] : memref<1x8x8x128xf32, #tpu.memory_space<vmem>>, vector<1x1x8x128xf32>
    %149 = vector.shape_cast %148 : vector<1x1x8x128xf32> to vector<8x128xf32>
    %150 = vector.shape_cast %144 : vector<8x128xf32> to vector<1x1x8x128xf32>
    tpu.vector_store %arg3[%c0_84, %147, %c0_85, %c0_86], %150 {strides = array<i32>} : memref<1x8x8x128xf32, #tpu.memory_space<vmem>>, vector<1x1x8x128xf32>,
    %c3_i32 = arith.constant 3 : i32
    %c0_i32_87 = arith.constant 0 : i32
    %151 = arith.cmpi eq, %arg0, %c0_i32_87 : i32
    %c7_i32_88 = arith.constant 7 : i32
    %152 = arith.subi %c7_i32_88, %c3_i32 : i32
    %153 = arith.select %151, %c3_i32, %152 : i32
    %154 = arith.index_cast %153 : i32 to index
    %c0_89 = arith.constant 0 : index
    %c0_90 = arith.constant 0 : index
    %155 = vector.load %arg1[%154, %c0_89, %c0_90] : memref<8x8x512xf32, #tpu.memory_space<vmem>>, vector<1x8x512xf32>
    %156 = vector.shape_cast %155 : vector<1x8x512xf32> to vector<8x512xf32>
    %c0_91 = arith.constant 0 : index
    %c0_92 = arith.constant 0 : index
    %157 = vector.load %arg4[%c0_91, %c0_92] : memref<8x128xf32, #tpu.memory_space<vmem>>, vector<8x128xf32>
    %c0_93 = arith.constant 0 : index
    %c0_94 = arith.constant 0 : index
    %c0_95 = arith.constant 0 : index
    %158 = vector.load %arg2[%c0_93, %c0_94, %c0_95] : memref<1x128x512xf32, #tpu.memory_space<vmem>>, vector<1x128x512xf32>
    %159 = vector.shape_cast %158 : vector<1x128x512xf32> to vector<128x512xf32>
    %cst_96 = arith.constant dense<0.000000e+00> : vector<8x512xf32>
    %160 = tpu.matmul %157, %159, %cst_96 {dimension_numbers = #tpu.dot_dimension_numbers<[1], [0], [0], [1], [0, 0, 1, 1], [], []>} : vector<8x128xf32>, vector<128x512xf32>, vector<8x512xf32> -> vector<8x512xf32>
    %161 = arith.addf %156, %160 : vector<8x512xf32>
    %162 = vector.extract_strided_slice %161 {offsets = [0, 0], sizes = [8, 128], strides = [1, 1]} : vector<8x512xf32> to vector<8x128xf32>
    %cst_97 = arith.constant 5.000000e-01 : f32
    %163 = vector.broadcast %cst_97 : f32 to vector<8x128xf32>
    %164 = arith.mulf %163, %162 : vector<8x128xf32>
    %165 = math.tanh %164 : vector<8x128xf32>
    %cst_98 = arith.constant 5.000000e-01 : f32
    %166 = vector.broadcast %cst_98 : f32 to vector<8x128xf32>
    %167 = arith.mulf %166, %165 : vector<8x128xf32>
    %cst_99 = arith.constant 5.000000e-01 : f32
    %168 = vector.broadcast %cst_99 : f32 to vector<8x128xf32>
    %169 = arith.addf %167, %168 : vector<8x128xf32>
    %170 = vector.extract_strided_slice %161 {offsets = [0, 128], sizes = [8, 128], strides = [1, 1]} : vector<8x512xf32> to vector<8x128xf32>
    %cst_100 = arith.constant 5.000000e-01 : f32
    %171 = vector.broadcast %cst_100 : f32 to vector<8x128xf32>
    %172 = arith.mulf %171, %170 : vector<8x128xf32>
    %173 = math.tanh %172 : vector<8x128xf32>
    %cst_101 = arith.constant 5.000000e-01 : f32
    %174 = vector.broadcast %cst_101 : f32 to vector<8x128xf32>
    %175 = arith.mulf %174, %173 : vector<8x128xf32>
    %cst_102 = arith.constant 5.000000e-01 : f32
    %176 = vector.broadcast %cst_102 : f32 to vector<8x128xf32>
    %177 = arith.addf %175, %176 : vector<8x128xf32>
    %178 = vector.extract_strided_slice %161 {offsets = [0, 256], sizes = [8, 128], strides = [1, 1]} : vector<8x512xf32> to vector<8x128xf32>
    %179 = math.tanh %178 : vector<8x128xf32>
    %180 = vector.extract_strided_slice %161 {offsets = [0, 384], sizes = [8, 128], strides = [1, 1]} : vector<8x512xf32> to vector<8x128xf32>
    %cst_103 = arith.constant 5.000000e-01 : f32
    %181 = vector.broadcast %cst_103 : f32 to vector<8x128xf32>
    %182 = arith.mulf %181, %180 : vector<8x128xf32>
    %183 = math.tanh %182 : vector<8x128xf32>
    %cst_104 = arith.constant 5.000000e-01 : f32
    %184 = vector.broadcast %cst_104 : f32 to vector<8x128xf32>
    %185 = arith.mulf %184, %183 : vector<8x128xf32>
    %cst_105 = arith.constant 5.000000e-01 : f32
    %186 = vector.broadcast %cst_105 : f32 to vector<8x128xf32>
    %187 = arith.addf %185, %186 : vector<8x128xf32>
    %c0_106 = arith.constant 0 : index
    %c0_107 = arith.constant 0 : index
    %188 = vector.load %arg5[%c0_106, %c0_107] : memref<8x128xf32, #tpu.memory_space<vmem>>, vector<8x128xf32>
    %189 = arith.mulf %177, %188 : vector<8x128xf32>
    %190 = arith.mulf %169, %179 : vector<8x128xf32>
    %191 = arith.addf %189, %190 : vector<8x128xf32>
    %192 = math.tanh %191 : vector<8x128xf32>
    %193 = arith.mulf %187, %192 : vector<8x128xf32>
    %c0_108 = arith.constant 0 : index
    %c0_109 = arith.constant 0 : index
    %194 = vector.load %arg5[%c0_108, %c0_109] : memref<8x128xf32, #tpu.memory_space<vmem>>, vector<8x128xf32>
    tpu.vector_store %arg5[%c0_108, %c0_109], %191 {strides = array<i32>} : memref<8x128xf32, #tpu.memory_space<vmem>>, vector<8x128xf32>,
    %c0_110 = arith.constant 0 : index
    %c0_111 = arith.constant 0 : index
    %195 = vector.load %arg4[%c0_110, %c0_111] : memref<8x128xf32, #tpu.memory_space<vmem>>, vector<8x128xf32>
    tpu.vector_store %arg4[%c0_110, %c0_111], %193 {strides = array<i32>} : memref<8x128xf32, #tpu.memory_space<vmem>>, vector<8x128xf32>,
    %c0_112 = arith.constant 0 : index
    %196 = arith.index_cast %153 : i32 to index
    %c0_113 = arith.constant 0 : index
    %c0_114 = arith.constant 0 : index
    %197 = vector.load %arg3[%c0_112, %196, %c0_113, %c0_114] : memref<1x8x8x128xf32, #tpu.memory_space<vmem>>, vector<1x1x8x128xf32>
    %198 = vector.shape_cast %197 : vector<1x1x8x128xf32> to vector<8x128xf32>
    %199 = vector.shape_cast %193 : vector<8x128xf32> to vector<1x1x8x128xf32>
    tpu.vector_store %arg3[%c0_112, %196, %c0_113, %c0_114], %199 {strides = array<i32>} : memref<1x8x8x128xf32, #tpu.memory_space<vmem>>, vector<1x1x8x128xf32>,
    %c4_i32 = arith.constant 4 : i32
    %c0_i32_115 = arith.constant 0 : i32
    %200 = arith.cmpi eq, %arg0, %c0_i32_115 : i32
    %c7_i32_116 = arith.constant 7 : i32
    %201 = arith.subi %c7_i32_116, %c4_i32 : i32
    %202 = arith.select %200, %c4_i32, %201 : i32
    %203 = arith.index_cast %202 : i32 to index
    %c0_117 = arith.constant 0 : index
    %c0_118 = arith.constant 0 : index
    %204 = vector.load %arg1[%203, %c0_117, %c0_118] : memref<8x8x512xf32, #tpu.memory_space<vmem>>, vector<1x8x512xf32>
    %205 = vector.shape_cast %204 : vector<1x8x512xf32> to vector<8x512xf32>
    %c0_119 = arith.constant 0 : index
    %c0_120 = arith.constant 0 : index
    %206 = vector.load %arg4[%c0_119, %c0_120] : memref<8x128xf32, #tpu.memory_space<vmem>>, vector<8x128xf32>
    %c0_121 = arith.constant 0 : index
    %c0_122 = arith.constant 0 : index
    %c0_123 = arith.constant 0 : index
    %207 = vector.load %arg2[%c0_121, %c0_122, %c0_123] : memref<1x128x512xf32, #tpu.memory_space<vmem>>, vector<1x128x512xf32>
    %208 = vector.shape_cast %207 : vector<1x128x512xf32> to vector<128x512xf32>
    %cst_124 = arith.constant dense<0.000000e+00> : vector<8x512xf32>
    %209 = tpu.matmul %206, %208, %cst_124 {dimension_numbers = #tpu.dot_dimension_numbers<[1], [0], [0], [1], [0, 0, 1, 1], [], []>} : vector<8x128xf32>, vector<128x512xf32>, vector<8x512xf32> -> vector<8x512xf32>
    %210 = arith.addf %205, %209 : vector<8x512xf32>
    %211 = vector.extract_strided_slice %210 {offsets = [0, 0], sizes = [8, 128], strides = [1, 1]} : vector<8x512xf32> to vector<8x128xf32>
    %cst_125 = arith.constant 5.000000e-01 : f32
    %212 = vector.broadcast %cst_125 : f32 to vector<8x128xf32>
    %213 = arith.mulf %212, %211 : vector<8x128xf32>
    %214 = math.tanh %213 : vector<8x128xf32>
    %cst_126 = arith.constant 5.000000e-01 : f32
    %215 = vector.broadcast %cst_126 : f32 to vector<8x128xf32>
    %216 = arith.mulf %215, %214 : vector<8x128xf32>
    %cst_127 = arith.constant 5.000000e-01 : f32
    %217 = vector.broadcast %cst_127 : f32 to vector<8x128xf32>
    %218 = arith.addf %216, %217 : vector<8x128xf32>
    %219 = vector.extract_strided_slice %210 {offsets = [0, 128], sizes = [8, 128], strides = [1, 1]} : vector<8x512xf32> to vector<8x128xf32>
    %cst_128 = arith.constant 5.000000e-01 : f32
    %220 = vector.broadcast %cst_128 : f32 to vector<8x128xf32>
    %221 = arith.mulf %220, %219 : vector<8x128xf32>
    %222 = math.tanh %221 : vector<8x128xf32>
    %cst_129 = arith.constant 5.000000e-01 : f32
    %223 = vector.broadcast %cst_129 : f32 to vector<8x128xf32>
    %224 = arith.mulf %223, %222 : vector<8x128xf32>
    %cst_130 = arith.constant 5.000000e-01 : f32
    %225 = vector.broadcast %cst_130 : f32 to vector<8x128xf32>
    %226 = arith.addf %224, %225 : vector<8x128xf32>
    %227 = vector.extract_strided_slice %210 {offsets = [0, 256], sizes = [8, 128], strides = [1, 1]} : vector<8x512xf32> to vector<8x128xf32>
    %228 = math.tanh %227 : vector<8x128xf32>
    %229 = vector.extract_strided_slice %210 {offsets = [0, 384], sizes = [8, 128], strides = [1, 1]} : vector<8x512xf32> to vector<8x128xf32>
    %cst_131 = arith.constant 5.000000e-01 : f32
    %230 = vector.broadcast %cst_131 : f32 to vector<8x128xf32>
    %231 = arith.mulf %230, %229 : vector<8x128xf32>
    %232 = math.tanh %231 : vector<8x128xf32>
    %cst_132 = arith.constant 5.000000e-01 : f32
    %233 = vector.broadcast %cst_132 : f32 to vector<8x128xf32>
    %234 = arith.mulf %233, %232 : vector<8x128xf32>
    %cst_133 = arith.constant 5.000000e-01 : f32
    %235 = vector.broadcast %cst_133 : f32 to vector<8x128xf32>
    %236 = arith.addf %234, %235 : vector<8x128xf32>
    %c0_134 = arith.constant 0 : index
    %c0_135 = arith.constant 0 : index
    %237 = vector.load %arg5[%c0_134, %c0_135] : memref<8x128xf32, #tpu.memory_space<vmem>>, vector<8x128xf32>
    %238 = arith.mulf %226, %237 : vector<8x128xf32>
    %239 = arith.mulf %218, %228 : vector<8x128xf32>
    %240 = arith.addf %238, %239 : vector<8x128xf32>
    %241 = math.tanh %240 : vector<8x128xf32>
    %242 = arith.mulf %236, %241 : vector<8x128xf32>
    %c0_136 = arith.constant 0 : index
    %c0_137 = arith.constant 0 : index
    %243 = vector.load %arg5[%c0_136, %c0_137] : memref<8x128xf32, #tpu.memory_space<vmem>>, vector<8x128xf32>
    tpu.vector_store %arg5[%c0_136, %c0_137], %240 {strides = array<i32>} : memref<8x128xf32, #tpu.memory_space<vmem>>, vector<8x128xf32>,
    %c0_138 = arith.constant 0 : index
    %c0_139 = arith.constant 0 : index
    %244 = vector.load %arg4[%c0_138, %c0_139] : memref<8x128xf32, #tpu.memory_space<vmem>>, vector<8x128xf32>
    tpu.vector_store %arg4[%c0_138, %c0_139], %242 {strides = array<i32>} : memref<8x128xf32, #tpu.memory_space<vmem>>, vector<8x128xf32>,
    %c0_140 = arith.constant 0 : index
    %245 = arith.index_cast %202 : i32 to index
    %c0_141 = arith.constant 0 : index
    %c0_142 = arith.constant 0 : index
    %246 = vector.load %arg3[%c0_140, %245, %c0_141, %c0_142] : memref<1x8x8x128xf32, #tpu.memory_space<vmem>>, vector<1x1x8x128xf32>
    %247 = vector.shape_cast %246 : vector<1x1x8x128xf32> to vector<8x128xf32>
    %248 = vector.shape_cast %242 : vector<8x128xf32> to vector<1x1x8x128xf32>
    tpu.vector_store %arg3[%c0_140, %245, %c0_141, %c0_142], %248 {strides = array<i32>} : memref<1x8x8x128xf32, #tpu.memory_space<vmem>>, vector<1x1x8x128xf32>,
    %c5_i32 = arith.constant 5 : i32
    %c0_i32_143 = arith.constant 0 : i32
    %249 = arith.cmpi eq, %arg0, %c0_i32_143 : i32
    %c7_i32_144 = arith.constant 7 : i32
    %250 = arith.subi %c7_i32_144, %c5_i32 : i32
    %251 = arith.select %249, %c5_i32, %250 : i32
    %252 = arith.index_cast %251 : i32 to index
    %c0_145 = arith.constant 0 : index
    %c0_146 = arith.constant 0 : index
    %253 = vector.load %arg1[%252, %c0_145, %c0_146] : memref<8x8x512xf32, #tpu.memory_space<vmem>>, vector<1x8x512xf32>
    %254 = vector.shape_cast %253 : vector<1x8x512xf32> to vector<8x512xf32>
    %c0_147 = arith.constant 0 : index
    %c0_148 = arith.constant 0 : index
    %255 = vector.load %arg4[%c0_147, %c0_148] : memref<8x128xf32, #tpu.memory_space<vmem>>, vector<8x128xf32>
    %c0_149 = arith.constant 0 : index
    %c0_150 = arith.constant 0 : index
    %c0_151 = arith.constant 0 : index
    %256 = vector.load %arg2[%c0_149, %c0_150, %c0_151] : memref<1x128x512xf32, #tpu.memory_space<vmem>>, vector<1x128x512xf32>
    %257 = vector.shape_cast %256 : vector<1x128x512xf32> to vector<128x512xf32>
    %cst_152 = arith.constant dense<0.000000e+00> : vector<8x512xf32>
    %258 = tpu.matmul %255, %257, %cst_152 {dimension_numbers = #tpu.dot_dimension_numbers<[1], [0], [0], [1], [0, 0, 1, 1], [], []>} : vector<8x128xf32>, vector<128x512xf32>, vector<8x512xf32> -> vector<8x512xf32>
    %259 = arith.addf %254, %258 : vector<8x512xf32>
    %260 = vector.extract_strided_slice %259 {offsets = [0, 0], sizes = [8, 128], strides = [1, 1]} : vector<8x512xf32> to vector<8x128xf32>
    %cst_153 = arith.constant 5.000000e-01 : f32
    %261 = vector.broadcast %cst_153 : f32 to vector<8x128xf32>
    %262 = arith.mulf %261, %260 : vector<8x128xf32>
    %263 = math.tanh %262 : vector<8x128xf32>
    %cst_154 = arith.constant 5.000000e-01 : f32
    %264 = vector.broadcast %cst_154 : f32 to vector<8x128xf32>
    %265 = arith.mulf %264, %263 : vector<8x128xf32>
    %cst_155 = arith.constant 5.000000e-01 : f32
    %266 = vector.broadcast %cst_155 : f32 to vector<8x128xf32>
    %267 = arith.addf %265, %266 : vector<8x128xf32>
    %268 = vector.extract_strided_slice %259 {offsets = [0, 128], sizes = [8, 128], strides = [1, 1]} : vector<8x512xf32> to vector<8x128xf32>
    %cst_156 = arith.constant 5.000000e-01 : f32
    %269 = vector.broadcast %cst_156 : f32 to vector<8x128xf32>
    %270 = arith.mulf %269, %268 : vector<8x128xf32>
    %271 = math.tanh %270 : vector<8x128xf32>
    %cst_157 = arith.constant 5.000000e-01 : f32
    %272 = vector.broadcast %cst_157 : f32 to vector<8x128xf32>
    %273 = arith.mulf %272, %271 : vector<8x128xf32>
    %cst_158 = arith.constant 5.000000e-01 : f32
    %274 = vector.broadcast %cst_158 : f32 to vector<8x128xf32>
    %275 = arith.addf %273, %274 : vector<8x128xf32>
    %276 = vector.extract_strided_slice %259 {offsets = [0, 256], sizes = [8, 128], strides = [1, 1]} : vector<8x512xf32> to vector<8x128xf32>
    %277 = math.tanh %276 : vector<8x128xf32>
    %278 = vector.extract_strided_slice %259 {offsets = [0, 384], sizes = [8, 128], strides = [1, 1]} : vector<8x512xf32> to vector<8x128xf32>
    %cst_159 = arith.constant 5.000000e-01 : f32
    %279 = vector.broadcast %cst_159 : f32 to vector<8x128xf32>
    %280 = arith.mulf %279, %278 : vector<8x128xf32>
    %281 = math.tanh %280 : vector<8x128xf32>
    %cst_160 = arith.constant 5.000000e-01 : f32
    %282 = vector.broadcast %cst_160 : f32 to vector<8x128xf32>
    %283 = arith.mulf %282, %281 : vector<8x128xf32>
    %cst_161 = arith.constant 5.000000e-01 : f32
    %284 = vector.broadcast %cst_161 : f32 to vector<8x128xf32>
    %285 = arith.addf %283, %284 : vector<8x128xf32>
    %c0_162 = arith.constant 0 : index
    %c0_163 = arith.constant 0 : index
    %286 = vector.load %arg5[%c0_162, %c0_163] : memref<8x128xf32, #tpu.memory_space<vmem>>, vector<8x128xf32>
    %287 = arith.mulf %275, %286 : vector<8x128xf32>
    %288 = arith.mulf %267, %277 : vector<8x128xf32>
    %289 = arith.addf %287, %288 : vector<8x128xf32>
    %290 = math.tanh %289 : vector<8x128xf32>
    %291 = arith.mulf %285, %290 : vector<8x128xf32>
    %c0_164 = arith.constant 0 : index
    %c0_165 = arith.constant 0 : index
    %292 = vector.load %arg5[%c0_164, %c0_165] : memref<8x128xf32, #tpu.memory_space<vmem>>, vector<8x128xf32>
    tpu.vector_store %arg5[%c0_164, %c0_165], %289 {strides = array<i32>} : memref<8x128xf32, #tpu.memory_space<vmem>>, vector<8x128xf32>,
    %c0_166 = arith.constant 0 : index
    %c0_167 = arith.constant 0 : index
    %293 = vector.load %arg4[%c0_166, %c0_167] : memref<8x128xf32, #tpu.memory_space<vmem>>, vector<8x128xf32>
    tpu.vector_store %arg4[%c0_166, %c0_167], %291 {strides = array<i32>} : memref<8x128xf32, #tpu.memory_space<vmem>>, vector<8x128xf32>,
    %c0_168 = arith.constant 0 : index
    %294 = arith.index_cast %251 : i32 to index
    %c0_169 = arith.constant 0 : index
    %c0_170 = arith.constant 0 : index
    %295 = vector.load %arg3[%c0_168, %294, %c0_169, %c0_170] : memref<1x8x8x128xf32, #tpu.memory_space<vmem>>, vector<1x1x8x128xf32>
    %296 = vector.shape_cast %295 : vector<1x1x8x128xf32> to vector<8x128xf32>
    %297 = vector.shape_cast %291 : vector<8x128xf32> to vector<1x1x8x128xf32>
    tpu.vector_store %arg3[%c0_168, %294, %c0_169, %c0_170], %297 {strides = array<i32>} : memref<1x8x8x128xf32, #tpu.memory_space<vmem>>, vector<1x1x8x128xf32>,
    %c6_i32 = arith.constant 6 : i32
    %c0_i32_171 = arith.constant 0 : i32
    %298 = arith.cmpi eq, %arg0, %c0_i32_171 : i32
    %c7_i32_172 = arith.constant 7 : i32
    %299 = arith.subi %c7_i32_172, %c6_i32 : i32
    %300 = arith.select %298, %c6_i32, %299 : i32
    %301 = arith.index_cast %300 : i32 to index
    %c0_173 = arith.constant 0 : index
    %c0_174 = arith.constant 0 : index
    %302 = vector.load %arg1[%301, %c0_173, %c0_174] : memref<8x8x512xf32, #tpu.memory_space<vmem>>, vector<1x8x512xf32>
    %303 = vector.shape_cast %302 : vector<1x8x512xf32> to vector<8x512xf32>
    %c0_175 = arith.constant 0 : index
    %c0_176 = arith.constant 0 : index
    %304 = vector.load %arg4[%c0_175, %c0_176] : memref<8x128xf32, #tpu.memory_space<vmem>>, vector<8x128xf32>
    %c0_177 = arith.constant 0 : index
    %c0_178 = arith.constant 0 : index
    %c0_179 = arith.constant 0 : index
    %305 = vector.load %arg2[%c0_177, %c0_178, %c0_179] : memref<1x128x512xf32, #tpu.memory_space<vmem>>, vector<1x128x512xf32>
    %306 = vector.shape_cast %305 : vector<1x128x512xf32> to vector<128x512xf32>
    %cst_180 = arith.constant dense<0.000000e+00> : vector<8x512xf32>
    %307 = tpu.matmul %304, %306, %cst_180 {dimension_numbers = #tpu.dot_dimension_numbers<[1], [0], [0], [1], [0, 0, 1, 1], [], []>} : vector<8x128xf32>, vector<128x512xf32>, vector<8x512xf32> -> vector<8x512xf32>
    %308 = arith.addf %303, %307 : vector<8x512xf32>
    %309 = vector.extract_strided_slice %308 {offsets = [0, 0], sizes = [8, 128], strides = [1, 1]} : vector<8x512xf32> to vector<8x128xf32>
    %cst_181 = arith.constant 5.000000e-01 : f32
    %310 = vector.broadcast %cst_181 : f32 to vector<8x128xf32>
    %311 = arith.mulf %310, %309 : vector<8x128xf32>
    %312 = math.tanh %311 : vector<8x128xf32>
    %cst_182 = arith.constant 5.000000e-01 : f32
    %313 = vector.broadcast %cst_182 : f32 to vector<8x128xf32>
    %314 = arith.mulf %313, %312 : vector<8x128xf32>
    %cst_183 = arith.constant 5.000000e-01 : f32
    %315 = vector.broadcast %cst_183 : f32 to vector<8x128xf32>
    %316 = arith.addf %314, %315 : vector<8x128xf32>
    %317 = vector.extract_strided_slice %308 {offsets = [0, 128], sizes = [8, 128], strides = [1, 1]} : vector<8x512xf32> to vector<8x128xf32>
    %cst_184 = arith.constant 5.000000e-01 : f32
    %318 = vector.broadcast %cst_184 : f32 to vector<8x128xf32>
    %319 = arith.mulf %318, %317 : vector<8x128xf32>
    %320 = math.tanh %319 : vector<8x128xf32>
    %cst_185 = arith.constant 5.000000e-01 : f32
    %321 = vector.broadcast %cst_185 : f32 to vector<8x128xf32>
    %322 = arith.mulf %321, %320 : vector<8x128xf32>
    %cst_186 = arith.constant 5.000000e-01 : f32
    %323 = vector.broadcast %cst_186 : f32 to vector<8x128xf32>
    %324 = arith.addf %322, %323 : vector<8x128xf32>
    %325 = vector.extract_strided_slice %308 {offsets = [0, 256], sizes = [8, 128], strides = [1, 1]} : vector<8x512xf32> to vector<8x128xf32>
    %326 = math.tanh %325 : vector<8x128xf32>
    %327 = vector.extract_strided_slice %308 {offsets = [0, 384], sizes = [8, 128], strides = [1, 1]} : vector<8x512xf32> to vector<8x128xf32>
    %cst_187 = arith.constant 5.000000e-01 : f32
    %328 = vector.broadcast %cst_187 : f32 to vector<8x128xf32>
    %329 = arith.mulf %328, %327 : vector<8x128xf32>
    %330 = math.tanh %329 : vector<8x128xf32>
    %cst_188 = arith.constant 5.000000e-01 : f32
    %331 = vector.broadcast %cst_188 : f32 to vector<8x128xf32>
    %332 = arith.mulf %331, %330 : vector<8x128xf32>
    %cst_189 = arith.constant 5.000000e-01 : f32
    %333 = vector.broadcast %cst_189 : f32 to vector<8x128xf32>
    %334 = arith.addf %332, %333 : vector<8x128xf32>
    %c0_190 = arith.constant 0 : index
    %c0_191 = arith.constant 0 : index
    %335 = vector.load %arg5[%c0_190, %c0_191] : memref<8x128xf32, #tpu.memory_space<vmem>>, vector<8x128xf32>
    %336 = arith.mulf %324, %335 : vector<8x128xf32>
    %337 = arith.mulf %316, %326 : vector<8x128xf32>
    %338 = arith.addf %336, %337 : vector<8x128xf32>
    %339 = math.tanh %338 : vector<8x128xf32>
    %340 = arith.mulf %334, %339 : vector<8x128xf32>
    %c0_192 = arith.constant 0 : index
    %c0_193 = arith.constant 0 : index
    %341 = vector.load %arg5[%c0_192, %c0_193] : memref<8x128xf32, #tpu.memory_space<vmem>>, vector<8x128xf32>
    tpu.vector_store %arg5[%c0_192, %c0_193], %338 {strides = array<i32>} : memref<8x128xf32, #tpu.memory_space<vmem>>, vector<8x128xf32>,
    %c0_194 = arith.constant 0 : index
    %c0_195 = arith.constant 0 : index
    %342 = vector.load %arg4[%c0_194, %c0_195] : memref<8x128xf32, #tpu.memory_space<vmem>>, vector<8x128xf32>
    tpu.vector_store %arg4[%c0_194, %c0_195], %340 {strides = array<i32>} : memref<8x128xf32, #tpu.memory_space<vmem>>, vector<8x128xf32>,
    %c0_196 = arith.constant 0 : index
    %343 = arith.index_cast %300 : i32 to index
    %c0_197 = arith.constant 0 : index
    %c0_198 = arith.constant 0 : index
    %344 = vector.load %arg3[%c0_196, %343, %c0_197, %c0_198] : memref<1x8x8x128xf32, #tpu.memory_space<vmem>>, vector<1x1x8x128xf32>
    %345 = vector.shape_cast %344 : vector<1x1x8x128xf32> to vector<8x128xf32>
    %346 = vector.shape_cast %340 : vector<8x128xf32> to vector<1x1x8x128xf32>
    tpu.vector_store %arg3[%c0_196, %343, %c0_197, %c0_198], %346 {strides = array<i32>} : memref<1x8x8x128xf32, #tpu.memory_space<vmem>>, vector<1x1x8x128xf32>,
    %c7_i32_199 = arith.constant 7 : i32
    %c0_i32_200 = arith.constant 0 : i32
    %347 = arith.cmpi eq, %arg0, %c0_i32_200 : i32
    %c7_i32_201 = arith.constant 7 : i32
    %348 = arith.subi %c7_i32_201, %c7_i32_199 : i32
    %349 = arith.select %347, %c7_i32_199, %348 : i32
    %350 = arith.index_cast %349 : i32 to index
    %c0_202 = arith.constant 0 : index
    %c0_203 = arith.constant 0 : index
    %351 = vector.load %arg1[%350, %c0_202, %c0_203] : memref<8x8x512xf32, #tpu.memory_space<vmem>>, vector<1x8x512xf32>
    %352 = vector.shape_cast %351 : vector<1x8x512xf32> to vector<8x512xf32>
    %c0_204 = arith.constant 0 : index
    %c0_205 = arith.constant 0 : index
    %353 = vector.load %arg4[%c0_204, %c0_205] : memref<8x128xf32, #tpu.memory_space<vmem>>, vector<8x128xf32>
    %c0_206 = arith.constant 0 : index
    %c0_207 = arith.constant 0 : index
    %c0_208 = arith.constant 0 : index
    %354 = vector.load %arg2[%c0_206, %c0_207, %c0_208] : memref<1x128x512xf32, #tpu.memory_space<vmem>>, vector<1x128x512xf32>
    %355 = vector.shape_cast %354 : vector<1x128x512xf32> to vector<128x512xf32>
    %cst_209 = arith.constant dense<0.000000e+00> : vector<8x512xf32>
    %356 = tpu.matmul %353, %355, %cst_209 {dimension_numbers = #tpu.dot_dimension_numbers<[1], [0], [0], [1], [0, 0, 1, 1], [], []>} : vector<8x128xf32>, vector<128x512xf32>, vector<8x512xf32> -> vector<8x512xf32>
    %357 = arith.addf %352, %356 : vector<8x512xf32>
    %358 = vector.extract_strided_slice %357 {offsets = [0, 0], sizes = [8, 128], strides = [1, 1]} : vector<8x512xf32> to vector<8x128xf32>
    %cst_210 = arith.constant 5.000000e-01 : f32
    %359 = vector.broadcast %cst_210 : f32 to vector<8x128xf32>
    %360 = arith.mulf %359, %358 : vector<8x128xf32>
    %361 = math.tanh %360 : vector<8x128xf32>
    %cst_211 = arith.constant 5.000000e-01 : f32
    %362 = vector.broadcast %cst_211 : f32 to vector<8x128xf32>
    %363 = arith.mulf %362, %361 : vector<8x128xf32>
    %cst_212 = arith.constant 5.000000e-01 : f32
    %364 = vector.broadcast %cst_212 : f32 to vector<8x128xf32>
    %365 = arith.addf %363, %364 : vector<8x128xf32>
    %366 = vector.extract_strided_slice %357 {offsets = [0, 128], sizes = [8, 128], strides = [1, 1]} : vector<8x512xf32> to vector<8x128xf32>
    %cst_213 = arith.constant 5.000000e-01 : f32
    %367 = vector.broadcast %cst_213 : f32 to vector<8x128xf32>
    %368 = arith.mulf %367, %366 : vector<8x128xf32>
    %369 = math.tanh %368 : vector<8x128xf32>
    %cst_214 = arith.constant 5.000000e-01 : f32
    %370 = vector.broadcast %cst_214 : f32 to vector<8x128xf32>
    %371 = arith.mulf %370, %369 : vector<8x128xf32>
    %cst_215 = arith.constant 5.000000e-01 : f32
    %372 = vector.broadcast %cst_215 : f32 to vector<8x128xf32>
    %373 = arith.addf %371, %372 : vector<8x128xf32>
    %374 = vector.extract_strided_slice %357 {offsets = [0, 256], sizes = [8, 128], strides = [1, 1]} : vector<8x512xf32> to vector<8x128xf32>
    %375 = math.tanh %374 : vector<8x128xf32>
    %376 = vector.extract_strided_slice %357 {offsets = [0, 384], sizes = [8, 128], strides = [1, 1]} : vector<8x512xf32> to vector<8x128xf32>
    %cst_216 = arith.constant 5.000000e-01 : f32
    %377 = vector.broadcast %cst_216 : f32 to vector<8x128xf32>
    %378 = arith.mulf %377, %376 : vector<8x128xf32>
    %379 = math.tanh %378 : vector<8x128xf32>
    %cst_217 = arith.constant 5.000000e-01 : f32
    %380 = vector.broadcast %cst_217 : f32 to vector<8x128xf32>
    %381 = arith.mulf %380, %379 : vector<8x128xf32>
    %cst_218 = arith.constant 5.000000e-01 : f32
    %382 = vector.broadcast %cst_218 : f32 to vector<8x128xf32>
    %383 = arith.addf %381, %382 : vector<8x128xf32>
    %c0_219 = arith.constant 0 : index
    %c0_220 = arith.constant 0 : index
    %384 = vector.load %arg5[%c0_219, %c0_220] : memref<8x128xf32, #tpu.memory_space<vmem>>, vector<8x128xf32>
    %385 = arith.mulf %373, %384 : vector<8x128xf32>
    %386 = arith.mulf %365, %375 : vector<8x128xf32>
    %387 = arith.addf %385, %386 : vector<8x128xf32>
    %388 = math.tanh %387 : vector<8x128xf32>
    %389 = arith.mulf %383, %388 : vector<8x128xf32>
    %c0_221 = arith.constant 0 : index
    %c0_222 = arith.constant 0 : index
    %390 = vector.load %arg5[%c0_221, %c0_222] : memref<8x128xf32, #tpu.memory_space<vmem>>, vector<8x128xf32>
    tpu.vector_store %arg5[%c0_221, %c0_222], %387 {strides = array<i32>} : memref<8x128xf32, #tpu.memory_space<vmem>>, vector<8x128xf32>,
    %c0_223 = arith.constant 0 : index
    %c0_224 = arith.constant 0 : index
    %391 = vector.load %arg4[%c0_223, %c0_224] : memref<8x128xf32, #tpu.memory_space<vmem>>, vector<8x128xf32>
    tpu.vector_store %arg4[%c0_223, %c0_224], %389 {strides = array<i32>} : memref<8x128xf32, #tpu.memory_space<vmem>>, vector<8x128xf32>,
    %c0_225 = arith.constant 0 : index
    %392 = arith.index_cast %349 : i32 to index
    %c0_226 = arith.constant 0 : index
    %c0_227 = arith.constant 0 : index
    %393 = vector.load %arg3[%c0_225, %392, %c0_226, %c0_227] : memref<1x8x8x128xf32, #tpu.memory_space<vmem>>, vector<1x1x8x128xf32>
    %394 = vector.shape_cast %393 : vector<1x1x8x128xf32> to vector<8x128xf32>
    %395 = vector.shape_cast %389 : vector<8x128xf32> to vector<1x1x8x128xf32>
    tpu.vector_store %arg3[%c0_225, %392, %c0_226, %c0_227], %395 {strides = array<i32>} : memref<1x8x8x128xf32, #tpu.memory_space<vmem>>, vector<1x1x8x128xf32>,
    %c8_i32 = arith.constant 8 : i32
    return
  }
  func.func @transform_0(%arg0: i32) -> (i32, i32, i32) {
    %c0_i32 = arith.constant 0 : i32
    %c0_i32_0 = arith.constant 0 : i32
    %c0_i32_1 = arith.constant 0 : i32
    return %c0_i32, %c0_i32_0, %arg0 : i32, i32, i32
  }
  func.func @transform_1(%arg0: i32) -> (i32, i32, i32) {
    %c0_i32 = arith.constant 0 : i32
    %c0_i32_0 = arith.constant 0 : i32
    %c0_i32_1 = arith.constant 0 : i32
    return %arg0, %c0_i32, %c0_i32_0 : i32, i32, i32
  }
  func.func @transform_2(%arg0: i32) -> (i32, i32, i32, i32) {
    %c0_i32 = arith.constant 0 : i32
    %c0_i32_0 = arith.constant 0 : i32
    %c0_i32_1 = arith.constant 0 : i32
    %c0_i32_2 = arith.constant 0 : i32
    return %arg0, %c0_i32, %c0_i32_0, %c0_i32_1 : i32, i32, i32, i32
  }
}

module attributes {stable_mosaic.version = 11 : i64} {
  func.func @_linear2_kernel(%arg0: i32, %arg1: memref<64x128xf32, #tpu.memory_space<vmem>>, %arg2: memref<64x128xf32, #tpu.memory_space<vmem>>, %arg3: memref<128x128xf32, #tpu.memory_space<vmem>>, %arg4: memref<128x128xf32, #tpu.memory_space<vmem>>, %arg5: memref<1x128xf32, #tpu.memory_space<vmem>>, %arg6: memref<64x128xf32, #tpu.memory_space<vmem>>) attributes {dimension_semantics = [#tpu.dimension_semantics<parallel>], iteration_bounds = array<i64: 1>, scalar_prefetch = 0 : i64, scratch_operands = 0 : i64, tpu.core_type = #tpu.core_type<tc>, window_params = [{transform_indices = @transform_0, window_bounds = array<i64: 64, 128>}, {transform_indices = @transform_1, window_bounds = array<i64: 64, 128>}, {pipeline_mode = #tpu.pipeline_mode<synchronous>, transform_indices = @transform_2, window_bounds = array<i64: 128, 128>}, {pipeline_mode = #tpu.pipeline_mode<synchronous>, transform_indices = @transform_3, window_bounds = array<i64: 128, 128>}, {pipeline_mode = #tpu.pipeline_mode<synchronous>, transform_indices = @transform_4, window_bounds = array<i64: 1, 128>}, {transform_indices = @transform_5, window_bounds = array<i64: 64, 128>}]} {
    %c0 = arith.constant 0 : index
    %c0_0 = arith.constant 0 : index
    %0 = vector.load %arg1[%c0, %c0_0] : memref<64x128xf32, #tpu.memory_space<vmem>>, vector<64x128xf32>
    %c0_1 = arith.constant 0 : index
    %c0_2 = arith.constant 0 : index
    %1 = vector.load %arg3[%c0_1, %c0_2] : memref<128x128xf32, #tpu.memory_space<vmem>>, vector<128x128xf32>
    %cst = arith.constant dense<0.000000e+00> : vector<64x128xf32>
    %2 = tpu.matmul %0, %1, %cst {dimension_numbers = #tpu.dot_dimension_numbers<[1], [0], [0], [1], [0, 0, 1, 1], [], []>} : vector<64x128xf32>, vector<128x128xf32>, vector<64x128xf32> -> vector<64x128xf32>
    %c0_3 = arith.constant 0 : index
    %c0_4 = arith.constant 0 : index
    %3 = vector.load %arg2[%c0_3, %c0_4] : memref<64x128xf32, #tpu.memory_space<vmem>>, vector<64x128xf32>
    %c0_5 = arith.constant 0 : index
    %c0_6 = arith.constant 0 : index
    %4 = vector.load %arg4[%c0_5, %c0_6] : memref<128x128xf32, #tpu.memory_space<vmem>>, vector<128x128xf32>
    %cst_7 = arith.constant dense<0.000000e+00> : vector<64x128xf32>
    %5 = tpu.matmul %3, %4, %cst_7 {dimension_numbers = #tpu.dot_dimension_numbers<[1], [0], [0], [1], [0, 0, 1, 1], [], []>} : vector<64x128xf32>, vector<128x128xf32>, vector<64x128xf32> -> vector<64x128xf32>
    %6 = arith.addf %2, %5 : vector<64x128xf32>
    %c0_8 = arith.constant 0 : index
    %c0_9 = arith.constant 0 : index
    %7 = vector.load %arg5[%c0_8, %c0_9] : memref<1x128xf32, #tpu.memory_space<vmem>>, vector<1x128xf32>
    %8 = vector.broadcast %7 : vector<1x128xf32> to vector<64x128xf32>
    %9 = arith.addf %6, %8 : vector<64x128xf32>
    %c0_10 = arith.constant 0 : index
    %c0_11 = arith.constant 0 : index
    %10 = vector.load %arg6[%c0_10, %c0_11] : memref<64x128xf32, #tpu.memory_space<vmem>>, vector<64x128xf32>
    tpu.vector_store %arg6[%c0_10, %c0_11], %9 {strides = array<i32>} : memref<64x128xf32, #tpu.memory_space<vmem>>, vector<64x128xf32>,
    return
  }
  func.func @transform_0(%arg0: i32) -> (i32, i32) {
    %c0_i32 = arith.constant 0 : i32
    %c0_i32_0 = arith.constant 0 : i32
    return %arg0, %c0_i32 : i32, i32
  }
  func.func @transform_1(%arg0: i32) -> (i32, i32) {
    %c0_i32 = arith.constant 0 : i32
    %c0_i32_0 = arith.constant 0 : i32
    return %arg0, %c0_i32 : i32, i32
  }
  func.func @transform_2(%arg0: i32) -> (i32, i32) {
    %c0_i32 = arith.constant 0 : i32
    %c0_i32_0 = arith.constant 0 : i32
    %c0_i32_1 = arith.constant 0 : i32
    return %c0_i32, %c0_i32_0 : i32, i32
  }
  func.func @transform_3(%arg0: i32) -> (i32, i32) {
    %c0_i32 = arith.constant 0 : i32
    %c0_i32_0 = arith.constant 0 : i32
    %c0_i32_1 = arith.constant 0 : i32
    return %c0_i32, %c0_i32_0 : i32, i32
  }
  func.func @transform_4(%arg0: i32) -> (i32, i32) {
    %c0_i32 = arith.constant 0 : i32
    %c0_i32_0 = arith.constant 0 : i32
    %c0_i32_1 = arith.constant 0 : i32
    return %c0_i32, %c0_i32_0 : i32, i32
  }
  func.func @transform_5(%arg0: i32) -> (i32, i32) {
    %c0_i32 = arith.constant 0 : i32
    %c0_i32_0 = arith.constant 0 : i32
    return %arg0, %c0_i32 : i32, i32
  }
}

</mosaic_0001>

<bundles_post_ra>
// kernel: bidirectional_lstm_forward.5
= control target key start
LH: loop header
LB: loop body
LE: loop exit
PB: predicated region body
PF: predicated region fallthrough
CT: control target
= control target key end

     0   :  { %s408_s3 = inlined_call_operand.vmem [shape: f32[128,128], index: 3, kind: input, shape index: {}]   ;;  %s409_s2 = inlined_call_operand.vmem [shape: f32[128,128], index: 2, kind: input, shape index: {}]   ;;  %s410_s1 = inlined_call_operand.vmem [shape: f32[64,128], index: 1, kind: input, shape index: {}]   ;;  %s411_s0 = inlined_call_operand.vmem [shape: f32[64,128], index: 0, kind: input, shape index: {}]   ;;  %s412_s4 = inlined_call_operand.vmem [shape: f32[1,128], index: 4, kind: input, shape index: {}]   ;;  %s413_s5 = inlined_call_operand.vmem [shape: f32[64,128], index: 5, kind: output, shape index: {}]  }
   0x1   :  { %v67_v0 = vld [vmem:[%s408_s3 + $0x78] sm:$0xff]  ;;  %v66_v2 = vld [vmem:[%s408_s3 + $0x70] sm:$0xff]  ;;  %v65_v4 = vld [vmem:[%s408_s3 + $0x68] sm:$0xff] }
   0x2   :  { %v43_v1 = vld [vmem:[%s409_s2 + $0x78] sm:$0xff]  ;;  %174 = vmatpush.msra.mxu2 %v67_v0  ;;  %v42_v3 = vld [vmem:[%s409_s2 + $0x70] sm:$0xff]  ;;  %v41_v5 = vld [vmem:[%s409_s2 + $0x68] sm:$0xff]  ;;  %68 = vmatpush.msra.mxu0 %v67_v0 }
   0x3   :  { %190 = vmatpush.msra.mxu3 %v43_v1  ;;  %109 = vmatpush.msra.mxu1 %v43_v1  ;;  %v64_v6 = vld [vmem:[%s408_s3 + $0x60] sm:$0xff]  ;;  %v63_v8 = vld [vmem:[%s408_s3 + $0x58] sm:$0xff]  ;;  %v62_v10 = vld [vmem:[%s408_s3 + $0x50] sm:$0xff] }
   0x4   :  { %175 = vmatpush.msra.mxu2 %v66_v2  ;;  %v40_v7 = vld [vmem:[%s409_s2 + $0x60] sm:$0xff]  ;;  %69 = vmatpush.msra.mxu0 %v66_v2  ;;  %v39_v9 = vld [vmem:[%s409_s2 + $0x58] sm:$0xff]  ;;  %v38_v11 = vld [vmem:[%s409_s2 + $0x50] sm:$0xff] }
   0x5   :  { %191 = vmatpush.msra.mxu3 %v42_v3  ;;  %110 = vmatpush.msra.mxu1 %v42_v3  ;;  %v61_v12 = vld [vmem:[%s408_s3 + $0x48] sm:$0xff]  ;;  %v60_v14 = vld [vmem:[%s408_s3 + $0x40] sm:$0xff]  ;;  %v59_v16 = vld [vmem:[%s408_s3 + $0x38] sm:$0xff] }
   0x6   :  { %176 = vmatpush.msra.mxu2 %v65_v4  ;;  %70 = vmatpush.msra.mxu0 %v65_v4  ;;  %v37_v13 = vld [vmem:[%s409_s2 + $0x48] sm:$0xff]  ;;  %v36_v15 = vld [vmem:[%s409_s2 + $0x40] sm:$0xff]  ;;  %v35_v17 = vld [vmem:[%s409_s2 + $0x38] sm:$0xff] }
   0x7   :  { %192 = vmatpush.msra.mxu3 %v41_v5  ;;  %111 = vmatpush.msra.mxu1 %v41_v5  ;;  %v58_v18 = vld [vmem:[%s408_s3 + $0x30] sm:$0xff]  ;;  %v57_v20 = vld [vmem:[%s408_s3 + $0x28] sm:$0xff]  ;;  %v56_v22 = vld [vmem:[%s408_s3 + $0x20] sm:$0xff] }
   0x8   :  { %177 = vmatpush.msra.mxu2 %v64_v6  ;;  %71 = vmatpush.msra.mxu0 %v64_v6  ;;  %v34_v19 = vld [vmem:[%s409_s2 + $0x30] sm:$0xff]  ;;  %v33_v21 = vld [vmem:[%s409_s2 + $0x28] sm:$0xff]  ;;  %v32_v23 = vld [vmem:[%s409_s2 + $0x20] sm:$0xff] }
   0x9   :  { %193 = vmatpush.msra.mxu3 %v40_v7  ;;  %112 = vmatpush.msra.mxu1 %v40_v7  ;;  %v55_v24 = vld [vmem:[%s408_s3 + $0x18] sm:$0xff]  ;;  %v54_v26 = vld [vmem:[%s408_s3 + $0x10] sm:$0xff]  ;;  %v53_v28 = vld [vmem:[%s408_s3 + $0x8] sm:$0xff] }
   0xa   :  { %178 = vmatpush.msra.mxu2 %v63_v8  ;;  %72 = vmatpush.msra.mxu0 %v63_v8  ;;  %v31_v25 = vld [vmem:[%s409_s2 + $0x18] sm:$0xff]  ;;  %v30_v27 = vld [vmem:[%s409_s2 + $0x10] sm:$0xff]  ;;  %v29_v29 = vld [vmem:[%s409_s2 + $0x8] sm:$0xff] }
   0xb   :  { %194 = vmatpush.msra.mxu3 %v39_v9  ;;  %113 = vmatpush.msra.mxu1 %v39_v9  ;;  %v52_v30 = vld [vmem:[%s408_s3] sm:$0xff]  ;;  %v49_v36 = vld [vmem:[%s410_s1 + $0x28] sm:$0xff]  ;;  %v50_v40 = vld [vmem:[%s410_s1 + $0x30] sm:$0xff] }
   0xc   :  { %179 = vmatpush.msra.mxu2 %v62_v10  ;;  %73 = vmatpush.msra.mxu0 %v62_v10  ;;  %v28_v31 = vld [vmem:[%s409_s2] sm:$0xff]  ;;  %v25_v37 = vld [vmem:[%s411_s0 + $0x28] sm:$0xff]  ;;  %v26_v41 = vld [vmem:[%s411_s0 + $0x30] sm:$0xff] }
   0xd   :  { %195 = vmatpush.msra.mxu3 %v38_v11  ;;  %114 = vmatpush.msra.mxu1 %v38_v11  ;;  %v48_v32 = vld [vmem:[%s410_s1 + $0x20] sm:$0xff]  ;;  %v45_v38 = vld [vmem:[%s410_s1 + $0x8] sm:$0xff]  ;;  %v46_v42 = vld [vmem:[%s410_s1 + $0x10] sm:$0xff] }
   0xe   :  { %180 = vmatpush.msra.mxu2 %v61_v12  ;;  %74 = vmatpush.msra.mxu0 %v61_v12  ;;  %v24_v33 = vld [vmem:[%s411_s0 + $0x20] sm:$0xff]  ;;  %v21_v39 = vld [vmem:[%s411_s0 + $0x8] sm:$0xff]  ;;  %v22_v43 = vld [vmem:[%s411_s0 + $0x10] sm:$0xff] }
   0xf   :  { %196 = vmatpush.msra.mxu3 %v37_v13  ;;  %115 = vmatpush.msra.mxu1 %v37_v13  ;;  %v44_v34 = vld [vmem:[%s410_s1] sm:$0xff]  ;;  %v51_v44 = vld [vmem:[%s410_s1 + $0x38] sm:$0xff] }
  0x10   :  { %181 = vmatpush.msra.mxu2 %v60_v14  ;;  %75 = vmatpush.msra.mxu0 %v60_v14  ;;  %v20_v35 = vld [vmem:[%s411_s0] sm:$0xff]  ;;  %v27_v45 = vld [vmem:[%s411_s0 + $0x38] sm:$0xff] }
  0x11   :  { %197 = vmatpush.msra.mxu3 %v36_v15  ;;  %116 = vmatpush.msra.mxu1 %v36_v15  ;;  %v47_v46 = vld [vmem:[%s410_s1 + $0x18] sm:$0xff]  ;;  %v206_v48 = vld [vmem:[%s412_s4] ss:$0 sm:$0xff] }
  0x12   :  { %182 = vmatpush.msra.mxu2 %v59_v16  ;;  %76 = vmatpush.msra.mxu0 %v59_v16  ;;  %v23_v47 = vld [vmem:[%s411_s0 + $0x18] sm:$0xff] }
  0x13   :  { %198 = vmatpush.msra.mxu3 %v35_v17  ;;  %117 = vmatpush.msra.mxu1 %v35_v17 }
  0x14   :  { %183 = vmatpush.msra.mxu2 %v58_v18  ;;  %77 = vmatpush.msra.mxu0 %v58_v18 }
  0x15   :  { %199 = vmatpush.msra.mxu3 %v34_v19  ;;  %118 = vmatpush.msra.mxu1 %v34_v19 }
  0x16   :  { %184 = vmatpush.msra.mxu2 %v57_v20  ;;  %78 = vmatpush.msra.mxu0 %v57_v20 }
  0x17   :  { %200 = vmatpush.msra.mxu3 %v33_v21  ;;  %119 = vmatpush.msra.mxu1 %v33_v21 }
  0x18   :  { %185 = vmatpush.msra.mxu2 %v56_v22  ;;  %79 = vmatpush.msra.mxu0 %v56_v22 }
  0x19   :  { %201 = vmatpush.msra.mxu3 %v32_v23  ;;  %120 = vmatpush.msra.mxu1 %v32_v23 }
  0x1a   :  { %186 = vmatpush.msra.mxu2 %v55_v24  ;;  %80 = vmatpush.msra.mxu0 %v55_v24 }
  0x1b   :  { %202 = vmatpush.msra.mxu3 %v31_v25  ;;  %121 = vmatpush.msra.mxu1 %v31_v25 }
  0x1c   :  { %187 = vmatpush.msra.mxu2 %v54_v26  ;;  %81 = vmatpush.msra.mxu0 %v54_v26 }
  0x1d   :  { %203 = vmatpush.msra.mxu3 %v30_v27  ;;  %122 = vmatpush.msra.mxu1 %v30_v27 }
  0x1e   :  { %188 = vmatpush.msra.mxu2 %v53_v28  ;;  %82 = vmatpush.msra.mxu0 %v53_v28 }
  0x1f   :  { %204 = vmatpush.msra.mxu3 %v29_v29  ;;  %123 = vmatpush.msra.mxu1 %v29_v29 }
  0x20   :  { %189 = vmatpush.msra.mxu2 %v52_v30  ;;  %83 = vmatpush.msra.mxu0 %v52_v30 }
  0x21   :  { %205 = vmatpush.msra.mxu3 %v28_v31  ;;  %96 = vmatmul.f32.vlgmr.msra.gmra.mxu2 %v48_v32 }
  0x22   :  { %137 = vmatmul.f32.vlgmr.msra.gmra.mxu3 %v24_v33  ;;  %124 = vmatpush.msra.mxu1 %v28_v31 }
  0x23   :  { %84 = vmatmul.f32.vlgmr.msra.gmra.mxu0 %v44_v34  ;;  %125 = vmatmul.f32.vlgmr.msra.gmra.mxu1 %v20_v35 }
  0x29   :  { %99 = vmatmul.f32.gmra.mxu2 %v49_v36 }
  0x2a   :  { %140 = vmatmul.f32.gmra.mxu3 %v25_v37 }
  0x2b   :  { %87 = vmatmul.f32.gmra.mxu0 %v45_v38  ;;  %128 = vmatmul.f32.gmra.mxu1 %v21_v39 }
  0x31   :  { %102 = vmatmul.f32.gmra.mxu2 %v50_v40 }
  0x32   :  { %143 = vmatmul.f32.gmra.mxu3 %v26_v41 }
  0x33   :  { %90 = vmatmul.f32.gmra.mxu0 %v46_v42  ;;  %131 = vmatmul.f32.gmra.mxu1 %v22_v43 }
  0x39   :  { %105 = vmatmul.f32.gmra.mxu2 %v51_v44 }
  0x3a   :  { %146 = vmatmul.f32.gmra.mxu3 %v27_v45 }
  0x3b   :  { %93 = vmatmul.f32.gmra.mxu0 %v47_v46  ;;  %134 = vmatmul.f32.gmra.mxu1 %v23_v47 }
  0xa0   :  { %v85_v49 = vpop.f32.mrf.mxu0  ;;  %v126_v50 = vpop.f32.mrf.mxu1 }
  0xa1   :  { %v127_v51 = vadd.f32 %v126_v50, %v85_v49 }
  0xa3   :  { %v154_v52 = vadd.f32 %v206_v48, %v127_v51 }
  0xa4   :  { %v97_v53 = vpop.f32.mrf.mxu2 }
  0xa5   :  { %v138_v54 = vpop.f32.mrf.mxu3  ;;  %162 = vst [vmem:[%s413_s5] sm:$0xff] %v154_v52 }
  0xa6   :  { %v139_v55 = vadd.f32 %v138_v54, %v97_v53 }
  0xa8   :  { %v158_v56 = vadd.f32 %v206_v48, %v139_v55  ;;  %v88_v57 = vpop.f32.mrf.mxu0  ;;  %v129_v58 = vpop.f32.mrf.mxu1 }
  0xa9   :  { %v130_v59 = vadd.f32 %v129_v58, %v88_v57 }
  0xaa   :  { %166 = vst [vmem:[%s413_s5 + $0x20] sm:$0xff] %v158_v56 }
  0xab   :  { %v155_v60 = vadd.f32 %v206_v48, %v130_v59 }
  0xac   :  { %v100_v61 = vpop.f32.mrf.mxu2 }
  0xad   :  { %v141_v62 = vpop.f32.mrf.mxu3  ;;  %163 = vst [vmem:[%s413_s5 + $0x8] sm:$0xff] %v155_v60 }
  0xae   :  { %v142_v63 = vadd.f32 %v141_v62, %v100_v61 }
  0xb0   :  { %v159_v0 = vadd.f32 %v206_v48, %v142_v63  ;;  %v91_v1 = vpop.f32.mrf.mxu0  ;;  %v132_v2 = vpop.f32.mrf.mxu1 }
  0xb1   :  { %v133_v3 = vadd.f32 %v132_v2, %v91_v1 }
  0xb2   :  { %167 = vst [vmem:[%s413_s5 + $0x28] sm:$0xff] %v159_v0 }
  0xb3   :  { %v156_v4 = vadd.f32 %v206_v48, %v133_v3 }
  0xb4   :  { %v103_v5 = vpop.f32.mrf.mxu2 }
  0xb5   :  { %v144_v6 = vpop.f32.mrf.mxu3  ;;  %164 = vst [vmem:[%s413_s5 + $0x10] sm:$0xff] %v156_v4 }
  0xb6   :  { %v145_v7 = vadd.f32 %v144_v6, %v103_v5 }
  0xb8   :  { %v160_v8 = vadd.f32 %v206_v48, %v145_v7  ;;  %v94_v9 = vpop.f32.mrf.mxu0  ;;  %v135_v10 = vpop.f32.mrf.mxu1 }
  0xb9   :  { %v136_v11 = vadd.f32 %v135_v10, %v94_v9 }
  0xba   :  { %168 = vst [vmem:[%s413_s5 + $0x30] sm:$0xff] %v160_v8 }
  0xbb   :  { %v157_v12 = vadd.f32 %v206_v48, %v136_v11 }
  0xbc   :  { %v106_v13 = vpop.f32.mrf.mxu2 }
  0xbd   :  { %v147_v14 = vpop.f32.mrf.mxu3  ;;  %165 = vst [vmem:[%s413_s5 + $0x18] sm:$0xff] %v157_v12 }
  0xbe   :  { %v148_v15 = vadd.f32 %v147_v14, %v106_v13 }
  0xc0   :  { %v161_v16 = vadd.f32 %v206_v48, %v148_v15 }
  0xc2   :  { %169 = vst [vmem:[%s413_s5 + $0x38] sm:$0xff] %v161_v16 }

// kernel: bidirectional_lstm_forward.3
= control target key start
LH: loop header
LB: loop body
LE: loop exit
PB: predicated region body
PF: predicated region fallthrough
CT: control target
= control target key end

     0   :  { %vm56_vm0 = vcmask 130048   ;;  %s992_s1 = inlined_call_operand.vmem [shape: f32[16,1024], index: 1, kind: input, shape index: {}]   ;;  %s993_s0 = inlined_call_operand.vmem [shape: f32[64,16], index: 0, kind: input, shape index: {}]   ;;  %s994_s2 = inlined_call_operand.vmem [shape: f32[1,1024], index: 2, kind: input, shape index: {}]   ;;  %s995_s3 = inlined_call_operand.vmem [shape: f32[64,1024], index: 3, kind: output, shape index: {}]  }
   0x1   :  { %v32_v0 = vld [vmem:[%s992_s1 + $0x50] sm:$0xff]  ;;  %v33_v1 = vld [vmem:[%s992_s1 + $0x58] sm:$0xff]  ;;  %v576_v4 = vld [vmem:[%s993_s0] sm:$0xff] }
   0x2   :  { %v24_v2 = vld [vmem:[%s992_s1 + $0x10] sm:$0xff]  ;;  %177 = vmatpush.msra.mxu2 %v32_v0  ;;  %218 = vmatpush.msra.mxu3 %v33_v1  ;;  %v25_v3 = vld [vmem:[%s992_s1 + $0x18] sm:$0xff]  ;;  %v30_v7 = vld [vmem:[%s992_s1 + $0x40] sm:$0xff] }
   0x3   :  { %v36_v5 = vld [vmem:[%s992_s1 + $0x70] sm:$0xff]  ;;  %v37_v6 = vld [vmem:[%s992_s1 + $0x78] sm:$0xff]  ;;  %v31_v8 = vld [vmem:[%s992_s1 + $0x48] sm:$0xff]  ;;  %95 = vmatpush.msra.mxu0 %v30_v7 }
   0x4   :  { %178 = vmatpush.msra.mxu2 %v24_v2  ;;  %219 = vmatpush.msra.mxu3 %v25_v3  ;;  %v22_v9 = vld [vmem:[%s992_s1] sm:$0xff]  ;;  %v23_v10 = vld [vmem:[%s992_s1 + $0x8] sm:$0xff]  ;;  %v28_v11 = vld [vmem:[%s992_s1 + $0x30] sm:$0xff] }
   0x5   :  { %493 = vmatmul.msk.f32.vlgmr.msra.gmra.mxu2 %vm56_vm0, %v576_v4  ;;  %501 = vmatmul.msk.f32.vlgmr.msra.gmra.mxu3 %vm56_vm0, %v576_v4  ;;  %v29_v12 = vld [vmem:[%s992_s1 + $0x38] sm:$0xff]  ;;  %v34_v13 = vld [vmem:[%s992_s1 + $0x60] sm:$0xff]  ;;  %v35_v14 = vld [vmem:[%s992_s1 + $0x68] sm:$0xff] }
   0x6   :  { %341 = vmatpush.msrb.mxu2 %v36_v5  ;;  %382 = vmatpush.msrb.mxu3 %v37_v6  ;;  %v15_v15 = vld [vmem:[%s993_s0 + $0x8] sm:$0xff]  ;;  %v26_v16 = vld [vmem:[%s992_s1 + $0x20] sm:$0xff]  ;;  %v16_v18 = vld [vmem:[%s993_s0 + $0x10] sm:$0xff] }
   0x7   :  { %136 = vmatpush.msra.mxu1 %v31_v8  ;;  %96 = vmatpush.msra.mxu0 %v22_v9  ;;  %v27_v17 = vld [vmem:[%s992_s1 + $0x28] sm:$0xff]  ;;  %v17_v19 = vld [vmem:[%s993_s0 + $0x18] sm:$0xff]  ;;  %v18_v20 = vld [vmem:[%s993_s0 + $0x20] sm:$0xff] }
   0x8   :  { %342 = vmatpush.msrb.mxu2 %v28_v11  ;;  %383 = vmatpush.msrb.mxu3 %v29_v12  ;;  %v19_v21 = vld [vmem:[%s993_s0 + $0x28] sm:$0xff]  ;;  %v20_v22 = vld [vmem:[%s993_s0 + $0x30] sm:$0xff]  ;;  %v21_v23 = vld [vmem:[%s993_s0 + $0x38] sm:$0xff] }
   0x9   :  { %137 = vmatpush.msra.mxu1 %v23_v10  ;;  %477 = vmatmul.msk.f32.vlgmr.msra.gmra.mxu0 %vm56_vm0, %v576_v4  ;;  %v708_v24 = vld [vmem:[%s994_s2] sm:$0xff] }
   0xa   :  { %485 = vmatmul.msk.f32.vlgmr.msra.gmra.mxu1 %vm56_vm0, %v576_v4  ;;  %259 = vmatpush.msrb.mxu0 %v34_v13  ;;  %v713_v25 = vperm.slane %v708_v24, 0  ;;  %v716_v26 = vperm.slane %v708_v24, 1  ;;  %v719_v27 = vperm.slane %v708_v24, 2  ;;  %v722_v28 = vperm.slane %v708_v24, 3 }
   0xb   :  { %300 = vmatpush.msrb.mxu1 %v35_v14 }
   0xc   :  { %260 = vmatpush.msrb.mxu0 %v26_v16 }
   0xd   :  { %494 = vmatmul.msk.f32.gmra.mxu2 %vm56_vm0, %v15_v15  ;;  %502 = vmatmul.msk.f32.gmra.mxu3 %vm56_vm0, %v15_v15 }
   0xe   :  { %301 = vmatpush.msrb.mxu1 %v27_v17 }
  0x11   :  { %478 = vmatmul.msk.f32.gmra.mxu0 %vm56_vm0, %v15_v15 }
  0x12   :  { %486 = vmatmul.msk.f32.gmra.mxu1 %vm56_vm0, %v15_v15 }
  0x15   :  { %495 = vmatmul.msk.f32.gmra.mxu2 %vm56_vm0, %v16_v18  ;;  %503 = vmatmul.msk.f32.gmra.mxu3 %vm56_vm0, %v16_v18 }
  0x19   :  { %479 = vmatmul.msk.f32.gmra.mxu0 %vm56_vm0, %v16_v18 }
  0x1a   :  { %487 = vmatmul.msk.f32.gmra.mxu1 %vm56_vm0, %v16_v18 }
  0x1d   :  { %496 = vmatmul.msk.f32.gmra.mxu2 %vm56_vm0, %v17_v19  ;;  %504 = vmatmul.msk.f32.gmra.mxu3 %vm56_vm0, %v17_v19 }
  0x21   :  { %480 = vmatmul.msk.f32.gmra.mxu0 %vm56_vm0, %v17_v19 }
  0x22   :  { %488 = vmatmul.msk.f32.gmra.mxu1 %vm56_vm0, %v17_v19 }
  0x25   :  { %497 = vmatmul.msk.f32.gmra.mxu2 %vm56_vm0, %v18_v20  ;;  %505 = vmatmul.msk.f32.gmra.mxu3 %vm56_vm0, %v18_v20 }
  0x29   :  { %481 = vmatmul.msk.f32.gmra.mxu0 %vm56_vm0, %v18_v20 }
  0x2a   :  { %489 = vmatmul.msk.f32.gmra.mxu1 %vm56_vm0, %v18_v20 }
  0x2d   :  { %498 = vmatmul.msk.f32.gmra.mxu2 %vm56_vm0, %v19_v21  ;;  %506 = vmatmul.msk.f32.gmra.mxu3 %vm56_vm0, %v19_v21 }
  0x31   :  { %482 = vmatmul.msk.f32.gmra.mxu0 %vm56_vm0, %v19_v21 }
  0x32   :  { %490 = vmatmul.msk.f32.gmra.mxu1 %vm56_vm0, %v19_v21 }
  0x35   :  { %499 = vmatmul.msk.f32.gmra.mxu2 %vm56_vm0, %v20_v22  ;;  %507 = vmatmul.msk.f32.gmra.mxu3 %vm56_vm0, %v20_v22 }
  0x39   :  { %483 = vmatmul.msk.f32.gmra.mxu0 %vm56_vm0, %v20_v22 }
  0x3a   :  { %491 = vmatmul.msk.f32.gmra.mxu1 %vm56_vm0, %v20_v22 }
  0x3d   :  { %500 = vmatmul.msk.f32.gmra.mxu2 %vm56_vm0, %v21_v23  ;;  %508 = vmatmul.msk.f32.gmra.mxu3 %vm56_vm0, %v21_v23 }
  0x41   :  { %484 = vmatmul.msk.f32.gmra.mxu0 %vm56_vm0, %v21_v23 }
  0x42   :  { %492 = vmatmul.msk.f32.gmra.mxu1 %vm56_vm0, %v21_v23 }
  0x45   :  { %525 = vmatmul.msk.f32.vlgmr.msrb.gmra.mxu2 %vm56_vm0, %v576_v4  ;;  %533 = vmatmul.msk.f32.vlgmr.msrb.gmra.mxu3 %vm56_vm0, %v576_v4 }
  0x49   :  { %509 = vmatmul.msk.f32.vlgmr.msrb.gmra.mxu0 %vm56_vm0, %v576_v4 }
  0x4a   :  { %517 = vmatmul.msk.f32.vlgmr.msrb.gmra.mxu1 %vm56_vm0, %v576_v4 }
  0x4d   :  { %526 = vmatmul.msk.f32.gmra.mxu2 %vm56_vm0, %v15_v15  ;;  %534 = vmatmul.msk.f32.gmra.mxu3 %vm56_vm0, %v15_v15 }
  0x51   :  { %510 = vmatmul.msk.f32.gmra.mxu0 %vm56_vm0, %v15_v15 }
  0x52   :  { %518 = vmatmul.msk.f32.gmra.mxu1 %vm56_vm0, %v15_v15 }
  0x55   :  { %527 = vmatmul.msk.f32.gmra.mxu2 %vm56_vm0, %v16_v18  ;;  %535 = vmatmul.msk.f32.gmra.mxu3 %vm56_vm0, %v16_v18 }
  0x59   :  { %511 = vmatmul.msk.f32.gmra.mxu0 %vm56_vm0, %v16_v18 }
  0x5a   :  { %519 = vmatmul.msk.f32.gmra.mxu1 %vm56_vm0, %v16_v18 }
  0x5d   :  { %528 = vmatmul.msk.f32.gmra.mxu2 %vm56_vm0, %v17_v19  ;;  %536 = vmatmul.msk.f32.gmra.mxu3 %vm56_vm0, %v17_v19 }
  0x61   :  { %512 = vmatmul.msk.f32.gmra.mxu0 %vm56_vm0, %v17_v19 }
  0x62   :  { %520 = vmatmul.msk.f32.gmra.mxu1 %vm56_vm0, %v17_v19 }
  0x65   :  { %529 = vmatmul.msk.f32.gmra.mxu2 %vm56_vm0, %v18_v20  ;;  %537 = vmatmul.msk.f32.gmra.mxu3 %vm56_vm0, %v18_v20 }
  0x69   :  { %513 = vmatmul.msk.f32.gmra.mxu0 %vm56_vm0, %v18_v20 }
  0x6a   :  { %521 = vmatmul.msk.f32.gmra.mxu1 %vm56_vm0, %v18_v20 }
  0x6d   :  { %530 = vmatmul.msk.f32.gmra.mxu2 %vm56_vm0, %v19_v21  ;;  %538 = vmatmul.msk.f32.gmra.mxu3 %vm56_vm0, %v19_v21 }
  0x71   :  { %514 = vmatmul.msk.f32.gmra.mxu0 %vm56_vm0, %v19_v21 }
  0x72   :  { %522 = vmatmul.msk.f32.gmra.mxu1 %vm56_vm0, %v19_v21 }
  0x75   :  { %531 = vmatmul.msk.f32.gmra.mxu2 %vm56_vm0, %v20_v22  ;;  %539 = vmatmul.msk.f32.gmra.mxu3 %vm56_vm0, %v20_v22 }
  0x79   :  { %515 = vmatmul.msk.f32.gmra.mxu0 %vm56_vm0, %v20_v22 }
  0x7a   :  { %523 = vmatmul.msk.f32.gmra.mxu1 %vm56_vm0, %v20_v22 }
  0x7d   :  { %532 = vmatmul.msk.f32.gmra.mxu2 %vm56_vm0, %v21_v23  ;;  %540 = vmatmul.msk.f32.gmra.mxu3 %vm56_vm0, %v21_v23 }
  0x81   :  { %516 = vmatmul.msk.f32.gmra.mxu0 %vm56_vm0, %v21_v23 }
  0x82   :  { %524 = vmatmul.msk.f32.gmra.mxu1 %vm56_vm0, %v21_v23 }
  0x86   :  { %v98_v29 = vpop.f32.mrf.mxu0 }
  0x87   :  { %v139_v30 = vpop.f32.mrf.mxu1  ;;  %v99_v31 = vadd.f32 %v98_v29, %v713_v25 }
  0x88   :  { %v140_v32 = vadd.f32 %v139_v30, %v716_v26  ;;  %v180_v33 = vpop.f32.mrf.mxu2  ;;  %v221_v34 = vpop.f32.mrf.mxu3 }
  0x89   :  { %v181_v35 = vadd.f32 %v180_v33, %v719_v27  ;;  %v222_v36 = vadd.f32 %v221_v34, %v722_v28  ;;  %409 = vst [vmem:[%s995_s3] sm:$0xff] %v99_v31 }
  0x8a   :  { %410 = vst [vmem:[%s995_s3 + $0x8] sm:$0xff] %v140_v32 }
  0x8b   :  { %411 = vst [vmem:[%s995_s3 + $0x10] sm:$0xff] %v181_v35 }
  0x8c   :  { %412 = vst [vmem:[%s995_s3 + $0x18] sm:$0xff] %v222_v36 }
  0x8e   :  { %v101_v37 = vpop.f32.mrf.mxu0 }
  0x8f   :  { %v142_v38 = vpop.f32.mrf.mxu1  ;;  %v102_v39 = vadd.f32 %v101_v37, %v713_v25 }
  0x90   :  { %v143_v40 = vadd.f32 %v142_v38, %v716_v26  ;;  %v183_v41 = vpop.f32.mrf.mxu2  ;;  %v224_v42 = vpop.f32.mrf.mxu3 }
  0x91   :  { %v184_v43 = vadd.f32 %v183_v41, %v719_v27  ;;  %v225_v44 = vadd.f32 %v224_v42, %v722_v28  ;;  %417 = vst [vmem:[%s995_s3 + $0x40] sm:$0xff] %v102_v39 }
  0x92   :  { %418 = vst [vmem:[%s995_s3 + $0x48] sm:$0xff] %v143_v40 }
  0x93   :  { %419 = vst [vmem:[%s995_s3 + $0x50] sm:$0xff] %v184_v43 }
  0x94   :  { %420 = vst [vmem:[%s995_s3 + $0x58] sm:$0xff] %v225_v44 }
  0x96   :  { %v104_v45 = vpop.f32.mrf.mxu0 }
  0x97   :  { %v145_v46 = vpop.f32.mrf.mxu1  ;;  %v105_v47 = vadd.f32 %v104_v45, %v713_v25 }
  0x98   :  { %v146_v48 = vadd.f32 %v145_v46, %v716_v26  ;;  %v186_v49 = vpop.f32.mrf.mxu2  ;;  %v227_v50 = vpop.f32.mrf.mxu3 }
  0x99   :  { %v187_v51 = vadd.f32 %v186_v49, %v719_v27  ;;  %v228_v52 = vadd.f32 %v227_v50, %v722_v28  ;;  %425 = vst [vmem:[%s995_s3 + $0x80] sm:$0xff] %v105_v47 }
  0x9a   :  { %426 = vst [vmem:[%s995_s3 + $0x88] sm:$0xff] %v146_v48 }
  0x9b   :  { %427 = vst [vmem:[%s995_s3 + $0x90] sm:$0xff] %v187_v51 }
  0x9c   :  { %428 = vst [vmem:[%s995_s3 + $0x98] sm:$0xff] %v228_v52 }
  0x9e   :  { %v107_v53 = vpop.f32.mrf.mxu0 }
  0x9f   :  { %v148_v54 = vpop.f32.mrf.mxu1  ;;  %v108_v55 = vadd.f32 %v107_v53, %v713_v25 }
  0xa0   :  { %v149_v56 = vadd.f32 %v148_v54, %v716_v26  ;;  %v189_v57 = vpop.f32.mrf.mxu2  ;;  %v230_v58 = vpop.f32.mrf.mxu3 }
  0xa1   :  { %v190_v59 = vadd.f32 %v189_v57, %v719_v27  ;;  %v231_v60 = vadd.f32 %v230_v58, %v722_v28  ;;  %433 = vst [vmem:[%s995_s3 + $0xc0] sm:$0xff] %v108_v55 }
  0xa2   :  { %434 = vst [vmem:[%s995_s3 + $0xc8] sm:$0xff] %v149_v56 }
  0xa3   :  { %435 = vst [vmem:[%s995_s3 + $0xd0] sm:$0xff] %v190_v59 }
  0xa4   :  { %436 = vst [vmem:[%s995_s3 + $0xd8] sm:$0xff] %v231_v60 }
  0xa6   :  { %v110_v61 = vpop.f32.mrf.mxu0 }
  0xa7   :  { %v151_v62 = vpop.f32.mrf.mxu1  ;;  %v111_v63 = vadd.f32 %v110_v61, %v713_v25 }
  0xa8   :  { %v152_v0 = vadd.f32 %v151_v62, %v716_v26  ;;  %v192_v1 = vpop.f32.mrf.mxu2  ;;  %v233_v2 = vpop.f32.mrf.mxu3 }
  0xa9   :  { %v193_v3 = vadd.f32 %v192_v1, %v719_v27  ;;  %v234_v4 = vadd.f32 %v233_v2, %v722_v28  ;;  %441 = vst [vmem:[%s995_s3 + $0x100] sm:$0xff] %v111_v63 }
  0xaa   :  { %442 = vst [vmem:[%s995_s3 + $0x108] sm:$0xff] %v152_v0 }
  0xab   :  { %443 = vst [vmem:[%s995_s3 + $0x110] sm:$0xff] %v193_v3 }
  0xac   :  { %444 = vst [vmem:[%s995_s3 + $0x118] sm:$0xff] %v234_v4 }
  0xae   :  { %v113_v5 = vpop.f32.mrf.mxu0 }
  0xaf   :  { %v154_v6 = vpop.f32.mrf.mxu1  ;;  %v114_v7 = vadd.f32 %v113_v5, %v713_v25 }
  0xb0   :  { %v155_v8 = vadd.f32 %v154_v6, %v716_v26  ;;  %v195_v9 = vpop.f32.mrf.mxu2  ;;  %v236_v10 = vpop.f32.mrf.mxu3 }
  0xb1   :  { %v196_v11 = vadd.f32 %v195_v9, %v719_v27  ;;  %v237_v12 = vadd.f32 %v236_v10, %v722_v28  ;;  %449 = vst [vmem:[%s995_s3 + $0x140] sm:$0xff] %v114_v7 }
  0xb2   :  { %450 = vst [vmem:[%s995_s3 + $0x148] sm:$0xff] %v155_v8 }
  0xb3   :  { %451 = vst [vmem:[%s995_s3 + $0x150] sm:$0xff] %v196_v11 }
  0xb4   :  { %452 = vst [vmem:[%s995_s3 + $0x158] sm:$0xff] %v237_v12 }
  0xb6   :  { %v116_v13 = vpop.f32.mrf.mxu0 }
  0xb7   :  { %v157_v14 = vpop.f32.mrf.mxu1  ;;  %v117_v15 = vadd.f32 %v116_v13, %v713_v25 }
  0xb8   :  { %v158_v16 = vadd.f32 %v157_v14, %v716_v26  ;;  %v198_v17 = vpop.f32.mrf.mxu2  ;;  %v239_v18 = vpop.f32.mrf.mxu3 }
  0xb9   :  { %v199_v19 = vadd.f32 %v198_v17, %v719_v27  ;;  %v240_v20 = vadd.f32 %v239_v18, %v722_v28  ;;  %457 = vst [vmem:[%s995_s3 + $0x180] sm:$0xff] %v117_v15 }
  0xba   :  { %458 = vst [vmem:[%s995_s3 + $0x188] sm:$0xff] %v158_v16 }
  0xbb   :  { %459 = vst [vmem:[%s995_s3 + $0x190] sm:$0xff] %v199_v19 }
  0xbc   :  { %460 = vst [vmem:[%s995_s3 + $0x198] sm:$0xff] %v240_v20 }
  0xbe   :  { %v119_v21 = vpop.f32.mrf.mxu0 }
  0xbf   :  { %v160_v22 = vpop.f32.mrf.mxu1  ;;  %v120_v23 = vadd.f32 %v119_v21, %v713_v25  ;;  %v850_v25 = vperm.slane %v708_v24, 4 }
  0xc0   :  { %v161_v29 = vadd.f32 %v160_v22, %v716_v26  ;;  %v201_v30 = vpop.f32.mrf.mxu2  ;;  %v242_v31 = vpop.f32.mrf.mxu3  ;;  %v853_v26 = vperm.slane %v708_v24, 5 }
  0xc1   :  { %v202_v32 = vadd.f32 %v201_v30, %v719_v27  ;;  %v243_v33 = vadd.f32 %v242_v31, %v722_v28  ;;  %465 = vst [vmem:[%s995_s3 + $0x1c0] sm:$0xff] %v120_v23  ;;  %v859_v27 = vperm.slane %v708_v24, 6  ;;  %v862_v28 = vperm.slane %v708_v24, 7 }
  0xc2   :  { %466 = vst [vmem:[%s995_s3 + $0x1c8] sm:$0xff] %v161_v29 }
  0xc3   :  { %467 = vst [vmem:[%s995_s3 + $0x1d0] sm:$0xff] %v202_v32 }
  0xc4   :  { %468 = vst [vmem:[%s995_s3 + $0x1d8] sm:$0xff] %v243_v33 }
  0xc6   :  { %v262_v34 = vpop.f32.mrf.mxu0 }
  0xc7   :  { %v303_v35 = vpop.f32.mrf.mxu1  ;;  %v263_v36 = vadd.f32 %v262_v34, %v850_v25 }
  0xc8   :  { %v304_v37 = vadd.f32 %v303_v35, %v853_v26  ;;  %v344_v38 = vpop.f32.mrf.mxu2  ;;  %v385_v39 = vpop.f32.mrf.mxu3 }
  0xc9   :  { %v345_v40 = vadd.f32 %v344_v38, %v859_v27  ;;  %v386_v41 = vadd.f32 %v385_v39, %v862_v28  ;;  %413 = vst [vmem:[%s995_s3 + $0x20] sm:$0xff] %v263_v36 }
  0xca   :  { %414 = vst [vmem:[%s995_s3 + $0x28] sm:$0xff] %v304_v37 }
  0xcb   :  { %415 = vst [vmem:[%s995_s3 + $0x30] sm:$0xff] %v345_v40 }
  0xcc   :  { %416 = vst [vmem:[%s995_s3 + $0x38] sm:$0xff] %v386_v41 }
  0xce   :  { %v265_v24 = vpop.f32.mrf.mxu0 }
  0xcf   :  { %v306_v42 = vpop.f32.mrf.mxu1  ;;  %v266_v43 = vadd.f32 %v265_v24, %v850_v25 }
  0xd0   :  { %v307_v44 = vadd.f32 %v306_v42, %v853_v26  ;;  %v347_v45 = vpop.f32.mrf.mxu2  ;;  %v388_v46 = vpop.f32.mrf.mxu3 }
  0xd1   :  { %v348_v47 = vadd.f32 %v347_v45, %v859_v27  ;;  %v389_v48 = vadd.f32 %v388_v46, %v862_v28  ;;  %421 = vst [vmem:[%s995_s3 + $0x60] sm:$0xff] %v266_v43 }
  0xd2   :  { %422 = vst [vmem:[%s995_s3 + $0x68] sm:$0xff] %v307_v44 }
  0xd3   :  { %423 = vst [vmem:[%s995_s3 + $0x70] sm:$0xff] %v348_v47 }
  0xd4   :  { %424 = vst [vmem:[%s995_s3 + $0x78] sm:$0xff] %v389_v48 }
  0xd6   :  { %v268_v49 = vpop.f32.mrf.mxu0 }
  0xd7   :  { %v309_v50 = vpop.f32.mrf.mxu1  ;;  %v269_v51 = vadd.f32 %v268_v49, %v850_v25 }
  0xd8   :  { %v310_v52 = vadd.f32 %v309_v50, %v853_v26  ;;  %v350_v53 = vpop.f32.mrf.mxu2  ;;  %v391_v54 = vpop.f32.mrf.mxu3 }
  0xd9   :  { %v351_v55 = vadd.f32 %v350_v53, %v859_v27  ;;  %v392_v56 = vadd.f32 %v391_v54, %v862_v28  ;;  %429 = vst [vmem:[%s995_s3 + $0xa0] sm:$0xff] %v269_v51 }
  0xda   :  { %430 = vst [vmem:[%s995_s3 + $0xa8] sm:$0xff] %v310_v52 }
  0xdb   :  { %431 = vst [vmem:[%s995_s3 + $0xb0] sm:$0xff] %v351_v55 }
  0xdc   :  { %432 = vst [vmem:[%s995_s3 + $0xb8] sm:$0xff] %v392_v56 }
  0xde   :  { %v271_v57 = vpop.f32.mrf.mxu0 }
  0xdf   :  { %v312_v58 = vpop.f32.mrf.mxu1  ;;  %v272_v59 = vadd.f32 %v271_v57, %v850_v25 }
  0xe0   :  { %v313_v60 = vadd.f32 %v312_v58, %v853_v26  ;;  %v353_v61 = vpop.f32.mrf.mxu2  ;;  %v394_v62 = vpop.f32.mrf.mxu3 }
  0xe1   :  { %v354_v63 = vadd.f32 %v353_v61, %v859_v27  ;;  %v395_v0 = vadd.f32 %v394_v62, %v862_v28  ;;  %437 = vst [vmem:[%s995_s3 + $0xe0] sm:$0xff] %v272_v59 }
  0xe2   :  { %438 = vst [vmem:[%s995_s3 + $0xe8] sm:$0xff] %v313_v60 }
  0xe3   :  { %439 = vst [vmem:[%s995_s3 + $0xf0] sm:$0xff] %v354_v63 }
  0xe4   :  { %440 = vst [vmem:[%s995_s3 + $0xf8] sm:$0xff] %v395_v0 }
  0xe6   :  { %v274_v1 = vpop.f32.mrf.mxu0 }
  0xe7   :  { %v315_v2 = vpop.f32.mrf.mxu1  ;;  %v275_v3 = vadd.f32 %v274_v1, %v850_v25 }
  0xe8   :  { %v316_v4 = vadd.f32 %v315_v2, %v853_v26  ;;  %v356_v5 = vpop.f32.mrf.mxu2  ;;  %v397_v6 = vpop.f32.mrf.mxu3 }
  0xe9   :  { %v357_v7 = vadd.f32 %v356_v5, %v859_v27  ;;  %v398_v8 = vadd.f32 %v397_v6, %v862_v28  ;;  %445 = vst [vmem:[%s995_s3 + $0x120] sm:$0xff] %v275_v3 }
  0xea   :  { %446 = vst [vmem:[%s995_s3 + $0x128] sm:$0xff] %v316_v4 }
  0xeb   :  { %447 = vst [vmem:[%s995_s3 + $0x130] sm:$0xff] %v357_v7 }
  0xec   :  { %448 = vst [vmem:[%s995_s3 + $0x138] sm:$0xff] %v398_v8 }
  0xee   :  { %v277_v9 = vpop.f32.mrf.mxu0 }
  0xef   :  { %v318_v10 = vpop.f32.mrf.mxu1  ;;  %v278_v11 = vadd.f32 %v277_v9, %v850_v25 }
  0xf0   :  { %v319_v12 = vadd.f32 %v318_v10, %v853_v26  ;;  %v359_v13 = vpop.f32.mrf.mxu2  ;;  %v400_v14 = vpop.f32.mrf.mxu3 }
  0xf1   :  { %v360_v15 = vadd.f32 %v359_v13, %v859_v27  ;;  %v401_v16 = vadd.f32 %v400_v14, %v862_v28  ;;  %453 = vst [vmem:[%s995_s3 + $0x160] sm:$0xff] %v278_v11 }
  0xf2   :  { %454 = vst [vmem:[%s995_s3 + $0x168] sm:$0xff] %v319_v12 }
  0xf3   :  { %455 = vst [vmem:[%s995_s3 + $0x170] sm:$0xff] %v360_v15 }
  0xf4   :  { %456 = vst [vmem:[%s995_s3 + $0x178] sm:$0xff] %v401_v16 }
  0xf6   :  { %v280_v17 = vpop.f32.mrf.mxu0 }
  0xf7   :  { %v321_v18 = vpop.f32.mrf.mxu1  ;;  %v281_v19 = vadd.f32 %v280_v17, %v850_v25 }
  0xf8   :  { %v322_v20 = vadd.f32 %v321_v18, %v853_v26  ;;  %v362_v21 = vpop.f32.mrf.mxu2  ;;  %v403_v22 = vpop.f32.mrf.mxu3 }
  0xf9   :  { %v363_v23 = vadd.f32 %v362_v21, %v859_v27  ;;  %v404_v29 = vadd.f32 %v403_v22, %v862_v28  ;;  %461 = vst [vmem:[%s995_s3 + $0x1a0] sm:$0xff] %v281_v19 }
  0xfa   :  { %462 = vst [vmem:[%s995_s3 + $0x1a8] sm:$0xff] %v322_v20 }
  0xfb   :  { %463 = vst [vmem:[%s995_s3 + $0x1b0] sm:$0xff] %v363_v23 }
  0xfc   :  { %464 = vst [vmem:[%s995_s3 + $0x1b8] sm:$0xff] %v404_v29 }
  0xfe   :  { %v283_v30 = vpop.f32.mrf.mxu0 }
  0xff   :  { %v324_v31 = vpop.f32.mrf.mxu1  ;;  %v284_v32 = vadd.f32 %v283_v30, %v850_v25 }
 0x100   :  { %v325_v33 = vadd.f32 %v324_v31, %v853_v26  ;;  %v365_v34 = vpop.f32.mrf.mxu2  ;;  %v406_v35 = vpop.f32.mrf.mxu3 }
 0x101   :  { %v366_v36 = vadd.f32 %v365_v34, %v859_v27  ;;  %v407_v37 = vadd.f32 %v406_v35, %v862_v28  ;;  %469 = vst [vmem:[%s995_s3 + $0x1e0] sm:$0xff] %v284_v32 }
 0x102   :  { %470 = vst [vmem:[%s995_s3 + $0x1e8] sm:$0xff] %v325_v33 }
 0x103   :  { %471 = vst [vmem:[%s995_s3 + $0x1f0] sm:$0xff] %v366_v36 }
 0x104   :  { %472 = vst [vmem:[%s995_s3 + $0x1f8] sm:$0xff] %v407_v37 }

// kernel: bidirectional_lstm_forward.4
= control target key start
LH: loop header
LB: loop body
LE: loop exit
PB: predicated region body
PF: predicated region fallthrough
CT: control target
= control target key end

     0   :  { %s1998_s9 = smov 0   ;;  %s2000_s10 = smov 0   ;;  %s3124_s0 = inlined_call_operand.vmem [shape: f32[8,8,1024], index: 0, kind: input, shape index: {}]   ;;  %s3125_s1 = inlined_call_operand.vmem [shape: f32[2,128,512], index: 1, kind: input, shape index: {}]   ;;  %s3126_s2 = inlined_call_operand.vmem [shape: f32[2,8,8,128], index: 2, kind: output, shape index: {}]  }
   0x1   :  { %s2002_s11 = smov 0  }
   0x2 LB: > { %s2014_s12 = sadd.s32 4294967295, %s1980_s11   ;;  %s2017_s13 = sadd.s32 1, %s1980_s11   ;;  %s1980_s11 = sphi %s2002_s11, %s3177_s11   ;;  %s1976_s10 = sphi %s2000_s10, %s3176_s10   ;;  %s1972_s9 = sphi %s1998_s9, %s3175_s9  }
   0x3   : > { %s16_s14 = ssub.s32 %s1980_s11, %s2017_s13  ;;  %s19_s15 = sadd.s32 1, %s1976_s10 }
   0x4   : > { %p17_p0 = scmp.eq.s32.totalorder %s16_s14, 0  ;;  %p26_p1 = scmp.ne.s32.totalorder %s1976_s10, %s1972_s9 }
   0x5   : > { %p27_p2 = scmp.eq.s32.totalorder %s1980_s11, 0  ;;  %p1806_p4 = scmp.ge.s32.totalorder %s1980_s11, 2 }
   0x6   : > { %s2026_s16 = scalar_select %p17_p0, %s1976_s10, %s19_s15  }
   0x7   : > { %p28_p3 = por %p27_p2, %p26_p1  ;;  %104 = sbr.rel (%p1806_p4) target bundleno = 48 (0x30), region = 16 }
   0xc   : > { %107 = sbr.rel (!%p28_p3) target bundleno = 48 (0x30), region = 20  ;;  %s109_s17 = sand.u32 (%p28_p3), 1, %s1976_s10  }
   0xd   : > { %s1842_s18 = sshll.u32 (%p28_p3), %s1980_s11, 5  ;;  %s1807_s19 = sshll.u32 (%p28_p3), %s109_s17, 8 }
   0xe   : > { %s2034_s22 = scalar_lea.vmem (%p28_p3), %s3124_s0, %s1842_s18  ;;  %s2039_s23 = scalar_lea.vmem (%p28_p3), [#allocation4], %s1807_s19 }
   0xf   : > { %v127_v0 = vld [vmem:[%s2034_s22] sm:$0xff] (%p28_p3)  ;;  %v129_v1 = vld [vmem:[%s2034_s22 + $0x8] sm:$0xff] (%p28_p3)  ;;  %v131_v2 = vld [vmem:[%s2034_s22 + $0x10] sm:$0xff] (%p28_p3) }
  0x10   : > { %128 = vst [vmem:[%s2039_s23] sm:$0xff] (%p28_p3), %v127_v0  ;;  %v133_v3 = vld [vmem:[%s2034_s22 + $0x18] sm:$0xff] (%p28_p3)  ;;  %v135_v4 = vld [vmem:[%s2034_s22 + $0x40] sm:$0xff] (%p28_p3)  ;;  %v137_v5 = vld [vmem:[%s2034_s22 + $0x48] sm:$0xff] (%p28_p3) }
  0x11   : > { %130 = vst [vmem:[%s2039_s23 + $0x8] sm:$0xff] %v129_v1  ;;  %v139_v6 = vld [vmem:[%s2034_s22 + $0x50] sm:$0xff]  ;;  %v141_v7 = vld [vmem:[%s2034_s22 + $0x58] sm:$0xff]  ;;  %v143_v8 = vld [vmem:[%s2034_s22 + $0x80] sm:$0xff] }
  0x12   : > { %132 = vst [vmem:[%s2039_s23 + $0x10] sm:$0xff] %v131_v2  ;;  %v145_v9 = vld [vmem:[%s2034_s22 + $0x88] sm:$0xff]  ;;  %v147_v10 = vld [vmem:[%s2034_s22 + $0x90] sm:$0xff]  ;;  %v149_v11 = vld [vmem:[%s2034_s22 + $0x98] sm:$0xff] }
  0x13   : > { %134 = vst [vmem:[%s2039_s23 + $0x18] sm:$0xff] %v133_v3  ;;  %v151_v12 = vld [vmem:[%s2034_s22 + $0xc0] sm:$0xff]  ;;  %v153_v13 = vld [vmem:[%s2034_s22 + $0xc8] sm:$0xff]  ;;  %v155_v14 = vld [vmem:[%s2034_s22 + $0xd0] sm:$0xff] }
  0x14   : > { %136 = vst [vmem:[%s2039_s23 + $0x20] sm:$0xff] %v135_v4  ;;  %v157_v15 = vld [vmem:[%s2034_s22 + $0xd8] sm:$0xff]  ;;  %v159_v16 = vld [vmem:[%s2034_s22 + $0x100] sm:$0xff]  ;;  %v161_v17 = vld [vmem:[%s2034_s22 + $0x108] sm:$0xff] }
  0x15   : > { %138 = vst [vmem:[%s2039_s23 + $0x28] sm:$0xff] %v137_v5  ;;  %v163_v18 = vld [vmem:[%s2034_s22 + $0x110] sm:$0xff]  ;;  %v165_v19 = vld [vmem:[%s2034_s22 + $0x118] sm:$0xff]  ;;  %v167_v20 = vld [vmem:[%s2034_s22 + $0x140] sm:$0xff] }
  0x16   : > { %140 = vst [vmem:[%s2039_s23 + $0x30] sm:$0xff] %v139_v6  ;;  %v169_v21 = vld [vmem:[%s2034_s22 + $0x148] sm:$0xff]  ;;  %v171_v22 = vld [vmem:[%s2034_s22 + $0x150] sm:$0xff]  ;;  %v173_v23 = vld [vmem:[%s2034_s22 + $0x158] sm:$0xff] }
  0x17   : > { %142 = vst [vmem:[%s2039_s23 + $0x38] sm:$0xff] %v141_v7  ;;  %v175_v24 = vld [vmem:[%s2034_s22 + $0x180] sm:$0xff]  ;;  %v177_v25 = vld [vmem:[%s2034_s22 + $0x188] sm:$0xff]  ;;  %v179_v26 = vld [vmem:[%s2034_s22 + $0x190] sm:$0xff] }
  0x18   : > { %144 = vst [vmem:[%s2039_s23 + $0x40] sm:$0xff] %v143_v8  ;;  %v181_v27 = vld [vmem:[%s2034_s22 + $0x198] sm:$0xff]  ;;  %v183_v28 = vld [vmem:[%s2034_s22 + $0x1c0] sm:$0xff]  ;;  %v185_v29 = vld [vmem:[%s2034_s22 + $0x1c8] sm:$0xff] }
  0x19   : > { %146 = vst [vmem:[%s2039_s23 + $0x48] sm:$0xff] %v145_v9  ;;  %v187_v30 = vld [vmem:[%s2034_s22 + $0x1d0] sm:$0xff]  ;;  %v189_v31 = vld [vmem:[%s2034_s22 + $0x1d8] sm:$0xff] }
  0x1a   : > { %148 = vst [vmem:[%s2039_s23 + $0x50] sm:$0xff] %v147_v10 }
  0x1b   : > { %150 = vst [vmem:[%s2039_s23 + $0x58] sm:$0xff] %v149_v11 }
  0x1c   : > { %152 = vst [vmem:[%s2039_s23 + $0x60] sm:$0xff] %v151_v12 }
  0x1d   : > { %154 = vst [vmem:[%s2039_s23 + $0x68] sm:$0xff] %v153_v13 }
  0x1e   : > { %156 = vst [vmem:[%s2039_s23 + $0x70] sm:$0xff] %v155_v14 }
  0x1f   : > { %158 = vst [vmem:[%s2039_s23 + $0x78] sm:$0xff] %v157_v15 }
  0x20   : > { %160 = vst [vmem:[%s2039_s23 + $0x80] sm:$0xff] %v159_v16 }
  0x21   : > { %162 = vst [vmem:[%s2039_s23 + $0x88] sm:$0xff] %v161_v17 }
  0x22   : > { %164 = vst [vmem:[%s2039_s23 + $0x90] sm:$0xff] %v163_v18 }
  0x23   : > { %166 = vst [vmem:[%s2039_s23 + $0x98] sm:$0xff] %v165_v19 }
  0x24   : > { %168 = vst [vmem:[%s2039_s23 + $0xa0] sm:$0xff] %v167_v20 }
  0x25   : > { %170 = vst [vmem:[%s2039_s23 + $0xa8] sm:$0xff] %v169_v21 }
  0x26   : > { %172 = vst [vmem:[%s2039_s23 + $0xb0] sm:$0xff] %v171_v22 }
  0x27   : > { %174 = vst [vmem:[%s2039_s23 + $0xb8] sm:$0xff] %v173_v23 }
  0x28   : > { %176 = vst [vmem:[%s2039_s23 + $0xc0] sm:$0xff] %v175_v24 }
  0x29   : > { %178 = vst [vmem:[%s2039_s23 + $0xc8] sm:$0xff] %v177_v25 }
  0x2a   : > { %180 = vst [vmem:[%s2039_s23 + $0xd0] sm:$0xff] %v179_v26 }
  0x2b   : > { %182 = vst [vmem:[%s2039_s23 + $0xd8] sm:$0xff] %v181_v27 }
  0x2c   : > { %184 = vst [vmem:[%s2039_s23 + $0xe0] sm:$0xff] %v183_v28 }
  0x2d   : > { %186 = vst [vmem:[%s2039_s23 + $0xe8] sm:$0xff] %v185_v29 }
  0x2e   : > { %188 = vst [vmem:[%s2039_s23 + $0xf0] sm:$0xff] %v187_v30 }
  0x2f   : > { %190 = vst [vmem:[%s2039_s23 + $0xf8] sm:$0xff] %v189_v31 }
  0x30 PF: > { %p1810_p5 = scmp.ge.s32.totalorder %s1980_s11, 1  ;;  %p203_p6 = scmp.lt.s32.totalorder %s1980_s11, 3 }
  0x32   : > { %p204_p7 = pnand %p1810_p5, %p203_p6 }
  0x34   : > { %207 = sbr.rel (%p204_p7) target bundleno = 1336 (0x538), region = 47 }
  0x39   : > { %p237_p8 = scmp.lt.s32.totalorder %s2014_s12, 1  ;;  %v1982_v31 = vmov 0.0   ;;  %p249_p9 = scmp.eq.s32.totalorder %s2014_s12, 0 }
  0x3a   : > { %s210_s29 = sand.u32 1, %s1972_s9  }
  0x3b   : > { %s2106_s24 = scalar_select %p237_p8, %s2014_s12, 1 }
  0x3c   : > { %s2502_s30 = scalar_select %p249_p9, 0, 7 }
  0x3d   : > { %s1843_s25 = sshll.u32 %s2106_s24, 9  ;;  %s1811_s3 = sshll.u32 %s210_s29, 8 }
  0x3e   : > { %s2112_s28 = scalar_lea.vmem %s3125_s1, %s1843_s25  ;;  %s1845_s4 = sshll.u32 %s2502_s30, 5 }
  0x3f   : > { %v2115_v32 = vld [vmem:[%s2112_s28 + $0x1e0] sm:$0xff]  ;;  %v2118_v33 = vld [vmem:[%s2112_s28 + $0x1e8] sm:$0xff]  ;;  %v2121_v34 = vld [vmem:[%s2112_s28 + $0x1f0] sm:$0xff]  ;;  %s2505_s5 = scalar_lea.vmem [#allocation4], %s1811_s3  ;;  %s1844_s7 = sshll.u32 %s2106_s24, 6 }
  0x40   : > { %323 = vmatpush.msra.mxu0 %v2115_v32  ;;  %343 = vmatpush.msra.mxu1 %v2118_v33  ;;  %v2126_v35 = vld [vmem:[%s2112_s28 + $0x1c0] sm:$0xff]  ;;  %v2129_v36 = vld [vmem:[%s2112_s28 + $0x1c8] sm:$0xff]  ;;  %v2132_v37 = vld [vmem:[%s2112_s28 + $0x1d0] sm:$0xff]  ;;  %s253_s6 = scalar_lea.vmem %s2505_s5, %s1845_s4 [#allocation4]  ;;  %s2515_s11 = scalar_lea.vmem %s3126_s2, %s1844_s7 }
  0x41   : > { %363 = vmatpush.msra.mxu2 %v2121_v34  ;;  %v2136_v38 = vld [vmem:[%s2112_s28 + $0x1a0] sm:$0xff]  ;;  %v2139_v39 = vld [vmem:[%s2112_s28 + $0x1a8] sm:$0xff]  ;;  %v2144_v40 = vld [vmem:[%s2112_s28 + $0x1b0] sm:$0xff]  ;;  %s1818_s14 = sshll.u32 %s2502_s30, 3 }
  0x42   : > { %324 = vmatpush.msra.mxu0 %v2126_v35  ;;  %344 = vmatpush.msra.mxu1 %v2129_v36  ;;  %v2147_v41 = vld [vmem:[%s2112_s28 + $0x1f8] sm:$0xff]  ;;  %v2152_v42 = vld [vmem:[%s2112_s28 + $0x180] sm:$0xff]  ;;  %v2155_v43 = vld [vmem:[%s2112_s28 + $0x188] sm:$0xff]  ;;  %s429_s15 = scalar_lea.vmem %s2515_s11, %s1818_s14 }
  0x43   : > { %364 = vmatpush.msra.mxu2 %v2132_v37  ;;  %383 = vmatpush.msra.mxu3 %v2147_v41  ;;  %v2158_v44 = vld [vmem:[%s2112_s28 + $0x1d8] sm:$0xff]  ;;  %v2163_v45 = vld [vmem:[%s2112_s28 + $0x190] sm:$0xff]  ;;  %v2171_v47 = vld [vmem:[%s2112_s28 + $0x160] sm:$0xff]  ;;  %s2549_s17 = scalar_select %p249_p9, 1, 6 }
  0x44   : > { %325 = vmatpush.msra.mxu0 %v2136_v38  ;;  %345 = vmatpush.msra.mxu1 %v2139_v39  ;;  %v2166_v46 = vld [vmem:[%s2112_s28 + $0x1b8] sm:$0xff]  ;;  %v2174_v48 = vld [vmem:[%s2112_s28 + $0x168] sm:$0xff]  ;;  %v2179_v49 = vld [vmem:[%s2112_s28 + $0x170] sm:$0xff]  ;;  %s2644_s22 = scalar_select %p249_p9, 2, 5 }
  0x45   : > { %365 = vmatpush.msra.mxu2 %v2144_v40  ;;  %384 = vmatpush.msra.mxu3 %v2158_v44  ;;  %v2182_v50 = vld [vmem:[%s2112_s28 + $0x198] sm:$0xff]  ;;  %v2187_v51 = vld [vmem:[%s2112_s28 + $0x140] sm:$0xff]  ;;  %v2190_v52 = vld [vmem:[%s2112_s28 + $0x148] sm:$0xff]  ;;  %s1846_s18 = sshll.u32 %s2549_s17, 5  ;;  %s1821_s20 = sshll.u32 %s2549_s17, 3 }
  0x46   : > { %326 = vmatpush.msra.mxu0 %v2152_v42  ;;  %346 = vmatpush.msra.mxu1 %v2155_v43  ;;  %v2195_v53 = vld [vmem:[%s2112_s28 + $0x150] sm:$0xff]  ;;  %v2198_v54 = vld [vmem:[%s2112_s28 + $0x178] sm:$0xff]  ;;  %v2203_v55 = vld [vmem:[%s2112_s28 + $0x120] sm:$0xff]  ;;  %s434_s19 = scalar_lea.vmem %s2505_s5, %s1846_s18 [#allocation4]  ;;  %s610_s21 = scalar_lea.vmem %s2515_s11, %s1821_s20 }
  0x47   : > { %366 = vmatpush.msra.mxu2 %v2163_v45  ;;  %385 = vmatpush.msra.mxu3 %v2166_v46  ;;  %v2206_v56 = vld [vmem:[%s2112_s28 + $0x128] sm:$0xff]  ;;  %v2211_v57 = vld [vmem:[%s2112_s28 + $0x130] sm:$0xff]  ;;  %v2214_v58 = vld [vmem:[%s2112_s28 + $0x158] sm:$0xff]  ;;  %s1847_s23 = sshll.u32 %s2644_s22, 5  ;;  %s1824_s25 = sshll.u32 %s2644_s22, 3 }
  0x48   : > { %327 = vmatpush.msra.mxu0 %v2171_v47  ;;  %347 = vmatpush.msra.mxu1 %v2174_v48  ;;  %v2219_v59 = vld [vmem:[%s2112_s28 + $0x100] sm:$0xff]  ;;  %v2222_v60 = vld [vmem:[%s2112_s28 + $0x108] sm:$0xff]  ;;  %v2227_v61 = vld [vmem:[%s2112_s28 + $0x110] sm:$0xff]  ;;  %s615_s24 = scalar_lea.vmem %s2505_s5, %s1847_s23 [#allocation4]  ;;  %s791_s26 = scalar_lea.vmem %s2515_s11, %s1824_s25 }
  0x49   : > { %367 = vmatpush.msra.mxu2 %v2179_v49  ;;  %386 = vmatpush.msra.mxu3 %v2182_v50  ;;  %v2230_v62 = vld [vmem:[%s2112_s28 + $0x138] sm:$0xff]  ;;  %v2235_v63 = vld [vmem:[%s2112_s28 + $0xe0] sm:$0xff]  ;;  %v2238_v0 = vld [vmem:[%s2112_s28 + $0xe8] sm:$0xff]  ;;  %s2828_s27 = scalar_select %p249_p9, 3, 4 }
  0x4a   : > { %328 = vmatpush.msra.mxu0 %v2187_v51  ;;  %348 = vmatpush.msra.mxu1 %v2190_v52  ;;  %v2243_v1 = vld [vmem:[%s2112_s28 + $0xf0] sm:$0xff]  ;;  %v2246_v2 = vld [vmem:[%s2112_s28 + $0x118] sm:$0xff]  ;;  %v2251_v3 = vld [vmem:[%s2112_s28 + $0xc0] sm:$0xff]  ;;  %s3108_s25 = scalar_select %p249_p9, 7, 0 }
  0x4b   : > { %368 = vmatpush.msra.mxu2 %v2195_v53  ;;  %387 = vmatpush.msra.mxu3 %v2198_v54  ;;  %v2254_v4 = vld [vmem:[%s2112_s28 + $0xc8] sm:$0xff]  ;;  %v2259_v5 = vld [vmem:[%s2112_s28 + $0xd0] sm:$0xff]  ;;  %v2262_v6 = vld [vmem:[%s2112_s28 + $0xf8] sm:$0xff]  ;;  %s1848_s29 = sshll.u32 %s2828_s27, 5  ;;  %s1827_s3 = sshll.u32 %s2828_s27, 3 }
  0x4c   : > { %329 = vmatpush.msra.mxu0 %v2203_v55  ;;  %349 = vmatpush.msra.mxu1 %v2206_v56  ;;  %v2267_v7 = vld [vmem:[%s2112_s28 + $0xa0] sm:$0xff]  ;;  %v2270_v8 = vld [vmem:[%s2112_s28 + $0xa8] sm:$0xff]  ;;  %v2275_v9 = vld [vmem:[%s2112_s28 + $0xb0] sm:$0xff]  ;;  %s2858_s30 = scalar_lea.vmem %s2505_s5, %s1848_s29 [#allocation4]  ;;  %s972_s4 = scalar_lea.vmem %s2515_s11, %s1827_s3 }
  0x4d   : > { %369 = vmatpush.msra.mxu2 %v2211_v57  ;;  %388 = vmatpush.msra.mxu3 %v2214_v58  ;;  %v2278_v10 = vld [vmem:[%s2112_s28 + $0xd8] sm:$0xff]  ;;  %v2283_v11 = vld [vmem:[%s2112_s28 + $0x80] sm:$0xff]  ;;  %v2286_v12 = vld [vmem:[%s2112_s28 + $0x88] sm:$0xff]  ;;  %s1839_s12 = sshll.u32 %s3108_s25, 3 }
  0x4e   : > { %330 = vmatpush.msra.mxu0 %v2219_v59  ;;  %350 = vmatpush.msra.mxu1 %v2222_v60  ;;  %v2291_v13 = vld [vmem:[%s2112_s28 + $0x90] sm:$0xff]  ;;  %v2294_v14 = vld [vmem:[%s2112_s28 + $0xb8] sm:$0xff]  ;;  %v2299_v15 = vld [vmem:[%s2112_s28 + $0x60] sm:$0xff] }
  0x4f   : > { %370 = vmatpush.msra.mxu2 %v2227_v61  ;;  %389 = vmatpush.msra.mxu3 %v2230_v62  ;;  %v2302_v16 = vld [vmem:[%s2112_s28 + $0x68] sm:$0xff]  ;;  %v2307_v17 = vld [vmem:[%s2112_s28 + $0x70] sm:$0xff]  ;;  %v2310_v18 = vld [vmem:[%s2112_s28 + $0x98] sm:$0xff] }
  0x50   : > { %331 = vmatpush.msra.mxu0 %v2235_v63  ;;  %351 = vmatpush.msra.mxu1 %v2238_v0  ;;  %v2315_v19 = vld [vmem:[%s2112_s28 + $0x40] sm:$0xff]  ;;  %v2318_v20 = vld [vmem:[%s2112_s28 + $0x48] sm:$0xff]  ;;  %v2323_v21 = vld [vmem:[%s2112_s28 + $0x50] sm:$0xff] }
  0x51   : > { %371 = vmatpush.msra.mxu2 %v2243_v1  ;;  %390 = vmatpush.msra.mxu3 %v2246_v2  ;;  %v2326_v22 = vld [vmem:[%s2112_s28 + $0x78] sm:$0xff]  ;;  %v2331_v23 = vld [vmem:[%s2112_s28 + $0x20] sm:$0xff]  ;;  %v2334_v24 = vld [vmem:[%s2112_s28 + $0x28] sm:$0xff] }
  0x52   : > { %332 = vmatpush.msra.mxu0 %v2251_v3  ;;  %352 = vmatpush.msra.mxu1 %v2254_v4  ;;  %3150 = vst [vmem:[#allocation5_spill] sm:$0xff] %v2331_v23  ;;  %v2339_v25 = vld [vmem:[%s2112_s28 + $0x30] sm:$0xff]  ;;  %v2342_v26 = vld [vmem:[%s2112_s28 + $0x58] sm:$0xff]  ;;  %v2347_v27 = vld [vmem:[%s2112_s28] sm:$0xff] }
  0x53   : > { %372 = vmatpush.msra.mxu2 %v2259_v5  ;;  %391 = vmatpush.msra.mxu3 %v2262_v6  ;;  %v2350_v28 = vld [vmem:[%s2112_s28 + $0x8] sm:$0xff]  ;;  %v2355_v29 = vld [vmem:[%s2112_s28 + $0x10] sm:$0xff]  ;;  %v2362_v30 = vld [vmem:[%s2112_s28 + $0x38] sm:$0xff] }
  0x54   : > { %333 = vmatpush.msra.mxu0 %v2267_v7  ;;  %353 = vmatpush.msra.mxu1 %v2270_v8 }
  0x55   : > { %373 = vmatpush.msra.mxu2 %v2275_v9  ;;  %392 = vmatpush.msra.mxu3 %v2278_v10 }
  0x56   : > { %334 = vmatpush.msra.mxu0 %v2283_v11  ;;  %354 = vmatpush.msra.mxu1 %v2286_v12 }
  0x57   : > { %374 = vmatpush.msra.mxu2 %v2291_v13  ;;  %393 = vmatpush.msra.mxu3 %v2294_v14 }
  0x58   : > { %335 = vmatpush.msra.mxu0 %v2299_v15  ;;  %355 = vmatpush.msra.mxu1 %v2302_v16 }
  0x59   : > { %375 = vmatpush.msra.mxu2 %v2307_v17  ;;  %394 = vmatpush.msra.mxu3 %v2310_v18 }
  0x5a   : > { %336 = vmatpush.msra.mxu0 %v2315_v19  ;;  %356 = vmatpush.msra.mxu1 %v2318_v20 }
  0x5b   : > { %376 = vmatpush.msra.mxu2 %v2323_v21  ;;  %395 = vmatpush.msra.mxu3 %v2326_v22 }
  0x5c   : > { %337 = vmatpush.msra.mxu0 %v2331_v23  ;;  %357 = vmatpush.msra.mxu1 %v2334_v24  ;;  %v2366_v23 = vld [vmem:[%s2112_s28 + $0x18] sm:$0xff] }
  0x5d   : > { %377 = vmatpush.msra.mxu2 %v2339_v25  ;;  %396 = vmatpush.msra.mxu3 %v2342_v26 }
  0x5e   : > { %338 = vmatpush.msra.mxu0 %v2347_v27  ;;  %358 = vmatpush.msra.mxu1 %v2350_v28 }
  0x5f   : > { %378 = vmatpush.msra.mxu2 %v2355_v29  ;;  %339 = vmatmul.f32.vlgmr.msra.gmra.mxu0 %v1982_v31 }
  0x60   : > { %359 = vmatmul.f32.vlgmr.msra.gmra.mxu1 %v1982_v31  ;;  %379 = vmatmul.f32.vlgmr.msra.gmra.mxu2 %v1982_v31 }
  0x61   : > { %397 = vmatpush.msra.mxu3 %v2362_v30  ;;  %504 = vmatpush.msrb.mxu0 %v2115_v32 }
  0x62   : > { %524 = vmatpush.msrb.mxu1 %v2118_v33  ;;  %544 = vmatpush.msrb.mxu2 %v2121_v34 }
  0x63   : > { %398 = vmatpush.msra.mxu3 %v2366_v23  ;;  %505 = vmatpush.msrb.mxu0 %v2126_v35 }
  0x64   : > { %399 = vmatmul.f32.vlgmr.msra.gmra.mxu3 %v1982_v31  ;;  %525 = vmatpush.msrb.mxu1 %v2129_v36  ;;  %v3151_v31 = vld [vmem:[#allocation5_spill] sm:$0xff] }
  0x65   : > { %564 = vmatpush.msrb.mxu3 %v2147_v41  ;;  %545 = vmatpush.msrb.mxu2 %v2132_v37 }
  0x66   : > { %506 = vmatpush.msrb.mxu0 %v2136_v38  ;;  %526 = vmatpush.msrb.mxu1 %v2139_v39 }
  0x67   : > { %565 = vmatpush.msrb.mxu3 %v2158_v44  ;;  %546 = vmatpush.msrb.mxu2 %v2144_v40 }
  0x68   : > { %507 = vmatpush.msrb.mxu0 %v2152_v42  ;;  %527 = vmatpush.msrb.mxu1 %v2155_v43 }
  0x69   : > { %566 = vmatpush.msrb.mxu3 %v2166_v46  ;;  %547 = vmatpush.msrb.mxu2 %v2163_v45 }
  0x6a   : > { %508 = vmatpush.msrb.mxu0 %v2171_v47  ;;  %528 = vmatpush.msrb.mxu1 %v2174_v48 }
  0x6b   : > { %567 = vmatpush.msrb.mxu3 %v2182_v50  ;;  %548 = vmatpush.msrb.mxu2 %v2179_v49 }
  0x6c   : > { %509 = vmatpush.msrb.mxu0 %v2187_v51  ;;  %529 = vmatpush.msrb.mxu1 %v2190_v52 }
  0x6d   : > { %568 = vmatpush.msrb.mxu3 %v2198_v54  ;;  %549 = vmatpush.msrb.mxu2 %v2195_v53 }
  0x6e   : > { %510 = vmatpush.msrb.mxu0 %v2203_v55  ;;  %530 = vmatpush.msrb.mxu1 %v2206_v56 }
  0x6f   : > { %569 = vmatpush.msrb.mxu3 %v2214_v58  ;;  %550 = vmatpush.msrb.mxu2 %v2211_v57 }
  0x70   : > { %511 = vmatpush.msrb.mxu0 %v2219_v59  ;;  %531 = vmatpush.msrb.mxu1 %v2222_v60 }
  0x71   : > { %570 = vmatpush.msrb.mxu3 %v2230_v62  ;;  %551 = vmatpush.msrb.mxu2 %v2227_v61 }
  0x72   : > { %512 = vmatpush.msrb.mxu0 %v2235_v63  ;;  %532 = vmatpush.msrb.mxu1 %v2238_v0 }
  0x73   : > { %571 = vmatpush.msrb.mxu3 %v2246_v2  ;;  %552 = vmatpush.msrb.mxu2 %v2243_v1 }
  0x74   : > { %513 = vmatpush.msrb.mxu0 %v2251_v3  ;;  %533 = vmatpush.msrb.mxu1 %v2254_v4 }
  0x75   : > { %572 = vmatpush.msrb.mxu3 %v2262_v6  ;;  %553 = vmatpush.msrb.mxu2 %v2259_v5 }
  0x76   : > { %514 = vmatpush.msrb.mxu0 %v2267_v7  ;;  %534 = vmatpush.msrb.mxu1 %v2270_v8 }
  0x77   : > { %573 = vmatpush.msrb.mxu3 %v2278_v10  ;;  %554 = vmatpush.msrb.mxu2 %v2275_v9 }
  0x78   : > { %515 = vmatpush.msrb.mxu0 %v2283_v11  ;;  %535 = vmatpush.msrb.mxu1 %v2286_v12 }
  0x79   : > { %574 = vmatpush.msrb.mxu3 %v2294_v14  ;;  %555 = vmatpush.msrb.mxu2 %v2291_v13 }
  0x7a   : > { %516 = vmatpush.msrb.mxu0 %v2299_v15  ;;  %536 = vmatpush.msrb.mxu1 %v2302_v16 }
  0x7b   : > { %575 = vmatpush.msrb.mxu3 %v2310_v18  ;;  %556 = vmatpush.msrb.mxu2 %v2307_v17 }
  0x7c   : > { %517 = vmatpush.msrb.mxu0 %v2315_v19  ;;  %537 = vmatpush.msrb.mxu1 %v2318_v20 }
  0x7d   : > { %576 = vmatpush.msrb.mxu3 %v2326_v22  ;;  %557 = vmatpush.msrb.mxu2 %v2323_v21 }
  0x7e   : > { %518 = vmatpush.msrb.mxu0 %v3151_v31  ;;  %538 = vmatpush.msrb.mxu1 %v2334_v24 }
  0x7f   : > { %577 = vmatpush.msrb.mxu3 %v2342_v26  ;;  %558 = vmatpush.msrb.mxu2 %v2339_v25 }
  0x80   : > { %519 = vmatpush.msrb.mxu0 %v2347_v27  ;;  %539 = vmatpush.msrb.mxu1 %v2350_v28 }
  0x81   : > { %578 = vmatpush.msrb.mxu3 %v2362_v30  ;;  %559 = vmatpush.msrb.mxu2 %v2355_v29 }
  0x82   : > { %685 = vmatpush.msra.mxu0 %v2115_v32  ;;  %705 = vmatpush.msra.mxu1 %v2118_v33 }
  0x83   : > { %579 = vmatpush.msrb.mxu3 %v2366_v23  ;;  %725 = vmatpush.msra.mxu2 %v2121_v34 }
  0x84   : > { %686 = vmatpush.msra.mxu0 %v2126_v35  ;;  %706 = vmatpush.msra.mxu1 %v2129_v36 }
  0x85   : > { %745 = vmatpush.msra.mxu3 %v2147_v41  ;;  %726 = vmatpush.msra.mxu2 %v2132_v37 }
  0x86   : > { %687 = vmatpush.msra.mxu0 %v2136_v38  ;;  %707 = vmatpush.msra.mxu1 %v2139_v39 }
  0x87   : > { %746 = vmatpush.msra.mxu3 %v2158_v44  ;;  %727 = vmatpush.msra.mxu2 %v2144_v40 }
  0x88   : > { %688 = vmatpush.msra.mxu0 %v2152_v42  ;;  %708 = vmatpush.msra.mxu1 %v2155_v43 }
  0x89   : > { %747 = vmatpush.msra.mxu3 %v2166_v46  ;;  %728 = vmatpush.msra.mxu2 %v2163_v45 }
  0x8a   : > { %689 = vmatpush.msra.mxu0 %v2171_v47  ;;  %709 = vmatpush.msra.mxu1 %v2174_v48  ;;  %v254_v47 = vld [vmem:[%s253_s6] sm:$0xff]  ;;  %v255_v48 = vld [vmem:[%s253_s6 + $0x8] sm:$0xff] }
  0x8b   : > { %748 = vmatpush.msra.mxu3 %v2182_v50  ;;  %729 = vmatpush.msra.mxu2 %v2179_v49 }
  0x8c   : > { %690 = vmatpush.msra.mxu0 %v2187_v51  ;;  %710 = vmatpush.msra.mxu1 %v2190_v52 }
  0x8d   : > { %749 = vmatpush.msra.mxu3 %v2198_v54  ;;  %730 = vmatpush.msra.mxu2 %v2195_v53 }
  0x8e   : > { %691 = vmatpush.msra.mxu0 %v2203_v55  ;;  %711 = vmatpush.msra.mxu1 %v2206_v56 }
  0x8f   : > { %750 = vmatpush.msra.mxu3 %v2214_v58  ;;  %731 = vmatpush.msra.mxu2 %v2211_v57  ;;  %v256_v57 = vld [vmem:[%s253_s6 + $0x10] sm:$0xff] }
  0x90   : > { %692 = vmatpush.msra.mxu0 %v2219_v59  ;;  %712 = vmatpush.msra.mxu1 %v2222_v60 }
  0x91   : > { %751 = vmatpush.msra.mxu3 %v2230_v62  ;;  %732 = vmatpush.msra.mxu2 %v2227_v61  ;;  %v257_v61 = vld [vmem:[%s253_s6 + $0x18] sm:$0xff]  ;;  %s3011_s6 = scalar_select %p249_p9, 4, 3 }
  0x92   : > { %693 = vmatpush.msra.mxu0 %v2235_v63  ;;  %713 = vmatpush.msra.mxu1 %v2238_v0 }
  0x93   : > { %752 = vmatpush.msra.mxu3 %v2246_v2  ;;  %733 = vmatpush.msra.mxu2 %v2243_v1  ;;  %s1849_s7 = sshll.u32 %s3011_s6, 5  ;;  %s1830_s9 = sshll.u32 %s3011_s6, 3 }
  0x94   : > { %694 = vmatpush.msra.mxu0 %v2251_v3  ;;  %714 = vmatpush.msra.mxu1 %v2254_v4  ;;  %s977_s8 = scalar_lea.vmem %s2505_s5, %s1849_s7 [#allocation4]  ;;  %s1153_s14 = scalar_lea.vmem %s2515_s11, %s1830_s9 }
  0x95   : > { %753 = vmatpush.msra.mxu3 %v2262_v6  ;;  %734 = vmatpush.msra.mxu2 %v2259_v5 }
  0x96   : > { %695 = vmatpush.msra.mxu0 %v2267_v7  ;;  %715 = vmatpush.msra.mxu1 %v2270_v8 }
  0x97   : > { %754 = vmatpush.msra.mxu3 %v2278_v10  ;;  %735 = vmatpush.msra.mxu2 %v2275_v9 }
  0x98   : > { %696 = vmatpush.msra.mxu0 %v2283_v11  ;;  %716 = vmatpush.msra.mxu1 %v2286_v12 }
  0x99   : > { %755 = vmatpush.msra.mxu3 %v2294_v14  ;;  %736 = vmatpush.msra.mxu2 %v2291_v13 }
  0x9a   : > { %697 = vmatpush.msra.mxu0 %v2299_v15  ;;  %717 = vmatpush.msra.mxu1 %v2302_v16 }
  0x9b   : > { %756 = vmatpush.msra.mxu3 %v2310_v18  ;;  %737 = vmatpush.msra.mxu2 %v2307_v17 }
  0x9c   : > { %698 = vmatpush.msra.mxu0 %v2315_v19  ;;  %718 = vmatpush.msra.mxu1 %v2318_v20 }
  0x9d   : > { %757 = vmatpush.msra.mxu3 %v2326_v22  ;;  %738 = vmatpush.msra.mxu2 %v2323_v21 }
  0x9e   : > { %699 = vmatpush.msra.mxu0 %v3151_v31  ;;  %719 = vmatpush.msra.mxu1 %v2334_v24  ;;  %v2572_v31 = vld [vmem:[%s2112_s28 + $0x140] sm:$0xff] }
  0x9f   : > { %758 = vmatpush.msra.mxu3 %v2342_v26  ;;  %739 = vmatpush.msra.mxu2 %v2339_v25 }
  0xa0   : > { %700 = vmatpush.msra.mxu0 %v2347_v27  ;;  %720 = vmatpush.msra.mxu1 %v2350_v28  ;;  %v2560_v28 = vld [vmem:[%s2112_s28 + $0x160] sm:$0xff] }
  0xa1   : > { %759 = vmatpush.msra.mxu3 %v2362_v30  ;;  %740 = vmatpush.msra.mxu2 %v2355_v29  ;;  %v2563_v29 = vld [vmem:[%s2112_s28 + $0x168] sm:$0xff] }
  0xa3   : > { %760 = vmatpush.msra.mxu3 %v2366_v23 }
  0xdc   : > { %v340_v49 = vpop.f32.mrf.mxu0 }
  0xdd   : > { %v403_v51 = vadd.f32 %v340_v49, %v254_v47  ;;  %v360_v52 = vpop.f32.mrf.mxu1  ;;  %v2575_v47 = vld [vmem:[%s2112_s28 + $0x148] sm:$0xff]  ;;  %v2584_v49 = vld [vmem:[%s2112_s28 + $0x120] sm:$0xff] }
  0xde   : > { %v404_v53 = vadd.f32 %v360_v52, %v255_v48  ;;  %v2578_v48 = vld [vmem:[%s2112_s28 + $0x150] sm:$0xff] }
  0xdf   : > { %v407_v55 = vmul.f32 0.5, %v403_v51  ;;  %v2587_v51 = vld [vmem:[%s2112_s28 + $0x128] sm:$0xff]  ;;  %v2590_v52 = vld [vmem:[%s2112_s28 + $0x130] sm:$0xff] }
  0xe0   : > { %v411_v56 = vmul.f32 0.5, %v404_v53  ;;  %v2596_v53 = vld [vmem:[%s2112_s28 + $0x100] sm:$0xff] }
  0xe1   : > { %1878 = vtanh.f32 %v407_v55  ;;  %v2599_v55 = vld [vmem:[%s2112_s28 + $0x108] sm:$0xff] }
  0xe2   : > { %1880 = vtanh.f32 %v411_v56  ;;  %v2602_v56 = vld [vmem:[%s2112_s28 + $0x110] sm:$0xff] }
  0xe3   : > { %v380_v59 = vpop.f32.mrf.mxu2 }
  0xe4   : > { %v405_v60 = vadd.f32 %v380_v59, %v256_v57  ;;  %v2608_v57 = vld [vmem:[%s2112_s28 + $0xe0] sm:$0xff]  ;;  %v2611_v59 = vld [vmem:[%s2112_s28 + $0xe8] sm:$0xff] }
  0xe6   : > { %1882 = vtanh.f32 %v405_v60  ;;  %v2614_v60 = vld [vmem:[%s2112_s28 + $0xf0] sm:$0xff] }
  0xe7   : > { %v1879_v63 = vpop.eup %1878  ;;  %v400_v0 = vpop.f32.mrf.mxu3 }
  0xe8   : > { %v1881_v1 = vpop.eup %1880  ;;  %v409_v3 = vmul.f32 0.5, %v1879_v63  ;;  %v406_v4 = vadd.f32 %v400_v0, %v257_v61  ;;  %v2620_v61 = vld [vmem:[%s2112_s28 + $0xc0] sm:$0xff]  ;;  %v2623_v63 = vld [vmem:[%s2112_s28 + $0xc8] sm:$0xff]  ;;  %v2626_v0 = vld [vmem:[%s2112_s28 + $0xd0] sm:$0xff] }
  0xe9   : > { %v413_v5 = vmul.f32 0.5, %v1881_v1  ;;  %v2632_v1 = vld [vmem:[%s2112_s28 + $0xa0] sm:$0xff] }
  0xea   : > { %v410_v7 = vadd.f32 0.5, %v409_v3  ;;  %v416_v8 = vmul.f32 0.5, %v406_v4  ;;  %v2635_v3 = vld [vmem:[%s2112_s28 + $0xa8] sm:$0xff]  ;;  %v2638_v4 = vld [vmem:[%s2112_s28 + $0xb0] sm:$0xff] }
  0xeb   : > { %v414_v9 = vadd.f32 0.5, %v413_v5  ;;  %v2648_v5 = vld [vmem:[%s2112_s28 + $0x80] sm:$0xff] }
  0xec   : > { %v1883_v11 = vpop.eup %1882  ;;  %1884 = vtanh.f32 %v416_v8  ;;  %v2654_v8 = vld [vmem:[%s2112_s28 + $0x90] sm:$0xff] }
  0xed   : > { %v421_v12 = vmul.f32 0.0, %v414_v9  ;;  %v422_v13 = vmul.f32 %v1883_v11, %v410_v7  ;;  %v2651_v7 = vld [vmem:[%s2112_s28 + $0x88] sm:$0xff]  ;;  %v2660_v9 = vld [vmem:[%s2112_s28 + $0x60] sm:$0xff] }
  0xee   : > { %v2663_v11 = vld [vmem:[%s2112_s28 + $0x68] sm:$0xff] }
  0xef   : > { %v2508_v15 = vadd.f32 %v422_v13, %v421_v12  ;;  %v2666_v12 = vld [vmem:[%s2112_s28 + $0x70] sm:$0xff]  ;;  %v2673_v13 = vld [vmem:[%s2112_s28 + $0x40] sm:$0xff] }
  0xf0   : > { %3152 = vst [vmem:[#allocation5_spill] sm:$0xff] %v2673_v13 }
  0xf1   : > { %1886 = vtanh.f32 %v2508_v15 }
  0xf2   : > { %v1885_v16 = vpop.eup %1884 }
  0xf3   : > { %v418_v17 = vmul.f32 0.5, %v1885_v16  ;;  %v2679_v16 = vld [vmem:[%s2112_s28 + $0x50] sm:$0xff] }
  0xf4   : > { %3153 = vst [vmem:[#allocation6_spill] sm:$0xff] %v2679_v16 }
  0xf5   : > { %v419_v19 = vadd.f32 0.5, %v418_v17  ;;  %v2685_v17 = vld [vmem:[%s2112_s28 + $0x20] sm:$0xff] }
  0xf7   : > { %v1887_v20 = vpop.eup %1886 }
  0xf8   : > { %v425_v21 = vmul.f32 %v1887_v20, %v419_v19  ;;  %v2688_v19 = vld [vmem:[%s2112_s28 + $0x28] sm:$0xff]  ;;  %v2691_v20 = vld [vmem:[%s2112_s28 + $0x30] sm:$0xff] }
  0xf9   : > { %3154 = vst [vmem:[#allocation7_spill] sm:$0xff] %v2688_v19 }
  0xfa   : > { %430 = vst [vmem:[%s429_s15] sm:$0xff] %v425_v21  ;;  %520 = vmatmul.f32.vlgmr.msrb.gmra.mxu0 %v425_v21  ;;  %540 = vmatmul.f32.vlgmr.msrb.gmra.mxu1 %v425_v21  ;;  %s3051_s15 = scalar_select %p249_p9, 5, 2 }
  0xfb   : > { %560 = vmatmul.f32.vlgmr.msrb.gmra.mxu2 %v425_v21  ;;  %580 = vmatmul.f32.vlgmr.msrb.gmra.mxu3 %v425_v21  ;;  %3155 = vst [vmem:[#allocation8_spill] sm:$0xff] %v2691_v20  ;;  %v2698_v21 = vld [vmem:[%s2112_s28] sm:$0xff] }
  0xfc   : > { %866 = vmatpush.msrb.mxu0 %v2115_v32  ;;  %886 = vmatpush.msrb.mxu1 %v2118_v33  ;;  %v435_v32 = vld [vmem:[%s434_s19] sm:$0xff]  ;;  %v436_v33 = vld [vmem:[%s434_s19 + $0x8] sm:$0xff]  ;;  %3156 = vst [vmem:[#allocation9_spill] sm:$0xff] %v2698_v21  ;;  %s1850_s17 = sshll.u32 %s3051_s15, 5 }
  0xfd   : > { %906 = vmatpush.msrb.mxu2 %v2121_v34  ;;  %926 = vmatpush.msrb.mxu3 %v2147_v41  ;;  %v438_v41 = vld [vmem:[%s434_s19 + $0x18] sm:$0xff]  ;;  %s1158_s18 = scalar_lea.vmem %s2505_s5, %s1850_s17 [#allocation4] }
  0xfe   : > { %867 = vmatpush.msrb.mxu0 %v2126_v35  ;;  %887 = vmatpush.msrb.mxu1 %v2129_v36 }
  0xff   : > { %907 = vmatpush.msrb.mxu2 %v2132_v37  ;;  %927 = vmatpush.msrb.mxu3 %v2158_v44 }
 0x100   : > { %868 = vmatpush.msrb.mxu0 %v2136_v38  ;;  %888 = vmatpush.msrb.mxu1 %v2139_v39 }
 0x101   : > { %908 = vmatpush.msrb.mxu2 %v2144_v40  ;;  %928 = vmatpush.msrb.mxu3 %v2166_v46  ;;  %v437_v40 = vld [vmem:[%s434_s19 + $0x10] sm:$0xff]  ;;  %s1833_s19 = sshll.u32 %s3051_s15, 3 }
 0x102   : > { %869 = vmatpush.msrb.mxu0 %v2152_v42  ;;  %889 = vmatpush.msrb.mxu1 %v2155_v43  ;;  %s1334_s20 = scalar_lea.vmem %s2515_s11, %s1833_s19 }
 0x103   : > { %909 = vmatpush.msrb.mxu2 %v2163_v45  ;;  %929 = vmatpush.msrb.mxu3 %v2182_v50 }
 0x104   : > { %870 = vmatpush.msrb.mxu0 %v2560_v28  ;;  %890 = vmatpush.msrb.mxu1 %v2563_v29 }
 0x105   : > { %930 = vmatpush.msrb.mxu3 %v2198_v54 }
 0x106   : > { %871 = vmatpush.msrb.mxu0 %v2572_v31  ;;  %891 = vmatpush.msrb.mxu1 %v2575_v47 }
 0x107   : > { %931 = vmatpush.msrb.mxu3 %v2214_v58 }
 0x108   : > { %872 = vmatpush.msrb.mxu0 %v2584_v49  ;;  %892 = vmatpush.msrb.mxu1 %v2587_v51 }
 0x109   : > { %932 = vmatpush.msrb.mxu3 %v2230_v62 }
 0x10a   : > { %873 = vmatpush.msrb.mxu0 %v2596_v53  ;;  %893 = vmatpush.msrb.mxu1 %v2599_v55 }
 0x10b   : > { %933 = vmatpush.msrb.mxu3 %v2246_v2 }
 0x10c   : > { %874 = vmatpush.msrb.mxu0 %v2608_v57  ;;  %894 = vmatpush.msrb.mxu1 %v2611_v59 }
 0x10d   : > { %934 = vmatpush.msrb.mxu3 %v2262_v6 }
 0x10e   : > { %875 = vmatpush.msrb.mxu0 %v2620_v61  ;;  %895 = vmatpush.msrb.mxu1 %v2623_v63 }
 0x10f   : > { %935 = vmatpush.msrb.mxu3 %v2278_v10 }
 0x110   : > { %876 = vmatpush.msrb.mxu0 %v2632_v1  ;;  %896 = vmatpush.msrb.mxu1 %v2635_v3 }
 0x111   : > { %936 = vmatpush.msrb.mxu3 %v2294_v14 }
 0x112   : > { %877 = vmatpush.msrb.mxu0 %v2648_v5  ;;  %897 = vmatpush.msrb.mxu1 %v2651_v7 }
 0x113   : > { %937 = vmatpush.msrb.mxu3 %v2310_v18 }
 0x114   : > { %878 = vmatpush.msrb.mxu0 %v2660_v9  ;;  %898 = vmatpush.msrb.mxu1 %v2663_v11 }
 0x115   : > { %938 = vmatpush.msrb.mxu3 %v2326_v22 }
 0x116   : > { %879 = vmatpush.msrb.mxu0 %v2673_v13 }
 0x117   : > { %939 = vmatpush.msrb.mxu3 %v2342_v26 }
 0x118   : > { %880 = vmatpush.msrb.mxu0 %v2685_v17 }
 0x119   : > { %940 = vmatpush.msrb.mxu3 %v2362_v30  ;;  %v2566_v30 = vld [vmem:[%s2112_s28 + $0x170] sm:$0xff] }
 0x11a   : > { %910 = vmatpush.msrb.mxu2 %v2566_v30  ;;  %881 = vmatpush.msrb.mxu0 %v2698_v21 }
 0x11b   : > { %941 = vmatpush.msrb.mxu3 %v2366_v23 }
 0x11c   : > { %911 = vmatpush.msrb.mxu2 %v2578_v48 }
 0x11e   : > { %912 = vmatpush.msrb.mxu2 %v2590_v52 }
 0x120   : > { %913 = vmatpush.msrb.mxu2 %v2602_v56 }
 0x122   : > { %914 = vmatpush.msrb.mxu2 %v2614_v60 }
 0x124   : > { %915 = vmatpush.msrb.mxu2 %v2626_v0 }
 0x126   : > { %916 = vmatpush.msrb.mxu2 %v2638_v4 }
 0x128   : > { %917 = vmatpush.msrb.mxu2 %v2654_v8 }
 0x12a   : > { %918 = vmatpush.msrb.mxu2 %v2666_v12 }
 0x12c   : > { %919 = vmatpush.msrb.mxu2 %v2679_v16 }
 0x12e   : > { %920 = vmatpush.msrb.mxu2 %v2691_v20 }
 0x177   : > { %v521_v34 = vpop.f32.mrf.mxu0  ;;  %v541_v35 = vpop.f32.mrf.mxu1 }
 0x178   : > { %v584_v36 = vadd.f32 %v521_v34, %v435_v32  ;;  %v585_v37 = vadd.f32 %v541_v35, %v436_v33  ;;  %v2701_v32 = vld [vmem:[%s2112_s28 + $0x8] sm:$0xff]  ;;  %v2704_v33 = vld [vmem:[%s2112_s28 + $0x10] sm:$0xff]  ;;  %v616_v34 = vld [vmem:[%s615_s24] sm:$0xff] }
 0x179   : > { %3157 = vst [vmem:[#allocation10_spill] sm:$0xff] %v2701_v32  ;;  %v617_v35 = vld [vmem:[%s615_s24 + $0x8] sm:$0xff]  ;;  %921 = vmatpush.msrb.mxu2 %v2704_v33 }
 0x17a   : > { %v588_v38 = vmul.f32 0.5, %v584_v36  ;;  %v592_v39 = vmul.f32 0.5, %v585_v37  ;;  %v2710_v36 = vld [vmem:[%s2112_s28 + $0x1e0] sm:$0xff]  ;;  %v2713_v37 = vld [vmem:[%s2112_s28 + $0x1e8] sm:$0xff] }
 0x17b   : > { %3158 = vst [vmem:[#allocation11_spill] sm:$0xff] %v2710_v36 }
 0x17c   : > { %1888 = vtanh.f32 %v588_v38  ;;  %3159 = vst [vmem:[#allocation12_spill] sm:$0xff] %v2713_v37  ;;  %v2716_v38 = vld [vmem:[%s2112_s28 + $0x1f0] sm:$0xff] }
 0x17d   : > { %1890 = vtanh.f32 %v592_v39 }
 0x17e   : > { %v561_v42 = vpop.f32.mrf.mxu2  ;;  %v581_v43 = vpop.f32.mrf.mxu3 }
 0x17f   : > { %v586_v44 = vadd.f32 %v561_v42, %v437_v40  ;;  %v587_v45 = vadd.f32 %v581_v43, %v438_v41  ;;  %v2721_v41 = vld [vmem:[%s2112_s28 + $0x1f8] sm:$0xff] }
 0x181   : > { %1892 = vtanh.f32 %v586_v44  ;;  %v597_v46 = vmul.f32 0.5, %v587_v45 }
 0x182   : > { %v1889_v50 = vpop.eup %1888 }
 0x183   : > { %v1891_v54 = vpop.eup %1890  ;;  %v590_v58 = vmul.f32 0.5, %v1889_v50  ;;  %1894 = vtanh.f32 %v597_v46  ;;  %v618_v46 = vld [vmem:[%s615_s24 + $0x10] sm:$0xff]  ;;  %v619_v50 = vld [vmem:[%s615_s24 + $0x18] sm:$0xff] }
 0x184   : > { %v594_v62 = vmul.f32 0.5, %v1891_v54 }
 0x185   : > { %v591_v2 = vadd.f32 0.5, %v590_v58 }
 0x186   : > { %v595_v6 = vadd.f32 0.5, %v594_v62 }
 0x187   : > { %v1893_v10 = vpop.eup %1892 }
 0x188   : > { %v602_v14 = vmul.f32 %v595_v6, %v2508_v15  ;;  %v603_v18 = vmul.f32 %v1893_v10, %v591_v2  ;;  %v2676_v15 = vld [vmem:[%s2112_s28 + $0x48] sm:$0xff] }
 0x189   : > { %v1895_v22 = vpop.eup %1894  ;;  %899 = vmatpush.msrb.mxu1 %v2676_v15 }
 0x18a   : > { %v2554_v23 = vadd.f32 %v603_v18, %v602_v14  ;;  %v599_v24 = vmul.f32 0.5, %v1895_v22 }
 0x18b   : > { %900 = vmatpush.msrb.mxu1 %v2688_v19 }
 0x18c   : > { %1896 = vtanh.f32 %v2554_v23  ;;  %v600_v25 = vadd.f32 0.5, %v599_v24 }
 0x18d   : > { %901 = vmatpush.msrb.mxu1 %v2701_v32 }
 0x192   : > { %v1897_v26 = vpop.eup %1896 }
 0x193   : > { %v606_v27 = vmul.f32 %v1897_v26, %v600_v25 }
 0x195   : > { %611 = vst [vmem:[%s610_s21] sm:$0xff] %v606_v27  ;;  %701 = vmatmul.f32.vlgmr.msra.gmra.mxu0 %v606_v27  ;;  %721 = vmatmul.f32.vlgmr.msra.gmra.mxu1 %v606_v27  ;;  %s3084_s21 = scalar_select %p249_p9, 6, 1 }
 0x196   : > { %741 = vmatmul.f32.vlgmr.msra.gmra.mxu2 %v606_v27  ;;  %761 = vmatmul.f32.vlgmr.msra.gmra.mxu3 %v606_v27 }
 0x197   : > { %1047 = vmatpush.msra.mxu0 %v2710_v36  ;;  %1067 = vmatpush.msra.mxu1 %v2713_v37  ;;  %s1851_s22 = sshll.u32 %s3084_s21, 5 }
 0x198   : > { %1087 = vmatpush.msra.mxu2 %v2716_v38  ;;  %1107 = vmatpush.msra.mxu3 %v2721_v41  ;;  %s1339_s23 = scalar_lea.vmem %s2505_s5, %s1851_s22 [#allocation4] }
 0x212   : > { %v702_v39 = vpop.f32.mrf.mxu0  ;;  %v722_v40 = vpop.f32.mrf.mxu1 }
 0x213   : > { %v765_v42 = vadd.f32 %v702_v39, %v616_v34  ;;  %v766_v43 = vadd.f32 %v722_v40, %v617_v35 }
 0x215   : > { %v769_v44 = vmul.f32 0.5, %v765_v42  ;;  %v773_v45 = vmul.f32 0.5, %v766_v43 }
 0x217   : > { %1898 = vtanh.f32 %v769_v44 }
 0x218   : > { %1900 = vtanh.f32 %v773_v45  ;;  %v2735_v45 = vld [vmem:[%s2112_s28 + $0x1c8] sm:$0xff] }
 0x219   : > { %v742_v54 = vpop.f32.mrf.mxu2  ;;  %v762_v58 = vpop.f32.mrf.mxu3  ;;  %1068 = vmatpush.msra.mxu1 %v2735_v45 }
 0x21a   : > { %v767_v62 = vadd.f32 %v742_v54, %v618_v46  ;;  %v768_v2 = vadd.f32 %v762_v58, %v619_v50  ;;  %v2738_v46 = vld [vmem:[%s2112_s28 + $0x1d0] sm:$0xff]  ;;  %v2743_v50 = vld [vmem:[%s2112_s28 + $0x1d8] sm:$0xff]  ;;  %v2748_v54 = vld [vmem:[%s2112_s28 + $0x1a0] sm:$0xff] }
 0x21b   : > { %1088 = vmatpush.msra.mxu2 %v2738_v46  ;;  %1108 = vmatpush.msra.mxu3 %v2743_v50  ;;  %v2751_v58 = vld [vmem:[%s2112_s28 + $0x1a8] sm:$0xff] }
 0x21c   : > { %1902 = vtanh.f32 %v767_v62  ;;  %v778_v6 = vmul.f32 0.5, %v768_v2  ;;  %v2754_v62 = vld [vmem:[%s2112_s28 + $0x1b0] sm:$0xff]  ;;  %1069 = vmatpush.msra.mxu1 %v2751_v58  ;;  %v2759_v2 = vld [vmem:[%s2112_s28 + $0x1b8] sm:$0xff] }
 0x21d   : > { %v1899_v10 = vpop.eup %1898  ;;  %1089 = vmatpush.msra.mxu2 %v2754_v62  ;;  %1109 = vmatpush.msra.mxu3 %v2759_v2 }
 0x21e   : > { %v1901_v14 = vpop.eup %1900  ;;  %v771_v18 = vmul.f32 0.5, %v1899_v10  ;;  %1904 = vtanh.f32 %v778_v6  ;;  %v2764_v6 = vld [vmem:[%s2112_s28 + $0x180] sm:$0xff]  ;;  %v2767_v10 = vld [vmem:[%s2112_s28 + $0x188] sm:$0xff] }
 0x21f   : > { %v775_v22 = vmul.f32 0.5, %v1901_v14  ;;  %v2770_v14 = vld [vmem:[%s2112_s28 + $0x190] sm:$0xff]  ;;  %1070 = vmatpush.msra.mxu1 %v2767_v10 }
 0x220   : > { %v772_v24 = vadd.f32 0.5, %v771_v18  ;;  %v2775_v18 = vld [vmem:[%s2112_s28 + $0x198] sm:$0xff]  ;;  %1090 = vmatpush.msra.mxu2 %v2770_v14 }
 0x221   : > { %v776_v25 = vadd.f32 0.5, %v775_v22  ;;  %1110 = vmatpush.msra.mxu3 %v2775_v18  ;;  %v2780_v22 = vld [vmem:[%s2112_s28 + $0x178] sm:$0xff]  ;;  %1071 = vmatpush.msra.mxu1 %v2563_v29 }
 0x222   : > { %v1903_v26 = vpop.eup %1902  ;;  %1091 = vmatpush.msra.mxu2 %v2566_v30 }
 0x223   : > { %v783_v27 = vmul.f32 %v776_v25, %v2554_v23  ;;  %v784_v34 = vmul.f32 %v1903_v26, %v772_v24  ;;  %v2732_v23 = vld [vmem:[%s2112_s28 + $0x1c0] sm:$0xff]  ;;  %1111 = vmatpush.msra.mxu3 %v2780_v22  ;;  %v2787_v24 = vld [vmem:[%s2112_s28 + $0x158] sm:$0xff]  ;;  %1072 = vmatpush.msra.mxu1 %v2575_v47 }
 0x224   : > { %v1905_v35 = vpop.eup %1904  ;;  %1048 = vmatpush.msra.mxu0 %v2732_v23  ;;  %1092 = vmatpush.msra.mxu2 %v2578_v48  ;;  %v2794_v25 = vld [vmem:[%s2112_s28 + $0x138] sm:$0xff] }
 0x225   : > { %v2726_v39 = vadd.f32 %v784_v34, %v783_v27  ;;  %v780_v40 = vmul.f32 0.5, %v1905_v35  ;;  %1112 = vmatpush.msra.mxu3 %v2787_v24  ;;  %1073 = vmatpush.msra.mxu1 %v2587_v51  ;;  %v2801_v26 = vld [vmem:[%s2112_s28 + $0x118] sm:$0xff] }
 0x226   : > { %1049 = vmatpush.msra.mxu0 %v2748_v54  ;;  %1093 = vmatpush.msra.mxu2 %v2590_v52  ;;  %v2808_v27 = vld [vmem:[%s2112_s28 + $0xf8] sm:$0xff] }
 0x227   : > { %1906 = vtanh.f32 %v2726_v39  ;;  %v781_v42 = vadd.f32 0.5, %v780_v40  ;;  %1113 = vmatpush.msra.mxu3 %v2794_v25  ;;  %1074 = vmatpush.msra.mxu1 %v2599_v55  ;;  %v2815_v34 = vld [vmem:[%s2112_s28 + $0xd8] sm:$0xff] }
 0x228   : > { %1050 = vmatpush.msra.mxu0 %v2764_v6  ;;  %1094 = vmatpush.msra.mxu2 %v2602_v56  ;;  %v2822_v35 = vld [vmem:[%s2112_s28 + $0xb8] sm:$0xff] }
 0x229   : > { %1114 = vmatpush.msra.mxu3 %v2801_v26  ;;  %1075 = vmatpush.msra.mxu1 %v2611_v59  ;;  %v2833_v40 = vld [vmem:[%s2112_s28 + $0x98] sm:$0xff] }
 0x22a   : > { %1051 = vmatpush.msra.mxu0 %v2560_v28  ;;  %1095 = vmatpush.msra.mxu2 %v2614_v60 }
 0x22b   : > { %1115 = vmatpush.msra.mxu3 %v2808_v27  ;;  %1076 = vmatpush.msra.mxu1 %v2623_v63 }
 0x22c   : > { %1052 = vmatpush.msra.mxu0 %v2572_v31  ;;  %1096 = vmatpush.msra.mxu2 %v2626_v0 }
 0x22d   : > { %v1907_v43 = vpop.eup %1906  ;;  %1116 = vmatpush.msra.mxu3 %v2815_v34  ;;  %1077 = vmatpush.msra.mxu1 %v2635_v3 }
 0x22e   : > { %v787_v44 = vmul.f32 %v1907_v43, %v781_v42  ;;  %1053 = vmatpush.msra.mxu0 %v2584_v49  ;;  %1097 = vmatpush.msra.mxu2 %v2638_v4  ;;  %v2840_v42 = vld [vmem:[%s2112_s28 + $0x78] sm:$0xff] }
 0x22f   : > { %1117 = vmatpush.msra.mxu3 %v2822_v35  ;;  %1078 = vmatpush.msra.mxu1 %v2651_v7  ;;  %3160 = vst [vmem:[#allocation13_spill] sm:$0xff] %v2840_v42  ;;  %v2848_v43 = vld [vmem:[%s2112_s28 + $0x58] sm:$0xff] }
 0x230   : > { %792 = vst [vmem:[%s791_s26] sm:$0xff] %v787_v44  ;;  %882 = vmatmul.f32.vlgmr.msrb.gmra.mxu0 %v787_v44  ;;  %902 = vmatmul.f32.vlgmr.msrb.gmra.mxu1 %v787_v44  ;;  %s1852_s26 = sshll.u32 %s3108_s25, 5 }
 0x231   : > { %922 = vmatmul.f32.vlgmr.msrb.gmra.mxu2 %v787_v44  ;;  %942 = vmatmul.f32.vlgmr.msrb.gmra.mxu3 %v787_v44  ;;  %3161 = vst [vmem:[#allocation14_spill] sm:$0xff] %v2848_v43  ;;  %v2855_v44 = vld [vmem:[%s2112_s28 + $0x38] sm:$0xff]  ;;  %s1520_s27 = scalar_lea.vmem %s2505_s5, %s1852_s26 [#allocation4]  ;;  %s1696_s5 = scalar_lea.vmem %s2515_s11, %s1839_s12 }
 0x232   : > { %1054 = vmatpush.msra.mxu0 %v2596_v53  ;;  %1098 = vmatpush.msra.mxu2 %v2654_v8 }
 0x233   : > { %1118 = vmatpush.msra.mxu3 %v2833_v40  ;;  %1079 = vmatpush.msra.mxu1 %v2663_v11 }
 0x234   : > { %1055 = vmatpush.msra.mxu0 %v2608_v57  ;;  %1099 = vmatpush.msra.mxu2 %v2666_v12 }
 0x235   : > { %1119 = vmatpush.msra.mxu3 %v2840_v42  ;;  %1080 = vmatpush.msra.mxu1 %v2676_v15 }
 0x236   : > { %1056 = vmatpush.msra.mxu0 %v2620_v61  ;;  %1100 = vmatpush.msra.mxu2 %v2679_v16  ;;  %v798_v16 = vld [vmem:[%s2858_s30 + $0x8] sm:$0xff] }
 0x237   : > { %1120 = vmatpush.msra.mxu3 %v2848_v43  ;;  %1081 = vmatpush.msra.mxu1 %v2688_v19  ;;  %v797_v43 = vld [vmem:[%s2858_s30] sm:$0xff] }
 0x238   : > { %1057 = vmatpush.msra.mxu0 %v2632_v1  ;;  %1101 = vmatpush.msra.mxu2 %v2691_v20 }
 0x239   : > { %1121 = vmatpush.msra.mxu3 %v2855_v44  ;;  %1082 = vmatpush.msra.mxu1 %v2701_v32 }
 0x23a   : > { %1058 = vmatpush.msra.mxu0 %v2648_v5  ;;  %1102 = vmatpush.msra.mxu2 %v2704_v33 }
 0x23b   : > { %1248 = vmatpush.msrb.mxu1 %v2713_v37 }
 0x23c   : > { %1059 = vmatpush.msra.mxu0 %v2660_v9  ;;  %1268 = vmatpush.msrb.mxu2 %v2716_v38 }
 0x23d   : > { %1249 = vmatpush.msrb.mxu1 %v2735_v45 }
 0x23e   : > { %1060 = vmatpush.msra.mxu0 %v2673_v13  ;;  %v2865_v13 = vld [vmem:[%s2112_s28 + $0x18] sm:$0xff]  ;;  %1269 = vmatpush.msrb.mxu2 %v2738_v46 }
 0x23f   : > { %1122 = vmatpush.msra.mxu3 %v2865_v13  ;;  %1250 = vmatpush.msrb.mxu1 %v2751_v58 }
 0x240   : > { %1061 = vmatpush.msra.mxu0 %v2685_v17  ;;  %1270 = vmatpush.msrb.mxu2 %v2754_v62 }
 0x241   : > { %1288 = vmatpush.msrb.mxu3 %v2721_v41  ;;  %1251 = vmatpush.msrb.mxu1 %v2767_v10 }
 0x242   : > { %1062 = vmatpush.msra.mxu0 %v2698_v21  ;;  %1271 = vmatpush.msrb.mxu2 %v2770_v14 }
 0x243   : > { %1289 = vmatpush.msrb.mxu3 %v2743_v50  ;;  %1252 = vmatpush.msrb.mxu1 %v2563_v29 }
 0x244   : > { %1228 = vmatpush.msrb.mxu0 %v2710_v36  ;;  %1272 = vmatpush.msrb.mxu2 %v2566_v30 }
 0x245   : > { %1290 = vmatpush.msrb.mxu3 %v2759_v2  ;;  %1253 = vmatpush.msrb.mxu1 %v2575_v47 }
 0x246   : > { %1229 = vmatpush.msrb.mxu0 %v2732_v23  ;;  %1273 = vmatpush.msrb.mxu2 %v2578_v48 }
 0x247   : > { %1291 = vmatpush.msrb.mxu3 %v2775_v18  ;;  %1254 = vmatpush.msrb.mxu1 %v2587_v51 }
 0x248   : > { %1230 = vmatpush.msrb.mxu0 %v2748_v54  ;;  %1274 = vmatpush.msrb.mxu2 %v2590_v52 }
 0x249   : > { %1292 = vmatpush.msrb.mxu3 %v2780_v22  ;;  %1255 = vmatpush.msrb.mxu1 %v2599_v55 }
 0x24a   : > { %1231 = vmatpush.msrb.mxu0 %v2764_v6  ;;  %1275 = vmatpush.msrb.mxu2 %v2602_v56 }
 0x24b   : > { %1293 = vmatpush.msrb.mxu3 %v2787_v24  ;;  %1256 = vmatpush.msrb.mxu1 %v2611_v59 }
 0x24c   : > { %1232 = vmatpush.msrb.mxu0 %v2560_v28  ;;  %1276 = vmatpush.msrb.mxu2 %v2614_v60 }
 0x24d   : > { %1294 = vmatpush.msrb.mxu3 %v2794_v25  ;;  %1257 = vmatpush.msrb.mxu1 %v2623_v63 }
 0x24e   : > { %1233 = vmatpush.msrb.mxu0 %v2572_v31  ;;  %1277 = vmatpush.msrb.mxu2 %v2626_v0 }
 0x24f   : > { %1295 = vmatpush.msrb.mxu3 %v2801_v26  ;;  %1258 = vmatpush.msrb.mxu1 %v2635_v3 }
 0x250   : > { %1234 = vmatpush.msrb.mxu0 %v2584_v49  ;;  %1278 = vmatpush.msrb.mxu2 %v2638_v4 }
 0x251   : > { %1296 = vmatpush.msrb.mxu3 %v2808_v27  ;;  %1259 = vmatpush.msrb.mxu1 %v2651_v7 }
 0x252   : > { %1235 = vmatpush.msrb.mxu0 %v2596_v53  ;;  %1279 = vmatpush.msrb.mxu2 %v2654_v8 }
 0x253   : > { %1297 = vmatpush.msrb.mxu3 %v2815_v34  ;;  %1260 = vmatpush.msrb.mxu1 %v2663_v11 }
 0x254   : > { %1236 = vmatpush.msrb.mxu0 %v2608_v57  ;;  %1280 = vmatpush.msrb.mxu2 %v2666_v12 }
 0x255   : > { %1298 = vmatpush.msrb.mxu3 %v2822_v35  ;;  %1261 = vmatpush.msrb.mxu1 %v2676_v15 }
 0x256   : > { %1237 = vmatpush.msrb.mxu0 %v2620_v61 }
 0x257   : > { %1299 = vmatpush.msrb.mxu3 %v2833_v40 }
 0x258   : > { %1238 = vmatpush.msrb.mxu0 %v2632_v1 }
 0x259   : > { %1300 = vmatpush.msrb.mxu3 %v2840_v42  ;;  %v3168_v42 = vld [vmem:[#allocation9_spill] sm:$0xff] }
 0x25a   : > { %1239 = vmatpush.msrb.mxu0 %v2648_v5 }
 0x25c   : > { %1240 = vmatpush.msrb.mxu0 %v2660_v9 }
 0x2ad   : > { %v883_v19 = vpop.f32.mrf.mxu0  ;;  %v903_v20 = vpop.f32.mrf.mxu1 }
 0x2ae   : > { %v946_v21 = vadd.f32 %v883_v19, %v797_v43  ;;  %v947_v32 = vadd.f32 %v903_v20, %v798_v16  ;;  %v799_v16 = vld [vmem:[%s2858_s30 + $0x10] sm:$0xff]  ;;  %v800_v19 = vld [vmem:[%s2858_s30 + $0x18] sm:$0xff] }
 0x2b0   : > { %v950_v36 = vmul.f32 0.5, %v946_v21  ;;  %v954_v37 = vmul.f32 0.5, %v947_v32 }
 0x2b2   : > { %1908 = vtanh.f32 %v950_v36 }
 0x2b3   : > { %1910 = vtanh.f32 %v954_v37 }
 0x2b4   : > { %v923_v20 = vpop.f32.mrf.mxu2  ;;  %v943_v21 = vpop.f32.mrf.mxu3 }
 0x2b5   : > { %v948_v32 = vadd.f32 %v923_v20, %v799_v16  ;;  %v949_v43 = vadd.f32 %v943_v21, %v800_v19 }
 0x2b7   : > { %1912 = vtanh.f32 %v948_v32  ;;  %v959_v36 = vmul.f32 0.5, %v949_v43 }
 0x2b8   : > { %v1909_v37 = vpop.eup %1908 }
 0x2b9   : > { %v1911_v16 = vpop.eup %1910  ;;  %v952_v19 = vmul.f32 0.5, %v1909_v37  ;;  %1914 = vtanh.f32 %v959_v36 }
 0x2ba   : > { %v956_v20 = vmul.f32 0.5, %v1911_v16 }
 0x2bb   : > { %v953_v21 = vadd.f32 0.5, %v952_v19 }
 0x2bc   : > { %v957_v32 = vadd.f32 0.5, %v956_v20  ;;  %v3163_v20 = vld [vmem:[#allocation5_spill] sm:$0xff] }
 0x2bd   : > { %v1913_v43 = vpop.eup %1912  ;;  %1241 = vmatpush.msrb.mxu0 %v3163_v20  ;;  %v3169_v20 = vld [vmem:[#allocation10_spill] sm:$0xff] }
 0x2be   : > { %v964_v36 = vmul.f32 %v957_v32, %v2726_v39  ;;  %v965_v37 = vmul.f32 %v1913_v43, %v953_v21  ;;  %v3164_v32 = vld [vmem:[#allocation6_spill] sm:$0xff] }
 0x2bf   : > { %v1915_v16 = vpop.eup %1914  ;;  %1281 = vmatpush.msrb.mxu2 %v3164_v32  ;;  %v3165_v43 = vld [vmem:[#allocation14_spill] sm:$0xff]  ;;  %1242 = vmatpush.msrb.mxu0 %v2685_v17 }
 0x2c0   : > { %v2916_v19 = vadd.f32 %v965_v37, %v964_v36  ;;  %v961_v39 = vmul.f32 0.5, %v1915_v16  ;;  %1301 = vmatpush.msrb.mxu3 %v3165_v43  ;;  %v3166_v37 = vld [vmem:[#allocation7_spill] sm:$0xff] }
 0x2c1   : > { %1262 = vmatpush.msrb.mxu1 %v3166_v37  ;;  %1243 = vmatpush.msrb.mxu0 %v3168_v42 }
 0x2c2   : > { %3162 = vst [vmem:[#allocation15_spill] sm:$0xff] %v2916_v19  ;;  %1916 = vtanh.f32 %v2916_v19  ;;  %v962_v21 = vadd.f32 0.5, %v961_v39  ;;  %v3167_v19 = vld [vmem:[#allocation8_spill] sm:$0xff]  ;;  %1302 = vmatpush.msrb.mxu3 %v2855_v44  ;;  %v3170_v39 = vld [vmem:[#allocation11_spill] sm:$0xff] }
 0x2c3   : > { %1282 = vmatpush.msrb.mxu2 %v3167_v19  ;;  %1263 = vmatpush.msrb.mxu1 %v3169_v20 }
 0x2c4   : > { %1303 = vmatpush.msrb.mxu3 %v2865_v13 }
 0x2c5   : > { %1283 = vmatpush.msrb.mxu2 %v2704_v33 }
 0x2c8   : > { %v1917_v36 = vpop.eup %1916 }
 0x2c9   : > { %v968_v16 = vmul.f32 %v1917_v36, %v962_v21  ;;  %v3171_v21 = vld [vmem:[#allocation12_spill] sm:$0xff] }
 0x2cb   : > { %973 = vst [vmem:[%s972_s4] sm:$0xff] %v968_v16  ;;  %1063 = vmatmul.f32.vlgmr.msra.gmra.mxu0 %v968_v16  ;;  %1083 = vmatmul.f32.vlgmr.msra.gmra.mxu1 %v968_v16 }
 0x2cc   : > { %1103 = vmatmul.f32.vlgmr.msra.gmra.mxu2 %v968_v16  ;;  %1123 = vmatmul.f32.vlgmr.msra.gmra.mxu3 %v968_v16 }
 0x2cd   : > { %1409 = vmatpush.msra.mxu0 %v3170_v39  ;;  %1429 = vmatpush.msra.mxu1 %v3171_v21 }
 0x2ce   : > { %1449 = vmatpush.msra.mxu2 %v2716_v38  ;;  %1469 = vmatpush.msra.mxu3 %v2721_v41 }
 0x2cf   : > { %1410 = vmatpush.msra.mxu0 %v2732_v23  ;;  %1430 = vmatpush.msra.mxu1 %v2735_v45 }
 0x2d0   : > { %1450 = vmatpush.msra.mxu2 %v2738_v46  ;;  %1470 = vmatpush.msra.mxu3 %v2743_v50 }
 0x2d1   : > { %1411 = vmatpush.msra.mxu0 %v2748_v54  ;;  %1431 = vmatpush.msra.mxu1 %v2751_v58 }
 0x2d2   : > { %1451 = vmatpush.msra.mxu2 %v2754_v62  ;;  %1471 = vmatpush.msra.mxu3 %v2759_v2 }
 0x2d3   : > { %1412 = vmatpush.msra.mxu0 %v2764_v6  ;;  %1432 = vmatpush.msra.mxu1 %v2767_v10 }
 0x2d4   : > { %1452 = vmatpush.msra.mxu2 %v2770_v14  ;;  %1472 = vmatpush.msra.mxu3 %v2775_v18 }
 0x2d5   : > { %1413 = vmatpush.msra.mxu0 %v2560_v28  ;;  %1433 = vmatpush.msra.mxu1 %v2563_v29  ;;  %v3172_v28 = vld [vmem:[#allocation13_spill] sm:$0xff] }
 0x2d6   : > { %1453 = vmatpush.msra.mxu2 %v2566_v30  ;;  %1473 = vmatpush.msra.mxu3 %v2780_v22  ;;  %v3173_v29 = vld [vmem:[#allocation5_spill] sm:$0xff] }
 0x2d7   : > { %1414 = vmatpush.msra.mxu0 %v2572_v31  ;;  %1434 = vmatpush.msra.mxu1 %v2575_v47  ;;  %v978_v30 = vld [vmem:[%s977_s8] sm:$0xff]  ;;  %v979_v31 = vld [vmem:[%s977_s8 + $0x8] sm:$0xff] }
 0x2d8   : > { %1454 = vmatpush.msra.mxu2 %v2578_v48  ;;  %1474 = vmatpush.msra.mxu3 %v2787_v24 }
 0x2d9   : > { %1415 = vmatpush.msra.mxu0 %v2584_v49  ;;  %1435 = vmatpush.msra.mxu1 %v2587_v51 }
 0x2da   : > { %1455 = vmatpush.msra.mxu2 %v2590_v52  ;;  %1475 = vmatpush.msra.mxu3 %v2794_v25 }
 0x2db   : > { %1416 = vmatpush.msra.mxu0 %v2596_v53  ;;  %1436 = vmatpush.msra.mxu1 %v2599_v55  ;;  %v980_v55 = vld [vmem:[%s977_s8 + $0x10] sm:$0xff] }
 0x2dc   : > { %1456 = vmatpush.msra.mxu2 %v2602_v56  ;;  %1476 = vmatpush.msra.mxu3 %v2801_v26  ;;  %v981_v56 = vld [vmem:[%s977_s8 + $0x18] sm:$0xff] }
 0x2dd   : > { %1417 = vmatpush.msra.mxu0 %v2608_v57  ;;  %1437 = vmatpush.msra.mxu1 %v2611_v59 }
 0x2de   : > { %1457 = vmatpush.msra.mxu2 %v2614_v60  ;;  %1477 = vmatpush.msra.mxu3 %v2808_v27 }
 0x2df   : > { %1418 = vmatpush.msra.mxu0 %v2620_v61  ;;  %1438 = vmatpush.msra.mxu1 %v2623_v63 }
 0x2e0   : > { %1458 = vmatpush.msra.mxu2 %v2626_v0  ;;  %1478 = vmatpush.msra.mxu3 %v2815_v34 }
 0x2e1   : > { %1419 = vmatpush.msra.mxu0 %v2632_v1  ;;  %1439 = vmatpush.msra.mxu1 %v2635_v3 }
 0x2e2   : > { %1459 = vmatpush.msra.mxu2 %v2638_v4  ;;  %1479 = vmatpush.msra.mxu3 %v2822_v35 }
 0x2e3   : > { %1420 = vmatpush.msra.mxu0 %v2648_v5  ;;  %1440 = vmatpush.msra.mxu1 %v2651_v7 }
 0x2e4   : > { %1460 = vmatpush.msra.mxu2 %v2654_v8  ;;  %1480 = vmatpush.msra.mxu3 %v2833_v40 }
 0x2e5   : > { %1421 = vmatpush.msra.mxu0 %v2660_v9  ;;  %1441 = vmatpush.msra.mxu1 %v2663_v11  ;;  %v3174_v9 = vld [vmem:[#allocation15_spill] sm:$0xff] }
 0x2e6   : > { %1461 = vmatpush.msra.mxu2 %v2666_v12  ;;  %1481 = vmatpush.msra.mxu3 %v3172_v28 }
 0x2e7   : > { %1422 = vmatpush.msra.mxu0 %v3173_v29  ;;  %1442 = vmatpush.msra.mxu1 %v2676_v15  ;;  %v1572_v29 = vld [vmem:[%s2112_s28 + $0x170] sm:$0xff] }
 0x2e8   : > { %1462 = vmatpush.msra.mxu2 %v3164_v32  ;;  %1482 = vmatpush.msra.mxu3 %v3165_v43 }
 0x2e9   : > { %1423 = vmatpush.msra.mxu0 %v2685_v17  ;;  %1443 = vmatpush.msra.mxu1 %v3166_v37 }
 0x2ea   : > { %1463 = vmatpush.msra.mxu2 %v3167_v19  ;;  %1483 = vmatpush.msra.mxu3 %v2855_v44 }
 0x2eb   : > { %1424 = vmatpush.msra.mxu0 %v3168_v42  ;;  %1444 = vmatpush.msra.mxu1 %v3169_v20 }
 0x2ec   : > { %1464 = vmatpush.msra.mxu2 %v2704_v33  ;;  %1484 = vmatpush.msra.mxu3 %v2865_v13 }
 0x348   : > { %v1064_v47 = vpop.f32.mrf.mxu0  ;;  %v1084_v48 = vpop.f32.mrf.mxu1 }
 0x349   : > { %v1127_v49 = vadd.f32 %v1064_v47, %v978_v30  ;;  %v1128_v51 = vadd.f32 %v1084_v48, %v979_v31  ;;  %v1566_v30 = vld [vmem:[%s2112_s28 + $0x140] sm:$0xff]  ;;  %v1567_v31 = vld [vmem:[%s2112_s28 + $0x148] sm:$0xff]  ;;  %v1568_v47 = vld [vmem:[%s2112_s28 + $0x150] sm:$0xff] }
 0x34a   : > { %v1562_v48 = vld [vmem:[%s2112_s28 + $0x120] sm:$0xff] }
 0x34b   : > { %v1131_v52 = vmul.f32 0.5, %v1127_v49  ;;  %v1135_v53 = vmul.f32 0.5, %v1128_v51  ;;  %v1563_v49 = vld [vmem:[%s2112_s28 + $0x128] sm:$0xff]  ;;  %v1564_v51 = vld [vmem:[%s2112_s28 + $0x130] sm:$0xff] }
 0x34d   : > { %1918 = vtanh.f32 %v1131_v52  ;;  %v1558_v52 = vld [vmem:[%s2112_s28 + $0x100] sm:$0xff] }
 0x34e   : > { %1920 = vtanh.f32 %v1135_v53  ;;  %v1559_v53 = vld [vmem:[%s2112_s28 + $0x108] sm:$0xff] }
 0x34f   : > { %v1104_v57 = vpop.f32.mrf.mxu2  ;;  %v1124_v59 = vpop.f32.mrf.mxu3 }
 0x350   : > { %v1129_v60 = vadd.f32 %v1104_v57, %v980_v55  ;;  %v1130_v61 = vadd.f32 %v1124_v59, %v981_v56  ;;  %v1560_v55 = vld [vmem:[%s2112_s28 + $0x110] sm:$0xff]  ;;  %v1554_v56 = vld [vmem:[%s2112_s28 + $0xe0] sm:$0xff]  ;;  %v1555_v57 = vld [vmem:[%s2112_s28 + $0xe8] sm:$0xff] }
 0x351   : > { %v1556_v59 = vld [vmem:[%s2112_s28 + $0xf0] sm:$0xff] }
 0x352   : > { %1922 = vtanh.f32 %v1129_v60  ;;  %v1140_v63 = vmul.f32 0.5, %v1130_v61  ;;  %v1550_v60 = vld [vmem:[%s2112_s28 + $0xc0] sm:$0xff]  ;;  %v1551_v61 = vld [vmem:[%s2112_s28 + $0xc8] sm:$0xff] }
 0x353   : > { %v1919_v0 = vpop.eup %1918 }
 0x354   : > { %v1921_v1 = vpop.eup %1920  ;;  %v1133_v3 = vmul.f32 0.5, %v1919_v0  ;;  %1924 = vtanh.f32 %v1140_v63  ;;  %v1552_v63 = vld [vmem:[%s2112_s28 + $0xd0] sm:$0xff]  ;;  %v1546_v0 = vld [vmem:[%s2112_s28 + $0xa0] sm:$0xff] }
 0x355   : > { %v1137_v4 = vmul.f32 0.5, %v1921_v1  ;;  %v1547_v1 = vld [vmem:[%s2112_s28 + $0xa8] sm:$0xff] }
 0x356   : > { %v1134_v5 = vadd.f32 0.5, %v1133_v3  ;;  %v1548_v3 = vld [vmem:[%s2112_s28 + $0xb0] sm:$0xff] }
 0x357   : > { %v1138_v7 = vadd.f32 0.5, %v1137_v4  ;;  %v1542_v4 = vld [vmem:[%s2112_s28 + $0x80] sm:$0xff] }
 0x358   : > { %v1923_v8 = vpop.eup %1922 }
 0x359   : > { %v1145_v11 = vmul.f32 %v1138_v7, %v3174_v9  ;;  %v1146_v12 = vmul.f32 %v1923_v8, %v1134_v5  ;;  %v1543_v5 = vld [vmem:[%s2112_s28 + $0x88] sm:$0xff]  ;;  %v1544_v7 = vld [vmem:[%s2112_s28 + $0x90] sm:$0xff]  ;;  %v1538_v8 = vld [vmem:[%s2112_s28 + $0x60] sm:$0xff] }
 0x35a   : > { %v1925_v15 = vpop.eup %1924  ;;  %v1539_v9 = vld [vmem:[%s2112_s28 + $0x68] sm:$0xff] }
 0x35b   : > { %v3016_v17 = vadd.f32 %v1146_v12, %v1145_v11  ;;  %v1142_v33 = vmul.f32 0.5, %v1925_v15  ;;  %v1540_v11 = vld [vmem:[%s2112_s28 + $0x70] sm:$0xff]  ;;  %v1534_v12 = vld [vmem:[%s2112_s28 + $0x40] sm:$0xff]  ;;  %v1535_v15 = vld [vmem:[%s2112_s28 + $0x48] sm:$0xff] }
 0x35d   : > { %1926 = vtanh.f32 %v3016_v17  ;;  %v1143_v42 = vadd.f32 0.5, %v1142_v33  ;;  %v1530_v33 = vld [vmem:[%s2112_s28 + $0x20] sm:$0xff] }
 0x363   : > { %v1927_v19 = vpop.eup %1926 }
 0x364   : > { %v1149_v20 = vmul.f32 %v1927_v19, %v1143_v42  ;;  %v1531_v42 = vld [vmem:[%s2112_s28 + $0x28] sm:$0xff]  ;;  %v1532_v19 = vld [vmem:[%s2112_s28 + $0x30] sm:$0xff] }
 0x366   : > { %1154 = vst [vmem:[%s1153_s14] sm:$0xff] %v1149_v20  ;;  %1244 = vmatmul.f32.vlgmr.msrb.gmra.mxu0 %v1149_v20  ;;  %1264 = vmatmul.f32.vlgmr.msrb.gmra.mxu1 %v1149_v20 }
 0x367   : > { %1284 = vmatmul.f32.vlgmr.msrb.gmra.mxu2 %v1149_v20  ;;  %1304 = vmatmul.f32.vlgmr.msrb.gmra.mxu3 %v1149_v20  ;;  %v1526_v20 = vld [vmem:[%s2112_s28] sm:$0xff] }
 0x368   : > { %1590 = vmatpush.msrb.mxu0 %v3170_v39  ;;  %1610 = vmatpush.msrb.mxu1 %v3171_v21  ;;  %v1570_v21 = vld [vmem:[%s2112_s28 + $0x160] sm:$0xff] }
 0x369   : > { %1630 = vmatpush.msrb.mxu2 %v2716_v38  ;;  %1650 = vmatpush.msrb.mxu3 %v2721_v41  ;;  %v1159_v38 = vld [vmem:[%s1158_s18] sm:$0xff]  ;;  %v1160_v41 = vld [vmem:[%s1158_s18 + $0x8] sm:$0xff] }
 0x36a   : > { %1591 = vmatpush.msrb.mxu0 %v2732_v23  ;;  %1611 = vmatpush.msrb.mxu1 %v2735_v45 }
 0x36b   : > { %1631 = vmatpush.msrb.mxu2 %v2738_v46  ;;  %1651 = vmatpush.msrb.mxu3 %v2743_v50 }
 0x36c   : > { %1592 = vmatpush.msrb.mxu0 %v2748_v54  ;;  %1612 = vmatpush.msrb.mxu1 %v2751_v58 }
 0x36d   : > { %1632 = vmatpush.msrb.mxu2 %v2754_v62  ;;  %1652 = vmatpush.msrb.mxu3 %v2759_v2  ;;  %v1161_v62 = vld [vmem:[%s1158_s18 + $0x10] sm:$0xff]  ;;  %v1162_v2 = vld [vmem:[%s1158_s18 + $0x18] sm:$0xff] }
 0x36e   : > { %1593 = vmatpush.msrb.mxu0 %v2764_v6  ;;  %1613 = vmatpush.msrb.mxu1 %v2767_v10 }
 0x36f   : > { %1633 = vmatpush.msrb.mxu2 %v2770_v14  ;;  %1653 = vmatpush.msrb.mxu3 %v2775_v18 }
 0x370   : > { %1594 = vmatpush.msrb.mxu0 %v1570_v21 }
 0x371   : > { %1654 = vmatpush.msrb.mxu3 %v2780_v22  ;;  %1634 = vmatpush.msrb.mxu2 %v1572_v29 }
 0x372   : > { %1595 = vmatpush.msrb.mxu0 %v1566_v30  ;;  %v1522_v30 = vld [vmem:[%s1520_s27 + $0x8] sm:$0xff] }
 0x373   : > { %1655 = vmatpush.msrb.mxu3 %v2787_v24  ;;  %1635 = vmatpush.msrb.mxu2 %v1568_v47 }
 0x374   : > { %1596 = vmatpush.msrb.mxu0 %v1562_v48 }
 0x375   : > { %1656 = vmatpush.msrb.mxu3 %v2794_v25  ;;  %1636 = vmatpush.msrb.mxu2 %v1564_v51 }
 0x376   : > { %1597 = vmatpush.msrb.mxu0 %v1558_v52 }
 0x377   : > { %1657 = vmatpush.msrb.mxu3 %v2801_v26  ;;  %1637 = vmatpush.msrb.mxu2 %v1560_v55  ;;  %v1524_v55 = vld [vmem:[%s1520_s27 + $0x18] sm:$0xff] }
 0x378   : > { %1598 = vmatpush.msrb.mxu0 %v1554_v56 }
 0x379   : > { %1658 = vmatpush.msrb.mxu3 %v2808_v27  ;;  %1638 = vmatpush.msrb.mxu2 %v1556_v59 }
 0x37a   : > { %1599 = vmatpush.msrb.mxu0 %v1550_v60 }
 0x37b   : > { %1659 = vmatpush.msrb.mxu3 %v2815_v34  ;;  %1639 = vmatpush.msrb.mxu2 %v1552_v63 }
 0x37c   : > { %1600 = vmatpush.msrb.mxu0 %v1546_v0 }
 0x37d   : > { %1660 = vmatpush.msrb.mxu3 %v2822_v35  ;;  %1640 = vmatpush.msrb.mxu2 %v1548_v3 }
 0x37e   : > { %1601 = vmatpush.msrb.mxu0 %v1542_v4 }
 0x37f   : > { %1661 = vmatpush.msrb.mxu3 %v2833_v40  ;;  %1641 = vmatpush.msrb.mxu2 %v1544_v7 }
 0x380   : > { %1602 = vmatpush.msrb.mxu0 %v1538_v8 }
 0x381   : > { %1662 = vmatpush.msrb.mxu3 %v3172_v28  ;;  %v1571_v28 = vld [vmem:[%s2112_s28 + $0x168] sm:$0xff]  ;;  %1642 = vmatpush.msrb.mxu2 %v1540_v11 }
 0x382   : > { %1614 = vmatpush.msrb.mxu1 %v1571_v28  ;;  %1603 = vmatpush.msrb.mxu0 %v1534_v12 }
 0x383   : > { %1663 = vmatpush.msrb.mxu3 %v3165_v43 }
 0x384   : > { %1615 = vmatpush.msrb.mxu1 %v1567_v31  ;;  %1604 = vmatpush.msrb.mxu0 %v1530_v33 }
 0x385   : > { %1664 = vmatpush.msrb.mxu3 %v2855_v44 }
 0x386   : > { %1616 = vmatpush.msrb.mxu1 %v1563_v49  ;;  %1605 = vmatpush.msrb.mxu0 %v1526_v20 }
 0x387   : > { %1665 = vmatpush.msrb.mxu3 %v2865_v13 }
 0x388   : > { %1617 = vmatpush.msrb.mxu1 %v1559_v53  ;;  %v1523_v53 = vld [vmem:[%s1520_s27 + $0x10] sm:$0xff] }
 0x38a   : > { %1618 = vmatpush.msrb.mxu1 %v1555_v57 }
 0x38c   : > { %1619 = vmatpush.msrb.mxu1 %v1551_v61 }
 0x38e   : > { %1620 = vmatpush.msrb.mxu1 %v1547_v1 }
 0x390   : > { %1621 = vmatpush.msrb.mxu1 %v1543_v5 }
 0x392   : > { %1622 = vmatpush.msrb.mxu1 %v1539_v9 }
 0x394   : > { %1623 = vmatpush.msrb.mxu1 %v1535_v15 }
 0x396   : > { %1624 = vmatpush.msrb.mxu1 %v1531_v42 }
 0x3e3   : > { %v1245_v23 = vpop.f32.mrf.mxu0  ;;  %v1265_v45 = vpop.f32.mrf.mxu1 }
 0x3e4   : > { %v1308_v46 = vadd.f32 %v1245_v23, %v1159_v38  ;;  %v1309_v50 = vadd.f32 %v1265_v45, %v1160_v41  ;;  %v1527_v38 = vld [vmem:[%s2112_s28 + $0x8] sm:$0xff]  ;;  %v1528_v41 = vld [vmem:[%s2112_s28 + $0x10] sm:$0xff]  ;;  %v1340_v23 = vld [vmem:[%s1339_s23] sm:$0xff] }
 0x3e5   : > { %1625 = vmatpush.msrb.mxu1 %v1527_v38  ;;  %v1341_v45 = vld [vmem:[%s1339_s23 + $0x8] sm:$0xff] }
 0x3e6   : > { %v1312_v54 = vmul.f32 0.5, %v1308_v46  ;;  %v1316_v58 = vmul.f32 0.5, %v1309_v50 }
 0x3e8   : > { %1928 = vtanh.f32 %v1312_v54 }
 0x3e9   : > { %1930 = vtanh.f32 %v1316_v58 }
 0x3ea   : > { %v1285_v6 = vpop.f32.mrf.mxu2  ;;  %v1305_v13 = vpop.f32.mrf.mxu3 }
 0x3eb   : > { %v1310_v10 = vadd.f32 %v1285_v6, %v1161_v62  ;;  %v1311_v14 = vadd.f32 %v1305_v13, %v1162_v2  ;;  %v1342_v6 = vld [vmem:[%s1339_s23 + $0x10] sm:$0xff]  ;;  %v1343_v13 = vld [vmem:[%s1339_s23 + $0x18] sm:$0xff] }
 0x3ed   : > { %1932 = vtanh.f32 %v1310_v10  ;;  %v1321_v18 = vmul.f32 0.5, %v1311_v14 }
 0x3ee   : > { %v1929_v22 = vpop.eup %1928 }
 0x3ef   : > { %v1931_v24 = vpop.eup %1930  ;;  %v1314_v25 = vmul.f32 0.5, %v1929_v22  ;;  %1934 = vtanh.f32 %v1321_v18 }
 0x3f0   : > { %v1318_v26 = vmul.f32 0.5, %v1931_v24 }
 0x3f1   : > { %v1315_v27 = vadd.f32 0.5, %v1314_v25 }
 0x3f2   : > { %v1319_v34 = vadd.f32 0.5, %v1318_v26 }
 0x3f3   : > { %v1933_v35 = vpop.eup %1932 }
 0x3f4   : > { %v1326_v40 = vmul.f32 %v1319_v34, %v3016_v17  ;;  %v1327_v44 = vmul.f32 %v1933_v35, %v1315_v27  ;;  %v1536_v17 = vld [vmem:[%s2112_s28 + $0x50] sm:$0xff]  ;;  %s1836_s28 = sshll.u32 %s3084_s21, 3 }
 0x3f5   : > { %v1935_v32 = vpop.eup %1934  ;;  %1643 = vmatpush.msrb.mxu2 %v1536_v17  ;;  %s1515_s24 = scalar_lea.vmem %s2515_s11, %s1836_s28 }
 0x3f6   : > { %v3056_v43 = vadd.f32 %v1327_v44, %v1326_v40  ;;  %v1323_v36 = vmul.f32 0.5, %v1935_v32 }
 0x3f7   : > { %1644 = vmatpush.msrb.mxu2 %v1532_v19 }
 0x3f8   : > { %1936 = vtanh.f32 %v3056_v43  ;;  %v1324_v37 = vadd.f32 0.5, %v1323_v36 }
 0x3f9   : > { %1645 = vmatpush.msrb.mxu2 %v1528_v41 }
 0x3fe   : > { %v1937_v16 = vpop.eup %1936 }
 0x3ff   : > { %v1330_v39 = vmul.f32 %v1937_v16, %v1324_v37 }
 0x401   : > { %1335 = vst [vmem:[%s1334_s20] sm:$0xff] %v1330_v39  ;;  %1425 = vmatmul.f32.vlgmr.msra.gmra.mxu0 %v1330_v39  ;;  %1445 = vmatmul.f32.vlgmr.msra.gmra.mxu1 %v1330_v39 }
 0x402   : > { %1465 = vmatmul.f32.vlgmr.msra.gmra.mxu2 %v1330_v39  ;;  %1485 = vmatmul.f32.vlgmr.msra.gmra.mxu3 %v1330_v39 }
 0x47e   : > { %v1426_v46 = vpop.f32.mrf.mxu0  ;;  %v1446_v50 = vpop.f32.mrf.mxu1 }
 0x47f   : > { %v1489_v54 = vadd.f32 %v1426_v46, %v1340_v23  ;;  %v1490_v58 = vadd.f32 %v1446_v50, %v1341_v45 }
 0x481   : > { %v1493_v62 = vmul.f32 0.5, %v1489_v54  ;;  %v1497_v2 = vmul.f32 0.5, %v1490_v58 }
 0x483   : > { %1938 = vtanh.f32 %v1493_v62 }
 0x484   : > { %1940 = vtanh.f32 %v1497_v2 }
 0x485   : > { %v1466_v10 = vpop.f32.mrf.mxu2  ;;  %v1486_v14 = vpop.f32.mrf.mxu3 }
 0x486   : > { %v1491_v18 = vadd.f32 %v1466_v10, %v1342_v6  ;;  %v1492_v22 = vadd.f32 %v1486_v14, %v1343_v13 }
 0x488   : > { %1942 = vtanh.f32 %v1491_v18  ;;  %v1502_v24 = vmul.f32 0.5, %v1492_v22 }
 0x489   : > { %v1939_v25 = vpop.eup %1938 }
 0x48a   : > { %v1941_v26 = vpop.eup %1940  ;;  %v1495_v27 = vmul.f32 0.5, %v1939_v25  ;;  %1944 = vtanh.f32 %v1502_v24 }
 0x48b   : > { %v1499_v34 = vmul.f32 0.5, %v1941_v26 }
 0x48c   : > { %v1496_v35 = vadd.f32 0.5, %v1495_v27 }
 0x48d   : > { %v1500_v40 = vadd.f32 0.5, %v1499_v34 }
 0x48e   : > { %v1943_v44 = vpop.eup %1942 }
 0x48f   : > { %v1507_v32 = vmul.f32 %v1500_v40, %v3056_v43  ;;  %v1508_v36 = vmul.f32 %v1943_v44, %v1496_v35  ;;  %v1521_v43 = vld [vmem:[%s1520_s27] sm:$0xff] }
 0x490   : > { %v1945_v37 = vpop.eup %1944 }
 0x491   : > { %v1509_v16 = vadd.f32 %v1508_v36, %v1507_v32  ;;  %v1504_v39 = vmul.f32 0.5, %v1945_v37 }
 0x493   : > { %1946 = vtanh.f32 %v1509_v16  ;;  %v1505_v21 = vadd.f32 0.5, %v1504_v39 }
 0x499   : > { %v1947_v28 = vpop.eup %1946 }
 0x49a   : > { %v1511_v29 = vmul.f32 %v1947_v28, %v1505_v21 }
 0x49c   : > { %1516 = vst [vmem:[%s1515_s24] sm:$0xff] %v1511_v29  ;;  %1606 = vmatmul.f32.vlgmr.msrb.gmra.mxu0 %v1511_v29  ;;  %1626 = vmatmul.f32.vlgmr.msrb.gmra.mxu1 %v1511_v29 }
 0x49d   : > { %1646 = vmatmul.f32.vlgmr.msrb.gmra.mxu2 %v1511_v29  ;;  %1666 = vmatmul.f32.vlgmr.msrb.gmra.mxu3 %v1511_v29 }
 0x519   : > { %v1607_v31 = vpop.f32.mrf.mxu0  ;;  %v1627_v47 = vpop.f32.mrf.mxu1 }
 0x51a   : > { %v1670_v48 = vadd.f32 %v1607_v31, %v1521_v43  ;;  %v1671_v49 = vadd.f32 %v1627_v47, %v1522_v30 }
 0x51c   : > { %v1674_v51 = vmul.f32 0.5, %v1670_v48  ;;  %v1678_v52 = vmul.f32 0.5, %v1671_v49 }
 0x51e   : > { %1948 = vtanh.f32 %v1674_v51 }
 0x51f   : > { %1950 = vtanh.f32 %v1678_v52 }
 0x520   : > { %v1647_v56 = vpop.f32.mrf.mxu2  ;;  %v1667_v57 = vpop.f32.mrf.mxu3 }
 0x521   : > { %v1672_v59 = vadd.f32 %v1647_v56, %v1523_v53  ;;  %v1673_v60 = vadd.f32 %v1667_v57, %v1524_v55 }
 0x523   : > { %1952 = vtanh.f32 %v1672_v59  ;;  %v1683_v61 = vmul.f32 0.5, %v1673_v60 }
 0x524   : > { %v1949_v63 = vpop.eup %1948 }
 0x525   : > { %v1951_v0 = vpop.eup %1950  ;;  %v1676_v1 = vmul.f32 0.5, %v1949_v63  ;;  %1954 = vtanh.f32 %v1683_v61 }
 0x526   : > { %v1680_v3 = vmul.f32 0.5, %v1951_v0 }
 0x527   : > { %v1677_v4 = vadd.f32 0.5, %v1676_v1 }
 0x528   : > { %v1681_v5 = vadd.f32 0.5, %v1680_v3 }
 0x529   : > { %v1953_v7 = vpop.eup %1952 }
 0x52a   : > { %v1688_v8 = vmul.f32 %v1681_v5, %v1509_v16  ;;  %v1689_v9 = vmul.f32 %v1953_v7, %v1677_v4 }
 0x52b   : > { %v1955_v11 = vpop.eup %1954 }
 0x52c   : > { %v1690_v12 = vadd.f32 %v1689_v9, %v1688_v8  ;;  %v1685_v15 = vmul.f32 0.5, %v1955_v11 }
 0x52e   : > { %1956 = vtanh.f32 %v1690_v12  ;;  %v1686_v17 = vadd.f32 0.5, %v1685_v15 }
 0x534   : > { %v1957_v33 = vpop.eup %1956 }
 0x535   : > { %v1692_v42 = vmul.f32 %v1957_v33, %v1686_v17 }
 0x537   : > { %1697 = vst [vmem:[%s1696_s5] sm:$0xff] %v1692_v42 }
 0x538 PF: > { %p9_p10 = scmp.ge.s32.totalorder %s2017_s13, 4   ;;  %s3175_s9 = smov %s1976_s10 }
 0x539   : > { %s3176_s10 = smov %s2026_s16  ;;  %s3177_s11 = smov %s2017_s13 }
 0x53a   :  { %11 = sbr.rel (!%p9_p10) target bundleno = 2 (0x2), region = 105 }

</bundles_post_ra>
